<compile_context>
chip_gen: v7x
topology: tpu7x:2x2x1
jax: 0.10.0
libtpu: 0.0.40
codegen_flags: <defaults>
</compile_context>

<pallas_src>
import functools

import jax
import jax.numpy as jnp
from jax.experimental import pallas as pl
from jax.experimental.pallas import tpu as pltpu

# ----------------------------------------------------------------------------
# Static LeNet-5 dimensions (32x32 single-channel input).
# ----------------------------------------------------------------------------
H0 = 32                      # input spatial size == per-image row-block height
K = 5                        # conv kernel size
C0, C1, C2, C3 = 1, 6, 16, 120
F1, NCLS = 84, 10
OUT_PAD = 128                # lane-dense padded logit width

H1 = H0 - K + 1              # 28  conv1 output spatial
P1 = H1 // 2                 # 14  pool1 output spatial
H2 = P1 - K + 1              # 10  conv2 output spatial
P2 = H2 // 2                 # 5   pool2 output spatial

NEG = -1e30                  # bias for padded logit lanes (drops out of softmax)


# ----------------------------------------------------------------------------
# In-kernel helpers.
# ----------------------------------------------------------------------------
def _dot(a, b):
    """MXU dot: bf16 x bf16 operands, f32 accumulation."""
    return jnp.dot(a.astype(jnp.bfloat16), b.astype(jnp.bfloat16),
                   preferred_element_type=jnp.float32)


def _shift_rows(a, k):
    """result[i] = a[i + k] (rows wrapped at the bottom land only in padding
    rows of the per-image 32-row blocks, which are never read)."""
    if k == 0:
        return a
    return jnp.concatenate([a[k:], a[:k]], axis=0)


def _conv(a, w_ref, b_ref, stride):
    """Conv layer on a row-stacked activation (TB*32, W_in*C_in).

    The kj (width) taps are folded into the width-Toeplitz weight; the 5 ki
    (height) taps are supplied by concatenating 5 row-shifted copies of the
    input along the contraction axis -> ONE fat MXU dot per conv layer.
    """
    lhs = jnp.concatenate([_shift_rows(a, ki * stride) for ki in range(K)],
                          axis=1)
    return jnp.maximum(_dot(lhs, w_ref[...]) + b_ref[...], 0.0)


def _pool(a, sel_ref, stride):
    """2x2/2 maxpool: row pair-max via a sublane shift (VPU), column
    compaction via two 0/1 selection matmuls (MXU).  The row stride of the
    layout doubles (no row compaction needed, so no batch-sized selectors)."""
    pr = jnp.maximum(a, _shift_rows(a, stride))
    return jnp.maximum(_dot(pr, sel_ref[0]), _dot(pr, sel_ref[1]))


def _lenet5_kernel(x_ref, w1_ref, b1_ref, p1_ref, w2_ref, b2_ref, p2_ref,
                   rsel_ref, w3_ref, b3_ref, l1w_ref, l1b_ref, l2w_ref,
                   l2b_ref, out_ref):
    # Activation layout: (TB*32, W*C); image b, spatial row r -> matrix row
    # b*32 + r*stride.  Rows beyond the valid height are don't-care padding.
    x = x_ref[...].astype(jnp.float32)            # (TB*32, 32)   stride 1

    a1 = _conv(x, w1_ref, b1_ref, 1)              # (TB*32, 168)  stride 1, 28 rows
    q1 = _pool(a1, p1_ref, 1)                     # (TB*32, 84)   stride 2, 14 rows
    a2 = _conv(q1, w2_ref, b2_ref, 2)             # (TB*32, 160)  stride 2, 10 rows
    q2 = _pool(a2, p2_ref, 2)                     # (TB*32, 80)   stride 4, 5 rows

    # Flatten: gather the 5 valid rows (stride 4) of each image into one row.
    rsel = rsel_ref[...]                          # (TB, TB*32) 0/1
    feat = jnp.concatenate(
        [_dot(rsel, _shift_rows(q2, 4 * ki)) for ki in range(K)], axis=1)

    # conv3 (== FC 400->120) + dense head, all at (TB, .).
    a3 = jnp.maximum(_dot(feat, w3_ref[...]) + b3_ref[...], 0.0)    # (TB, 120)
    h = jnp.maximum(_dot(a3, l1w_ref[...]) + l1b_ref[...], 0.0)     # (TB, 84)
    logits = _dot(h, l2w_ref[...]) + l2b_ref[...]                   # (TB, 128)

    # stable log-softmax; padded lanes carry bias NEG -> exp underflows to 0.
    m = jnp.max(logits, axis=-1, keepdims=True)
    s = logits - m
    logp = s - jnp.log(jnp.sum(jnp.exp(s), axis=-1, keepdims=True))
    out_ref[...] = logp.astype(out_ref.dtype)     # lane-dense (TB, 128) store


# ----------------------------------------------------------------------------
# One-time host-side weight packing (hoisted out of the jit'd forward).
# ----------------------------------------------------------------------------
def init_params(key):
    """PyTorch-style LeNet-5 parameters (uniform +-1/sqrt(fan_in))."""
    def uni(k, shape, fan_in):
        bound = 1.0 / jnp.sqrt(jnp.float32(fan_in))
        return jax.random.uniform(k, shape, jnp.float32, -bound, bound)

    ks = jax.random.split(key, 10)
    return {
        "conv1_w": uni(ks[0], (C1, C0, K, K), C0 * K * K),
        "conv1_b": uni(ks[1], (C1,), C0 * K * K),
        "conv2_w": uni(ks[2], (C2, C1, K, K), C1 * K * K),
        "conv2_b": uni(ks[3], (C2,), C1 * K * K),
        "conv3_w": uni(ks[4], (C3, C2, K, K), C2 * K * K),
        "conv3_b": uni(ks[5], (C3,), C2 * K * K),
        "lin1_w": uni(ks[6], (F1, C3), C3),      # PyTorch Linear: (out, in)
        "lin1_b": uni(ks[7], (F1,), C3),
        "lin2_w": uni(ks[8], (NCLS, F1), F1),
        "lin2_b": uni(ks[9], (NCLS,), F1),
    }


def _pack_conv(w, w_in):
    """(OC,IC,K,K) torch conv weight -> (K*W_in*IC, W_out*OC) ki-stacked
    width-Toeplitz matrix: row ki*(W_in*IC) + (w+kj)*IC + ic, col w*OC + oc
    holds W[oc, ic, ki, kj]."""
    oc, ic, kh, kw = w.shape
    w_out = w_in - kw + 1
    slabs = []
    for ki in range(kh):
        m = jnp.zeros((w_in * ic, w_out * oc), jnp.float32)
        for kj in range(kw):
            shift_eye = jnp.eye(w_in, w_out, k=-kj, dtype=jnp.float32)
            m = m + jnp.kron(shift_eye, w[:, :, ki, kj].T.astype(jnp.float32))
        slabs.append(m)
    return jnp.concatenate(slabs, axis=0)


def _pool_colsel(w_in, c):
    """0/1 column-compaction matrices (even/odd width positions) for a 2x2/2
    maxpool on a (rows, w_in*c) activation -> (2, w_in*c, (w_in//2)*c)."""
    w_out = w_in // 2
    idx = jnp.arange(w_out)
    e_even = jnp.zeros((w_in, w_out), jnp.float32).at[2 * idx, idx].set(1.0)
    e_odd = jnp.zeros((w_in, w_out), jnp.float32).at[2 * idx + 1, idx].set(1.0)
    eye_c = jnp.eye(c, dtype=jnp.float32)
    return jnp.stack([jnp.kron(e_even, eye_c), jnp.kron(e_odd, eye_c)], axis=0)


def prepare_params(params):
    """Pack PyTorch-layout weights into kernel-ready (mostly bf16) layouts."""
    bf16, f32 = jnp.bfloat16, jnp.float32

    l2w = jnp.zeros((F1, OUT_PAD), f32).at[:, :NCLS].set(
        params["lin2_w"].T.astype(f32))
    l2b = jnp.full((1, OUT_PAD), NEG, f32).at[0, :NCLS].set(
        params["lin2_b"].astype(f32))

    return {
        "w1": _pack_conv(params["conv1_w"], H0).astype(bf16),      # (160, 168)
        "b1": jnp.tile(params["conv1_b"].astype(f32), H1).reshape(1, H1 * C1),
        "p1": _pool_colsel(H1, C1).astype(bf16),                   # (2, 168, 84)
        "w2": _pack_conv(params["conv2_w"], P1).astype(bf16),      # (420, 160)
        "b2": jnp.tile(params["conv2_b"].astype(f32), H2).reshape(1, H2 * C2),
        "p2": _pool_colsel(H2, C2).astype(bf16),                   # (2, 160, 80)
        "w3": _pack_conv(params["conv3_w"], P2).astype(bf16),      # (400, 120)
        "b3": params["conv3_b"].astype(f32).reshape(1, C3),
        "l1w": params["lin1_w"].T.astype(bf16),                    # (120, 84)
        "l1b": params["lin1_b"].astype(f32).reshape(1, F1),
        "l2w": l2w.astype(bf16),                                   # (84, 128)
        "l2b": l2b,                                                # (1, 128) f32
    }


def _row_compactor(tb):
    """(TB, TB*32) 0/1 matrix picking matrix row b*32 of each image block."""
    pick = jnp.zeros((1, H0), jnp.float32).at[0, 0].set(1.0)
    return jnp.kron(jnp.eye(tb, dtype=jnp.float32), pick).astype(jnp.bfloat16)


# ----------------------------------------------------------------------------
# Forward pass: one fused pallas_call, TB images per grid step.
# ----------------------------------------------------------------------------
@functools.partial(jax.jit, static_argnames=("tb",))
def lenet5_forward(prepped, x, *, tb=32):
    """x: (B, 1, 32, 32) NCHW float32 -> (B, 10) log-probs."""
    if tb % 8:
        raise ValueError("tb must be a multiple of 8")
    B = x.shape[0]
    n_steps = pl.cdiv(B, tb)
    bp = n_steps * tb                           # batch padded to a TB multiple

    x2 = x.astype(jnp.float32).reshape(B, H0, H0)
    if bp != B:
        x2 = jnp.concatenate(
            [x2, jnp.zeros((bp - B, H0, H0), jnp.float32)], axis=0)
    x2 = x2.reshape(bp * H0, H0)                # row-stacked image blocks

    rowsel = _row_compactor(tb)
    weights = [prepped["w1"], prepped["b1"], prepped["p1"],
               prepped["w2"], prepped["b2"], prepped["p2"], rowsel,
               prepped["w3"], prepped["b3"],
               prepped["l1w"], prepped["l1b"], prepped["l2w"], prepped["l2b"]]

    def whole(arr):
        # full-array block, constant index_map -> resident in VMEM across grid
        return pl.BlockSpec(arr.shape, lambda i, nd=arr.ndim: (0,) * nd)

    rows = tb * H0
    macs = (rows * (K * H0) * (H1 * C1)                 # conv1
            + 2 * rows * (H1 * C1) * (P1 * C1)          # pool1 column select
            + rows * (K * P1 * C1) * (H2 * C2)          # conv2
            + 2 * rows * (H2 * C2) * (P2 * C2)          # pool2 column select
            + K * tb * rows * (P2 * C2)                 # flatten row gather
            + tb * (K * P2 * C2 * C3 + C3 * F1 + F1 * OUT_PAD))  # conv3 + FCs
    bytes_accessed = 4 * (bp * H0 * H0 + bp * OUT_PAD) + sum(
        int(w.size) * w.dtype.itemsize for w in weights)

    out = pl.pallas_call(
        _lenet5_kernel,
        out_shape=jax.ShapeDtypeStruct((bp, OUT_PAD), jnp.float32),
        grid=(n_steps,),
        in_specs=[pl.BlockSpec((rows, H0), lambda i: (i, 0))]
                 + [whole(w) for w in weights],
        out_specs=pl.BlockSpec((tb, OUT_PAD), lambda i: (i, 0)),
        compiler_params=pltpu.CompilerParams(
            dimension_semantics=("parallel",)),   # megacore-shard batch tiles
        cost_estimate=pl.CostEstimate(
            flops=2 * macs * n_steps,
            transcendentals=tb * OUT_PAD * n_steps,
            bytes_accessed=bytes_accessed),
    )(x2, *weights)

    return out[:B, :NCLS]


# ----------------------------------------------------------------------------
# Pure-XLA reference of the same module (for a correctness check only).
# ----------------------------------------------------------------------------
def lenet5_reference(params, x):
    dn = ("NCHW", "OIHW", "NCHW")

    def conv(x, w, b):
        y = jax.lax.conv_general_dilated(
            x, w, window_strides=(1, 1), padding="VALID", dimension_numbers=dn)
        return y + b.reshape(1, -1, 1, 1)

    def pool(x):
        return jax.lax.reduce_window(
            x, -jnp.inf, jax.lax.max, (1, 1, 2, 2), (1, 1, 2, 2), "VALID")

    x = pool(jax.nn.relu(conv(x, params["conv1_w"], params["conv1_b"])))
    x = pool(jax.nn.relu(conv(x, params["conv2_w"], params["conv2_b"])))
    x = jax.nn.relu(conv(x, params["conv3_w"], params["conv3_b"]))
    x = x.reshape(x.shape[0], -1)
    x = jax.nn.relu(jnp.dot(x, params["lin1_w"].T) + params["lin1_b"])
    x = jnp.dot(x, params["lin2_w"].T) + params["lin2_b"]
    return jax.nn.log_softmax(x, axis=-1)


if __name__ == "__main__":
    key = jax.random.PRNGKey(0)
    k_param, k_x = jax.random.split(key)
    params = init_params(k_param)
    prepped = prepare_params(params)          # one-time packing, outside jit

    # LeNet-5 requires 32x32 single-channel input (conv3 reduces 5x5 -> 1x1).
    # Small test: 16 images, 8 per grid step -> 2 pipelined / megacore steps.
    B, TB = 16, 8
    x = jax.random.normal(k_x, (B, C0, H0, H0), dtype=jnp.float32)

    out = jax.block_until_ready(lenet5_forward(prepped, x, tb=TB))

    assert out.shape == (B, NCLS), out.shape
    # log-softmax rows must sum (in prob space) to ~1
    assert jnp.allclose(jnp.sum(jnp.exp(out), axis=-1), 1.0, atol=1e-4)
    # must match a pure-XLA reference of the same module (loose tol: weights
    # and MXU operands are bf16; accumulation is f32)
    ref = lenet5_reference(params, x)
    err = float(jnp.max(jnp.abs(out - ref)))
    assert err < 1e-1, err
    print("KERNEL_OK")
</pallas_src>

<mosaic_0001>
module attributes {stable_mosaic.version = 11 : i64} {
  func.func @_lenet5_kernel(%arg0: i32, %arg1: memref<256x32xf32, #tpu.memory_space<vmem>>, %arg2: memref<160x168xbf16, #tpu.memory_space<vmem>>, %arg3: memref<1x168xf32, #tpu.memory_space<vmem>>, %arg4: memref<2x168x84xbf16, #tpu.memory_space<vmem>>, %arg5: memref<420x160xbf16, #tpu.memory_space<vmem>>, %arg6: memref<1x160xf32, #tpu.memory_space<vmem>>, %arg7: memref<2x160x80xbf16, #tpu.memory_space<vmem>>, %arg8: memref<8x256xbf16, #tpu.memory_space<vmem>>, %arg9: memref<400x120xbf16, #tpu.memory_space<vmem>>, %arg10: memref<1x120xf32, #tpu.memory_space<vmem>>, %arg11: memref<120x84xbf16, #tpu.memory_space<vmem>>, %arg12: memref<1x84xf32, #tpu.memory_space<vmem>>, %arg13: memref<84x128xbf16, #tpu.memory_space<vmem>>, %arg14: memref<1x128xf32, #tpu.memory_space<vmem>>, %arg15: memref<8x128xf32, #tpu.memory_space<vmem>>) attributes {dimension_semantics = [#tpu.dimension_semantics<parallel>], iteration_bounds = array<i64: 2>, scalar_prefetch = 0 : i64, scratch_operands = 0 : i64, tpu.core_type = #tpu.core_type<tc>, window_params = [{transform_indices = @transform_0, window_bounds = array<i64: 256, 32>}, {pipeline_mode = #tpu.pipeline_mode<synchronous>, transform_indices = @transform_1, window_bounds = array<i64: 160, 168>}, {pipeline_mode = #tpu.pipeline_mode<synchronous>, transform_indices = @transform_2, window_bounds = array<i64: 1, 168>}, {pipeline_mode = #tpu.pipeline_mode<synchronous>, transform_indices = @transform_3, window_bounds = array<i64: 2, 168, 84>}, {pipeline_mode = #tpu.pipeline_mode<synchronous>, transform_indices = @transform_4, window_bounds = array<i64: 420, 160>}, {pipeline_mode = #tpu.pipeline_mode<synchronous>, transform_indices = @transform_5, window_bounds = array<i64: 1, 160>}, {pipeline_mode = #tpu.pipeline_mode<synchronous>, transform_indices = @transform_6, window_bounds = array<i64: 2, 160, 80>}, {pipeline_mode = #tpu.pipeline_mode<synchronous>, transform_indices = @transform_7, window_bounds = array<i64: 8, 256>}, {pipeline_mode = #tpu.pipeline_mode<synchronous>, transform_indices = @transform_8, window_bounds = array<i64: 400, 120>}, {pipeline_mode = #tpu.pipeline_mode<synchronous>, transform_indices = @transform_9, window_bounds = array<i64: 1, 120>}, {pipeline_mode = #tpu.pipeline_mode<synchronous>, transform_indices = @transform_10, window_bounds = array<i64: 120, 84>}, {pipeline_mode = #tpu.pipeline_mode<synchronous>, transform_indices = @transform_11, window_bounds = array<i64: 1, 84>}, {pipeline_mode = #tpu.pipeline_mode<synchronous>, transform_indices = @transform_12, window_bounds = array<i64: 84, 128>}, {pipeline_mode = #tpu.pipeline_mode<synchronous>, transform_indices = @transform_13, window_bounds = array<i64: 1, 128>}, {transform_indices = @transform_14, window_bounds = array<i64: 8, 128>}]} {
    %c0 = arith.constant 0 : index
    %c0_0 = arith.constant 0 : index
    %0 = vector.load %arg1[%c0, %c0_0] : memref<256x32xf32, #tpu.memory_space<vmem>>, vector<256x32xf32>
    %1 = vector.extract_strided_slice %0 {offsets = [1, 0], sizes = [255, 32], strides = [1, 1]} : vector<256x32xf32> to vector<255x32xf32>
    %2 = vector.extract_strided_slice %0 {offsets = [0, 0], sizes = [1, 32], strides = [1, 1]} : vector<256x32xf32> to vector<1x32xf32>
    %3 = tpu.concatenate %1, %2 in 0 : vector<255x32xf32>, vector<1x32xf32> -> vector<256x32xf32>
    %4 = vector.extract_strided_slice %0 {offsets = [2, 0], sizes = [254, 32], strides = [1, 1]} : vector<256x32xf32> to vector<254x32xf32>
    %5 = vector.extract_strided_slice %0 {offsets = [0, 0], sizes = [2, 32], strides = [1, 1]} : vector<256x32xf32> to vector<2x32xf32>
    %6 = tpu.concatenate %4, %5 in 0 : vector<254x32xf32>, vector<2x32xf32> -> vector<256x32xf32>
    %7 = vector.extract_strided_slice %0 {offsets = [3, 0], sizes = [253, 32], strides = [1, 1]} : vector<256x32xf32> to vector<253x32xf32>
    %8 = vector.extract_strided_slice %0 {offsets = [0, 0], sizes = [3, 32], strides = [1, 1]} : vector<256x32xf32> to vector<3x32xf32>
    %9 = tpu.concatenate %7, %8 in 0 : vector<253x32xf32>, vector<3x32xf32> -> vector<256x32xf32>
    %10 = vector.extract_strided_slice %0 {offsets = [4, 0], sizes = [252, 32], strides = [1, 1]} : vector<256x32xf32> to vector<252x32xf32>
    %11 = vector.extract_strided_slice %0 {offsets = [0, 0], sizes = [4, 32], strides = [1, 1]} : vector<256x32xf32> to vector<4x32xf32>
    %12 = tpu.concatenate %10, %11 in 0 : vector<252x32xf32>, vector<4x32xf32> -> vector<256x32xf32>
    %13 = tpu.concatenate %0, %3, %6, %9, %12 in 1 : vector<256x32xf32>, vector<256x32xf32>, vector<256x32xf32>, vector<256x32xf32>, vector<256x32xf32> -> vector<256x160xf32>
    %c0_1 = arith.constant 0 : index
    %c0_2 = arith.constant 0 : index
    %14 = vector.load %arg2[%c0_1, %c0_2] : memref<160x168xbf16, #tpu.memory_space<vmem>>, vector<160x168xbf16>
    %15 = arith.truncf %13 : vector<256x160xf32> to vector<256x160xbf16>
    %cst = arith.constant dense<0.000000e+00> : vector<256x168xf32>
    %16 = tpu.matmul %15, %14, %cst {dimension_numbers = #tpu.dot_dimension_numbers<[1], [0], [0], [1], [0, 0, 1, 1], [], []>} : vector<256x160xbf16>, vector<160x168xbf16>, vector<256x168xf32> -> vector<256x168xf32>
    %c0_3 = arith.constant 0 : index
    %c0_4 = arith.constant 0 : index
    %17 = vector.load %arg3[%c0_3, %c0_4] : memref<1x168xf32, #tpu.memory_space<vmem>>, vector<1x168xf32>
    %18 = vector.broadcast %17 : vector<1x168xf32> to vector<256x168xf32>
    %19 = arith.addf %16, %18 : vector<256x168xf32>
    %cst_5 = arith.constant 0.000000e+00 : f32
    %20 = vector.broadcast %cst_5 : f32 to vector<256x168xf32>
    %21 = arith.maximumf %19, %20 : vector<256x168xf32>
    %22 = vector.extract_strided_slice %21 {offsets = [1, 0], sizes = [255, 168], strides = [1, 1]} : vector<256x168xf32> to vector<255x168xf32>
    %23 = vector.extract_strided_slice %21 {offsets = [0, 0], sizes = [1, 168], strides = [1, 1]} : vector<256x168xf32> to vector<1x168xf32>
    %24 = tpu.concatenate %22, %23 in 0 : vector<255x168xf32>, vector<1x168xf32> -> vector<256x168xf32>
    %25 = arith.maximumf %21, %24 : vector<256x168xf32>
    %c0_6 = arith.constant 0 : index
    %c0_7 = arith.constant 0 : index
    %c0_8 = arith.constant 0 : index
    %26 = vector.load %arg4[%c0_6, %c0_7, %c0_8] : memref<2x168x84xbf16, #tpu.memory_space<vmem>>, vector<1x168x84xbf16>
    %27 = vector.shape_cast %26 : vector<1x168x84xbf16> to vector<168x84xbf16>
    %28 = arith.truncf %25 : vector<256x168xf32> to vector<256x168xbf16>
    %cst_9 = arith.constant dense<0.000000e+00> : vector<256x84xf32>
    %29 = tpu.matmul %28, %27, %cst_9 {dimension_numbers = #tpu.dot_dimension_numbers<[1], [0], [0], [1], [0, 0, 1, 1], [], []>} : vector<256x168xbf16>, vector<168x84xbf16>, vector<256x84xf32> -> vector<256x84xf32>
    %c1 = arith.constant 1 : index
    %c0_10 = arith.constant 0 : index
    %c0_11 = arith.constant 0 : index
    %30 = vector.load %arg4[%c1, %c0_10, %c0_11] : memref<2x168x84xbf16, #tpu.memory_space<vmem>>, vector<1x168x84xbf16>
    %31 = vector.shape_cast %30 : vector<1x168x84xbf16> to vector<168x84xbf16>
    %32 = arith.truncf %25 : vector<256x168xf32> to vector<256x168xbf16>
    %cst_12 = arith.constant dense<0.000000e+00> : vector<256x84xf32>
    %33 = tpu.matmul %32, %31, %cst_12 {dimension_numbers = #tpu.dot_dimension_numbers<[1], [0], [0], [1], [0, 0, 1, 1], [], []>} : vector<256x168xbf16>, vector<168x84xbf16>, vector<256x84xf32> -> vector<256x84xf32>
    %34 = arith.maximumf %29, %33 : vector<256x84xf32>
    %35 = vector.extract_strided_slice %34 {offsets = [2, 0], sizes = [254, 84], strides = [1, 1]} : vector<256x84xf32> to vector<254x84xf32>
    %36 = vector.extract_strided_slice %34 {offsets = [0, 0], sizes = [2, 84], strides = [1, 1]} : vector<256x84xf32> to vector<2x84xf32>
    %37 = tpu.concatenate %35, %36 in 0 : vector<254x84xf32>, vector<2x84xf32> -> vector<256x84xf32>
    %38 = vector.extract_strided_slice %34 {offsets = [4, 0], sizes = [252, 84], strides = [1, 1]} : vector<256x84xf32> to vector<252x84xf32>
    %39 = vector.extract_strided_slice %34 {offsets = [0, 0], sizes = [4, 84], strides = [1, 1]} : vector<256x84xf32> to vector<4x84xf32>
    %40 = tpu.concatenate %38, %39 in 0 : vector<252x84xf32>, vector<4x84xf32> -> vector<256x84xf32>
    %41 = vector.extract_strided_slice %34 {offsets = [6, 0], sizes = [250, 84], strides = [1, 1]} : vector<256x84xf32> to vector<250x84xf32>
    %42 = vector.extract_strided_slice %34 {offsets = [0, 0], sizes = [6, 84], strides = [1, 1]} : vector<256x84xf32> to vector<6x84xf32>
    %43 = tpu.concatenate %41, %42 in 0 : vector<250x84xf32>, vector<6x84xf32> -> vector<256x84xf32>
    %44 = vector.extract_strided_slice %34 {offsets = [8, 0], sizes = [248, 84], strides = [1, 1]} : vector<256x84xf32> to vector<248x84xf32>
    %45 = vector.extract_strided_slice %34 {offsets = [0, 0], sizes = [8, 84], strides = [1, 1]} : vector<256x84xf32> to vector<8x84xf32>
    %46 = tpu.concatenate %44, %45 in 0 : vector<248x84xf32>, vector<8x84xf32> -> vector<256x84xf32>
    %47 = tpu.concatenate %34, %37, %40, %43, %46 in 1 : vector<256x84xf32>, vector<256x84xf32>, vector<256x84xf32>, vector<256x84xf32>, vector<256x84xf32> -> vector<256x420xf32>
    %c0_13 = arith.constant 0 : index
    %c0_14 = arith.constant 0 : index
    %48 = vector.load %arg5[%c0_13, %c0_14] : memref<420x160xbf16, #tpu.memory_space<vmem>>, vector<420x160xbf16>
    %49 = arith.truncf %47 : vector<256x420xf32> to vector<256x420xbf16>
    %cst_15 = arith.constant dense<0.000000e+00> : vector<256x160xf32>
    %50 = tpu.matmul %49, %48, %cst_15 {dimension_numbers = #tpu.dot_dimension_numbers<[1], [0], [0], [1], [0, 0, 1, 1], [], []>} : vector<256x420xbf16>, vector<420x160xbf16>, vector<256x160xf32> -> vector<256x160xf32>
    %c0_16 = arith.constant 0 : index
    %c0_17 = arith.constant 0 : index
    %51 = vector.load %arg6[%c0_16, %c0_17] : memref<1x160xf32, #tpu.memory_space<vmem>>, vector<1x160xf32>
    %52 = vector.broadcast %51 : vector<1x160xf32> to vector<256x160xf32>
    %53 = arith.addf %50, %52 : vector<256x160xf32>
    %cst_18 = arith.constant 0.000000e+00 : f32
    %54 = vector.broadcast %cst_18 : f32 to vector<256x160xf32>
    %55 = arith.maximumf %53, %54 : vector<256x160xf32>
    %56 = vector.extract_strided_slice %55 {offsets = [2, 0], sizes = [254, 160], strides = [1, 1]} : vector<256x160xf32> to vector<254x160xf32>
    %57 = vector.extract_strided_slice %55 {offsets = [0, 0], sizes = [2, 160], strides = [1, 1]} : vector<256x160xf32> to vector<2x160xf32>
    %58 = tpu.concatenate %56, %57 in 0 : vector<254x160xf32>, vector<2x160xf32> -> vector<256x160xf32>
    %59 = arith.maximumf %55, %58 : vector<256x160xf32>
    %c0_19 = arith.constant 0 : index
    %c0_20 = arith.constant 0 : index
    %c0_21 = arith.constant 0 : index
    %60 = vector.load %arg7[%c0_19, %c0_20, %c0_21] : memref<2x160x80xbf16, #tpu.memory_space<vmem>>, vector<1x160x80xbf16>
    %61 = vector.shape_cast %60 : vector<1x160x80xbf16> to vector<160x80xbf16>
    %62 = arith.truncf %59 : vector<256x160xf32> to vector<256x160xbf16>
    %cst_22 = arith.constant dense<0.000000e+00> : vector<256x80xf32>
    %63 = tpu.matmul %62, %61, %cst_22 {dimension_numbers = #tpu.dot_dimension_numbers<[1], [0], [0], [1], [0, 0, 1, 1], [], []>} : vector<256x160xbf16>, vector<160x80xbf16>, vector<256x80xf32> -> vector<256x80xf32>
    %c1_23 = arith.constant 1 : index
    %c0_24 = arith.constant 0 : index
    %c0_25 = arith.constant 0 : index
    %64 = vector.load %arg7[%c1_23, %c0_24, %c0_25] : memref<2x160x80xbf16, #tpu.memory_space<vmem>>, vector<1x160x80xbf16>
    %65 = vector.shape_cast %64 : vector<1x160x80xbf16> to vector<160x80xbf16>
    %66 = arith.truncf %59 : vector<256x160xf32> to vector<256x160xbf16>
    %cst_26 = arith.constant dense<0.000000e+00> : vector<256x80xf32>
    %67 = tpu.matmul %66, %65, %cst_26 {dimension_numbers = #tpu.dot_dimension_numbers<[1], [0], [0], [1], [0, 0, 1, 1], [], []>} : vector<256x160xbf16>, vector<160x80xbf16>, vector<256x80xf32> -> vector<256x80xf32>
    %68 = arith.maximumf %63, %67 : vector<256x80xf32>
    %c0_27 = arith.constant 0 : index
    %c0_28 = arith.constant 0 : index
    %69 = vector.load %arg8[%c0_27, %c0_28] : memref<8x256xbf16, #tpu.memory_space<vmem>>, vector<8x256xbf16>
    %70 = arith.truncf %68 : vector<256x80xf32> to vector<256x80xbf16>
    %cst_29 = arith.constant dense<0.000000e+00> : vector<8x80xf32>
    %71 = tpu.matmul %69, %70, %cst_29 {dimension_numbers = #tpu.dot_dimension_numbers<[1], [0], [0], [1], [0, 0, 1, 1], [], []>} : vector<8x256xbf16>, vector<256x80xbf16>, vector<8x80xf32> -> vector<8x80xf32>
    %72 = vector.extract_strided_slice %68 {offsets = [4, 0], sizes = [252, 80], strides = [1, 1]} : vector<256x80xf32> to vector<252x80xf32>
    %73 = vector.extract_strided_slice %68 {offsets = [0, 0], sizes = [4, 80], strides = [1, 1]} : vector<256x80xf32> to vector<4x80xf32>
    %74 = tpu.concatenate %72, %73 in 0 : vector<252x80xf32>, vector<4x80xf32> -> vector<256x80xf32>
    %75 = arith.truncf %74 : vector<256x80xf32> to vector<256x80xbf16>
    %cst_30 = arith.constant dense<0.000000e+00> : vector<8x80xf32>
    %76 = tpu.matmul %69, %75, %cst_30 {dimension_numbers = #tpu.dot_dimension_numbers<[1], [0], [0], [1], [0, 0, 1, 1], [], []>} : vector<8x256xbf16>, vector<256x80xbf16>, vector<8x80xf32> -> vector<8x80xf32>
    %77 = vector.extract_strided_slice %68 {offsets = [8, 0], sizes = [248, 80], strides = [1, 1]} : vector<256x80xf32> to vector<248x80xf32>
    %78 = vector.extract_strided_slice %68 {offsets = [0, 0], sizes = [8, 80], strides = [1, 1]} : vector<256x80xf32> to vector<8x80xf32>
    %79 = tpu.concatenate %77, %78 in 0 : vector<248x80xf32>, vector<8x80xf32> -> vector<256x80xf32>
    %80 = arith.truncf %79 : vector<256x80xf32> to vector<256x80xbf16>
    %cst_31 = arith.constant dense<0.000000e+00> : vector<8x80xf32>
    %81 = tpu.matmul %69, %80, %cst_31 {dimension_numbers = #tpu.dot_dimension_numbers<[1], [0], [0], [1], [0, 0, 1, 1], [], []>} : vector<8x256xbf16>, vector<256x80xbf16>, vector<8x80xf32> -> vector<8x80xf32>
    %82 = vector.extract_strided_slice %68 {offsets = [12, 0], sizes = [244, 80], strides = [1, 1]} : vector<256x80xf32> to vector<244x80xf32>
    %83 = vector.extract_strided_slice %68 {offsets = [0, 0], sizes = [12, 80], strides = [1, 1]} : vector<256x80xf32> to vector<12x80xf32>
    %84 = tpu.concatenate %82, %83 in 0 : vector<244x80xf32>, vector<12x80xf32> -> vector<256x80xf32>
    %85 = arith.truncf %84 : vector<256x80xf32> to vector<256x80xbf16>
    %cst_32 = arith.constant dense<0.000000e+00> : vector<8x80xf32>
    %86 = tpu.matmul %69, %85, %cst_32 {dimension_numbers = #tpu.dot_dimension_numbers<[1], [0], [0], [1], [0, 0, 1, 1], [], []>} : vector<8x256xbf16>, vector<256x80xbf16>, vector<8x80xf32> -> vector<8x80xf32>
    %87 = vector.extract_strided_slice %68 {offsets = [16, 0], sizes = [240, 80], strides = [1, 1]} : vector<256x80xf32> to vector<240x80xf32>
    %88 = vector.extract_strided_slice %68 {offsets = [0, 0], sizes = [16, 80], strides = [1, 1]} : vector<256x80xf32> to vector<16x80xf32>
    %89 = tpu.concatenate %87, %88 in 0 : vector<240x80xf32>, vector<16x80xf32> -> vector<256x80xf32>
    %90 = arith.truncf %89 : vector<256x80xf32> to vector<256x80xbf16>
    %cst_33 = arith.constant dense<0.000000e+00> : vector<8x80xf32>
    %91 = tpu.matmul %69, %90, %cst_33 {dimension_numbers = #tpu.dot_dimension_numbers<[1], [0], [0], [1], [0, 0, 1, 1], [], []>} : vector<8x256xbf16>, vector<256x80xbf16>, vector<8x80xf32> -> vector<8x80xf32>
    %92 = tpu.concatenate %71, %76, %81, %86, %91 in 1 : vector<8x80xf32>, vector<8x80xf32>, vector<8x80xf32>, vector<8x80xf32>, vector<8x80xf32> -> vector<8x400xf32>
    %c0_34 = arith.constant 0 : index
    %c0_35 = arith.constant 0 : index
    %93 = vector.load %arg9[%c0_34, %c0_35] : memref<400x120xbf16, #tpu.memory_space<vmem>>, vector<400x120xbf16>
    %94 = arith.truncf %92 : vector<8x400xf32> to vector<8x400xbf16>
    %cst_36 = arith.constant dense<0.000000e+00> : vector<8x120xf32>
    %95 = tpu.matmul %94, %93, %cst_36 {dimension_numbers = #tpu.dot_dimension_numbers<[1], [0], [0], [1], [0, 0, 1, 1], [], []>} : vector<8x400xbf16>, vector<400x120xbf16>, vector<8x120xf32> -> vector<8x120xf32>
    %c0_37 = arith.constant 0 : index
    %c0_38 = arith.constant 0 : index
    %96 = vector.load %arg10[%c0_37, %c0_38] : memref<1x120xf32, #tpu.memory_space<vmem>>, vector<1x120xf32>
    %97 = vector.broadcast %96 : vector<1x120xf32> to vector<8x120xf32>
    %98 = arith.addf %95, %97 : vector<8x120xf32>
    %cst_39 = arith.constant 0.000000e+00 : f32
    %99 = vector.broadcast %cst_39 : f32 to vector<8x120xf32>
    %100 = arith.maximumf %98, %99 : vector<8x120xf32>
    %c0_40 = arith.constant 0 : index
    %c0_41 = arith.constant 0 : index
    %101 = vector.load %arg11[%c0_40, %c0_41] : memref<120x84xbf16, #tpu.memory_space<vmem>>, vector<120x84xbf16>
    %102 = arith.truncf %100 : vector<8x120xf32> to vector<8x120xbf16>
    %cst_42 = arith.constant dense<0.000000e+00> : vector<8x84xf32>
    %103 = tpu.matmul %102, %101, %cst_42 {dimension_numbers = #tpu.dot_dimension_numbers<[1], [0], [0], [1], [0, 0, 1, 1], [], []>} : vector<8x120xbf16>, vector<120x84xbf16>, vector<8x84xf32> -> vector<8x84xf32>
    %c0_43 = arith.constant 0 : index
    %c0_44 = arith.constant 0 : index
    %104 = vector.load %arg12[%c0_43, %c0_44] : memref<1x84xf32, #tpu.memory_space<vmem>>, vector<1x84xf32>
    %105 = vector.broadcast %104 : vector<1x84xf32> to vector<8x84xf32>
    %106 = arith.addf %103, %105 : vector<8x84xf32>
    %cst_45 = arith.constant 0.000000e+00 : f32
    %107 = vector.broadcast %cst_45 : f32 to vector<8x84xf32>
    %108 = arith.maximumf %106, %107 : vector<8x84xf32>
    %c0_46 = arith.constant 0 : index
    %c0_47 = arith.constant 0 : index
    %109 = vector.load %arg13[%c0_46, %c0_47] : memref<84x128xbf16, #tpu.memory_space<vmem>>, vector<84x128xbf16>
    %110 = arith.truncf %108 : vector<8x84xf32> to vector<8x84xbf16>
    %cst_48 = arith.constant dense<0.000000e+00> : vector<8x128xf32>
    %111 = tpu.matmul %110, %109, %cst_48 {dimension_numbers = #tpu.dot_dimension_numbers<[1], [0], [0], [1], [0, 0, 1, 1], [], []>} : vector<8x84xbf16>, vector<84x128xbf16>, vector<8x128xf32> -> vector<8x128xf32>
    %c0_49 = arith.constant 0 : index
    %c0_50 = arith.constant 0 : index
    %112 = vector.load %arg14[%c0_49, %c0_50] : memref<1x128xf32, #tpu.memory_space<vmem>>, vector<1x128xf32>
    %113 = vector.broadcast %112 : vector<1x128xf32> to vector<8x128xf32>
    %114 = arith.addf %111, %113 : vector<8x128xf32>
    %cst_51 = arith.constant dense<0xFF800000> : vector<8xf32>
    %115 = vector.multi_reduction <maximumf>, %114, %cst_51 [1] : vector<8x128xf32> to vector<8xf32>
    %116 = vector.shape_cast %115 : vector<8xf32> to vector<8x1xf32>
    %117 = vector.broadcast %116 : vector<8x1xf32> to vector<8x128xf32>
    %118 = arith.subf %114, %117 : vector<8x128xf32>
    %119 = math.exp %118 : vector<8x128xf32>
    %cst_52 = arith.constant dense<0.000000e+00> : vector<8xf32>
    %120 = vector.multi_reduction <add>, %119, %cst_52 [1] : vector<8x128xf32> to vector<8xf32>
    %121 = vector.shape_cast %120 : vector<8xf32> to vector<8x1xf32>
    %122 = math.log %121 : vector<8x1xf32>
    %123 = vector.broadcast %122 : vector<8x1xf32> to vector<8x128xf32>
    %124 = arith.subf %118, %123 : vector<8x128xf32>
    %c0_53 = arith.constant 0 : index
    %c0_54 = arith.constant 0 : index
    %125 = vector.load %arg15[%c0_53, %c0_54] : memref<8x128xf32, #tpu.memory_space<vmem>>, vector<8x128xf32>
    tpu.vector_store %arg15[%c0_53, %c0_54], %124 {strides = array<i32>} : memref<8x128xf32, #tpu.memory_space<vmem>>, vector<8x128xf32>,
    return
  }
  func.func @transform_0(%arg0: i32) -> (i32, i32) {
    %c0_i32 = arith.constant 0 : i32
    %c0_i32_0 = arith.constant 0 : i32
    return %arg0, %c0_i32 : i32, i32
  }
  func.func @transform_1(%arg0: i32) -> (i32, i32) {
    %c0_i32 = arith.constant 0 : i32
    %c0_i32_0 = arith.constant 0 : i32
    %c0_i32_1 = arith.constant 0 : i32
    return %c0_i32, %c0_i32_0 : i32, i32
  }
  func.func @transform_2(%arg0: i32) -> (i32, i32) {
    %c0_i32 = arith.constant 0 : i32
    %c0_i32_0 = arith.constant 0 : i32
    %c0_i32_1 = arith.constant 0 : i32
    return %c0_i32, %c0_i32_0 : i32, i32
  }
  func.func @transform_3(%arg0: i32) -> (i32, i32, i32) {
    %c0_i32 = arith.constant 0 : i32
    %c0_i32_0 = arith.constant 0 : i32
    %c0_i32_1 = arith.constant 0 : i32
    %c0_i32_2 = arith.constant 0 : i32
    return %c0_i32, %c0_i32_0, %c0_i32_1 : i32, i32, i32
  }
  func.func @transform_4(%arg0: i32) -> (i32, i32) {
    %c0_i32 = arith.constant 0 : i32
    %c0_i32_0 = arith.constant 0 : i32
    %c0_i32_1 = arith.constant 0 : i32
    return %c0_i32, %c0_i32_0 : i32, i32
  }
  func.func @transform_5(%arg0: i32) -> (i32, i32) {
    %c0_i32 = arith.constant 0 : i32
    %c0_i32_0 = arith.constant 0 : i32
    %c0_i32_1 = arith.constant 0 : i32
    return %c0_i32, %c0_i32_0 : i32, i32
  }
  func.func @transform_6(%arg0: i32) -> (i32, i32, i32) {
    %c0_i32 = arith.constant 0 : i32
    %c0_i32_0 = arith.constant 0 : i32
    %c0_i32_1 = arith.constant 0 : i32
    %c0_i32_2 = arith.constant 0 : i32
    return %c0_i32, %c0_i32_0, %c0_i32_1 : i32, i32, i32
  }
  func.func @transform_7(%arg0: i32) -> (i32, i32) {
    %c0_i32 = arith.constant 0 : i32
    %c0_i32_0 = arith.constant 0 : i32
    %c0_i32_1 = arith.constant 0 : i32
    return %c0_i32, %c0_i32_0 : i32, i32
  }
  func.func @transform_8(%arg0: i32) -> (i32, i32) {
    %c0_i32 = arith.constant 0 : i32
    %c0_i32_0 = arith.constant 0 : i32
    %c0_i32_1 = arith.constant 0 : i32
    return %c0_i32, %c0_i32_0 : i32, i32
  }
  func.func @transform_9(%arg0: i32) -> (i32, i32) {
    %c0_i32 = arith.constant 0 : i32
    %c0_i32_0 = arith.constant 0 : i32
    %c0_i32_1 = arith.constant 0 : i32
    return %c0_i32, %c0_i32_0 : i32, i32
  }
  func.func @transform_10(%arg0: i32) -> (i32, i32) {
    %c0_i32 = arith.constant 0 : i32
    %c0_i32_0 = arith.constant 0 : i32
    %c0_i32_1 = arith.constant 0 : i32
    return %c0_i32, %c0_i32_0 : i32, i32
  }
  func.func @transform_11(%arg0: i32) -> (i32, i32) {
    %c0_i32 = arith.constant 0 : i32
    %c0_i32_0 = arith.constant 0 : i32
    %c0_i32_1 = arith.constant 0 : i32
    return %c0_i32, %c0_i32_0 : i32, i32
  }
  func.func @transform_12(%arg0: i32) -> (i32, i32) {
    %c0_i32 = arith.constant 0 : i32
    %c0_i32_0 = arith.constant 0 : i32
    %c0_i32_1 = arith.constant 0 : i32
    return %c0_i32, %c0_i32_0 : i32, i32
  }
  func.func @transform_13(%arg0: i32) -> (i32, i32) {
    %c0_i32 = arith.constant 0 : i32
    %c0_i32_0 = arith.constant 0 : i32
    %c0_i32_1 = arith.constant 0 : i32
    return %c0_i32, %c0_i32_0 : i32, i32
  }
  func.func @transform_14(%arg0: i32) -> (i32, i32) {
    %c0_i32 = arith.constant 0 : i32
    %c0_i32_0 = arith.constant 0 : i32
    return %arg0, %c0_i32 : i32, i32
  }
}

</mosaic_0001>

<bundles_post_ra>
// kernel: lenet5_forward.1
= control target key start
LH: loop header
LB: loop body
LE: loop exit
PB: predicated region body
PF: predicated region fallthrough
CT: control target
= control target key end

     0   :  { %s11020_s0 = inlined_call_operand.vmem [shape: f32[512,32], index: 0, kind: input, shape index: {}]   ;;  %s11021_s1 = inlined_call_operand.hbm [shape: bf16[160,168], index: 1, kind: input, shape index: {}]   ;;  %s11022_s2 = inlined_call_operand.vmem [shape: f32[1,168], index: 2, kind: input, shape index: {}]   ;;  %s11023_s3 = inlined_call_operand.hbm [shape: bf16[2,168,84], index: 3, kind: input, shape index: {}]   ;;  %s11024_s4 = inlined_call_operand.vmem [shape: bf16[420,160], index: 4, kind: input, shape index: {}]   ;;  %s11025_s5 = inlined_call_operand.vmem [shape: f32[1,160], index: 5, kind: input, shape index: {}]   ;;  %s11026_s6 = inlined_call_operand.hbm [shape: bf16[2,160,80], index: 6, kind: input, shape index: {}]   ;;  %s11027_s7 = inlined_call_operand.vmem [shape: bf16[8,256], index: 7, kind: input, shape index: {}]   ;;  %s11028_s8 = inlined_call_operand.vmem [shape: bf16[400,120], index: 8, kind: input, shape index: {}]   ;;  %s11029_s9 = inlined_call_operand.vmem [shape: f32[1,120], index: 9, kind: input, shape index: {}]   ;;  %s11030_s10 = inlined_call_operand.vmem [shape: bf16[120,84], index: 10, kind: input, shape index: {}]   ;;  %s11031_s11 = inlined_call_operand.vmem [shape: f32[1,84], index: 11, kind: input, shape index: {}]   ;;  %s11032_s12 = inlined_call_operand.vmem [shape: bf16[84,128], index: 12, kind: input, shape index: {}]   ;;  %s11033_s13 = inlined_call_operand.vmem [shape: f32[1,128], index: 13, kind: input, shape index: {}]   ;;  %s11034_s14 = inlined_call_operand.hbm [shape: f32[16,128], index: 14, kind: output, shape index: {}]  }
   0x1   :  { %11080 = sst [smem:[#allocation39_spill]] %s11023_s3 }
   0x2   :  { %11081 = sst [smem:[#allocation40_spill]] %s11034_s14 }
   0x3   :  { %19 = vsyncpa [#allocation3], 0 }
   0x4   :  { %20 = vsyncpa [#allocation6], 0 }
   0x5   :  { %21 = vsyncpa [#allocation4], 0 }
   0x6   :  { %23 = vsyncpa [#allocation4 + $0x1], 0  ;;  %s7992_s29 = smov 0   ;;  %s7994_s30 = smov 0  }
   0x7   :  { %s7996_s15 = smov 0   ;;  %s7998_s16 = smov 0  }
   0x8 LB: > { %11082 = sst [smem:[#allocation12_spill]] %s7884_s29  ;;  %s8013_s17 = sadd.s32 4294967295, %s7896_s16   ;;  %s7896_s16 = sphi %s7998_s16, %s11202_s16   ;;  %s7892_s15 = sphi %s7996_s15, %s11205_s15   ;;  %s7888_s30 = sphi %s7994_s30, %s11204_s30   ;;  %s7884_s29 = sphi %s7992_s29, %s11203_s29  }
   0x9   : > { %11083 = sst [smem:[#allocation13_spill]] %s7888_s30  ;;  %s6279_s18 = sadd.s32 4294967294, %s7896_s16  }
   0xa   : > { %11084 = sst [smem:[#allocation14_spill]] %s7892_s15  ;;  %s8017_s19 = sadd.s32 1, %s7896_s16  }
   0xb   : > { %11085 = sst [smem:[#allocation15_spill]] %s7896_s16  ;;  %s335_s20 = sadd.s32 1, %s7892_s15 }
   0xc   : > { %11086 = sst [smem:[#allocation16_spill]] %s8017_s19  ;;  %s332_s21 = ssub.s32 %s7896_s16, %s8017_s19 }
   0xd   : > { %p345_p0 = scmp.ne.s32.totalorder %s7892_s15, %s7888_s30  ;;  %p333_p1 = scmp.eq.s32.totalorder %s332_s21, 0 }
   0xe   : > { %p346_p2 = scmp.eq.s32.totalorder %s8013_s17, 1  ;;  %p351_p3 = scmp.ne.s32.totalorder %s7888_s30, %s7884_s29 }
   0xf   : > { %p352_p4 = scmp.eq.s32.totalorder %s6279_s18, 1  ;;  %p6280_p7 = scmp.ge.s32.totalorder %s7896_s16, 1 }
  0x10   : > { %s8028_s22 = scalar_select %p333_p1, %s7892_s15, %s335_s20  }
  0x11   : > { %p8030_p5 = por %p346_p2, %p345_p0  ;;  %p8034_p6 = por %p352_p4, %p351_p3 }
  0x12   : > { %11087 = sst [smem:[#allocation17_spill]] %s8028_s22  ;;  %p359_p8 = scmp.lt.s32.totalorder %s7896_s16, 3 }
  0x13   : > { %s11088_s23 = scalar_select %p8030_p5, 1, 0 }
  0x14   : > { %s11090_s24 = scalar_select %p8034_p6, 1, 0 }
  0x15   : > { %11089 = sst [smem:[#allocation18_spill]] %s11088_s23  ;;  %p11040_p9 = scmp.eq.s32.totalorder %s8013_s17, 0 }
  0x16   : > { %11091 = sst [smem:[#allocation19_spill]] %s11090_s24  ;;  %p8041_p10 = pnand %p6280_p7, %p359_p8 }
  0x17   : > { %s7898_s26 = smov [#allocation5]   ;;  %s7899_s18 = smov [#allocation2]  }
  0x18   : > { %s11092_s25 = scalar_select %p8041_p10, 1, 0 }
  0x19   : > { %s387_s27 = sshll.u32 %s7898_s26, 4  ;;  %p6882_p11 = pneg %p8041_p10  ;;  %s388_s27 = int_to_ptr.vmem [resolvable:$true] %s387_s27 }
  0x1a   : > { %s371_s20 = sshll.u32 %s7899_s18, 4  ;;  %s11094_s3 = sld [smem:[#allocation39_spill]]  ;;  %s8053_s20 = int_to_ptr.vmem [resolvable:$true] %s371_s20 }
  0x1b   : > { %p8049_p12 = pnand %p11040_p9, %p6882_p11 }
  0x1d   : > { %p8063_p0 = pneg %p8049_p12 }
  0x20   : > { %s7742_s15 = scalar_lea.hbm %s11094_s3, 2688 }
  0x21   : > { %p7743_p13 = scmp.ne.s32.totalorder %s11094_s3, %s7742_s15  ;;  %p7749_p3 = scmp.lt.u32.totalorder %s7742_s15, %s11094_s3 }
  0x23   : > { %p7745_p1 = pnand %p8063_p0, %p7743_p13 }
  0x25   : > { %p7746_p2 = pneg %p7745_p1 }
  0x27   : > { %p7751_p4 = pnand %p7749_p3, %p7746_p2 }
  0x29   : > { %7754 = shalt.err (!%p7751_p4)
}
  0x2a   : > { %s7755_s22 = scalar_lea.vmem %s388_s27, 2688  ;;  %p7763_p9 = scmp.lt.s32.totalorder %s388_s27, %s388_s27 }
  0x2b   : > { %p7756_p7 = scmp.ne.s32.totalorder %s388_s27, %s7755_s22  ;;  %p7764_p6 = scmp.lt.s32.totalorder %s7755_s22, %s7755_s22 }
  0x2d   : > { %p7758_p8 = pnand %p7756_p7, %p8063_p0  ;;  %p7765_p5 = por %p7764_p6, %p7763_p9 }
  0x2f   : > { %p7759_p11 = pneg %p7758_p8 }
  0x31   : > { %p7766_p10 = pnand %p7765_p5, %p7759_p11 }
  0x33   : > { %7769 = shalt.err (!%p7766_p10)
}
  0x34   : > { %s11048_s19 = smov 64   ;;  %s11049_s24 = smov 4  }
  0x35   : > { %6888 = dma.hbm_to_vmem [thread:$0]  (!%p8049_p12), %s11094_s3, 2688, %s388_s27, [#allocation6], %s11048_s19, %s11048_s19, %s11049_s24  }
  0x36   : > { %s7770_s16 = scalar_lea.hbm %s11021_s1, 2560 }
  0x37   : > { %p7771_p5 = scmp.ne.s32.totalorder %s11021_s1, %s7770_s16  ;;  %p7777_p10 = scmp.lt.u32.totalorder %s7770_s16, %s11021_s1 }
  0x39   : > { %p7773_p6 = pnand %p7771_p5, %p8063_p0 }
  0x3b   : > { %p7774_p9 = pneg %p7773_p6 }
  0x3d   : > { %p7779_p13 = pnand %p7777_p10, %p7774_p9 }
  0x3f   : > { %7782 = shalt.err (!%p7779_p13)
}
  0x40   : > { %s7783_s27 = scalar_lea.vmem %s8053_s20, 2560  ;;  %p7791_p4 = scmp.lt.s32.totalorder %s8053_s20, %s8053_s20 }
  0x41   : > { %p7784_p1 = scmp.ne.s32.totalorder %s8053_s20, %s7783_s27  ;;  %p7792_p7 = scmp.lt.s32.totalorder %s7783_s27, %s7783_s27 }
  0x43   : > { %p7786_p2 = pnand %p7784_p1, %p8063_p0  ;;  %p7793_p8 = por %p7792_p7, %p7791_p4 }
  0x45   : > { %p7787_p3 = pneg %p7786_p2 }
  0x47   : > { %p7794_p11 = pnand %p7793_p8, %p7787_p3 }
  0x49   : > { %7797 = shalt.err (!%p7794_p11)
}
  0x4a   : > { %s7902_s14 = smov 128   ;;  %s7903_s30 = smov 8  }
  0x4b   : > { %6885 = dma.hbm_to_vmem [thread:$0]  (!%p8049_p12), %s11021_s1, 2560, %s8053_s20, [#allocation3], %s7902_s14, %s7902_s14, %s7903_s30  }
  0x4c   : > { %s7904_s29 = smov [#allocation7]   ;;  %s7798_s22 = scalar_lea.hbm %s11026_s6, 2560 }
  0x4d   : > { %s406_s15 = sshll.u32 %s7904_s29, 4  ;;  %p7799_p5 = scmp.ne.s32.totalorder %s11026_s6, %s7798_s22  ;;  %s407_s15 = int_to_ptr.vmem [resolvable:$true] %s406_s15 }
  0x4e   : > { %p7805_p10 = scmp.lt.u32.totalorder %s7798_s22, %s11026_s6 }
  0x4f   : > { %p7801_p6 = pnand %p7799_p5, %p8063_p0 }
  0x51   : > { %p7802_p9 = pneg %p7801_p6 }
  0x53   : > { %p7807_p13 = pnand %p7805_p10, %p7802_p9 }
  0x55   : > { %7810 = shalt.err (!%p7807_p13)
}
  0x56   : > { %s7811_s20 = scalar_lea.vmem %s407_s15, 2560  ;;  %p7819_p4 = scmp.lt.s32.totalorder %s407_s15, %s407_s15 }
  0x57   : > { %p7812_p1 = scmp.ne.s32.totalorder %s407_s15, %s7811_s20  ;;  %p7820_p7 = scmp.lt.s32.totalorder %s7811_s20, %s7811_s20 }
  0x59   : > { %p7814_p2 = pnand %p7812_p1, %p8063_p0  ;;  %p7821_p8 = por %p7820_p7, %p7819_p4 }
  0x5b   : > { %p7815_p3 = pneg %p7814_p2 }
  0x5d   : > { %p7822_p11 = pnand %p7821_p8, %p7815_p3 }
  0x5f   : > { %7825 = shalt.err (!%p7822_p11)
}
  0x60   : > { %s11096_s19 = smov 4   ;;  %s11097_s14 = smov 64  }
  0x61   : > { %6891 = dma.hbm_to_vmem [thread:$0]  (!%p8049_p12), %s11026_s6, 2560, %s407_s15, [#allocation6], %s11097_s14, %s11097_s14, %s11096_s19  }
  0x62   : > { %p11098_p5 = scmp.ne.s32.totalorder %s11092_s25, 0 }
  0x64   : > { %452 = sbr.rel (%p11098_p5) target bundleno = 3079 (0xc07), region = 76 }
  0x6b   : > { %p11099_p0 = scmp.eq.s32.totalorder %s8013_s17, 0 }
  0x6d   : > { %7871 = dma.done.wait (%p11099_p0), [#allocation3], 2560   ;;  %p11100_p6 = pmov %p11099_p0 }
  0x6e   : > { %p11101_p9 = pmov %p11099_p0 }
  0x6f   : > { %7873 = vsyncadd (%p11100_p6), [#allocation3], 4294964736 }
  0x70   : > { %7875 = dma.done.wait (%p11101_p9), [#allocation6], 5248   ;;  %p11102_p10 = pmov %p11099_p0 }
  0x71   : > { %s6290_s28 = sshll.u32 %s8013_s17, 5  ;;  %vm577_vm0 = vcmask 1046528   ;;  %vm711_vm1 = vcmask 1044480   ;;  %vm644_vm2 = vcmask 1045504   ;;  %s7905_s23 = smov 32   ;;  %vm778_vm3 = vcmask 1043456  }
  0x72   : > { %7877 = vsyncadd (%p11102_p10), [#allocation6], 4294962048  ;;  %p507_p13 = scmp.lt.s32.totalorder %s6290_s28, 63  ;;  %s7906_s29 = smov 96   ;;  %v7513_v44 = vld [vmem:[#allocation2 + $0x4] ss:$8 sps:$4 sm:$0xff]  }
  0x73   : > { %v7515_v45 = vld [vmem:[#allocation2] ss:$8 sps:$4 sm:$0xff]   ;;  %s7907_s15 = smov 64   ;;  %1478 = vmatprep.subr.bf16.mxu0 %v7513_v44  ;;  %v7516_v54 = vld [vmem:[#allocation2 + $0x14] ss:$8 sps:$4 sm:$0xff]   ;;  %vm1167_vm4 = vcmask 261120  }
  0x74   : > { %s11207_s28 = smov (!%p507_p13, %s6290_s28), 63  ;;  %1479 = vmatpush1.bf16.msra.mxu0 %v7515_v45  ;;  %v7518_v57 = vld [vmem:[#allocation2 + $0x10] ss:$8 sps:$4 sm:$0xff]   ;;  %v7519_v60 = vld [vmem:[#allocation2 + $0x24] ss:$8 sps:$4 sm:$0xff]   ;;  %vm1200_vm5 = vcmask 523264  }
  0x75   : > { %s6291_s26 = sshll.u32 %s11207_s28, 3  ;;  %1480 = vmatprep.subr.bf16.mxu0 %v7516_v54  ;;  %v7531_v54 = vld [vmem:[#allocation2 + $0x64] ss:$8 sps:$4 sm:$0xff]   ;;  %vm1233_vm6 = vcmask 785408   ;;  %vm2173_vm7 = vcmask 326656   ;;  %vm2831_vm8 = vcmask 1041408  }
  0x76   : > { %s8140_s16 = scalar_lea.vmem %s11020_s0, %s6291_s26  ;;  %s7909_s14 = smov 40   ;;  %vm3285_vm9 = vcmask 687104   ;;  %vm3350_vm10 = vcmask 1014784   ;;  %vm3810_vm11 = vcmask 293888   ;;  %vm3383_vm12 = vcmask 654336  }
  0x77   : > { %v8143_v0 = vld [vmem:[%s8140_s16] sm:$0xff]  ;;  %v8146_v1 = vld [vmem:[%s8140_s16 + $0x8] sm:$0xff]  ;;  %v8149_v2 = vld [vmem:[%s8140_s16 + $0x10] sm:$0xff]  ;;  %s7910_s3 = smov 84   ;;  %s7911_s24 = smov 124   ;;  %vm5865_vm13 = vcmask 130048  }
  0x78   : > { %v578_v3 = vrot.slane %v8143_v0, 1  ;;  %v579_v4 = vrot.slane %v8146_v1, 1  ;;  %v581_v5 = vrot.slane %v8149_v2, 1  ;;  %v712_v6 = vrot.slane %v8143_v0, 3  ;;  %v516_v7 = vld [vmem:[%s8140_s16 + $0x18] sm:$0xff]  ;;  %v8161_v12 = vld [vmem:[%s8140_s16 + $0x20] sm:$0xff]  ;;  %1481 = vmatpush1.bf16.msra.mxu0 %v7518_v57 }
  0x79   : > { %v713_v8 = vrot.slane %v8146_v1, 3  ;;  %v715_v9 = vrot.slane %v8149_v2, 3  ;;  %v645_v10 = vrot.slane %v8143_v0, 2  ;;  %v646_v11 = vrot.slane %v8146_v1, 2  ;;  %v518_v21 = vld [vmem:[%s8140_s16 + $0x28] sm:$0xff]  ;;  %v8177_v22 = vld [vmem:[%s8140_s16 + $0x30] sm:$0xff]  ;;  %1482 = vmatprep.subr.bf16.mxu0 %v7519_v60 }
  0x7a   : > { %v580_v13 = vsel %vm577_vm0, %v578_v3, %v579_v4  ;;  %v582_v14 = vsel %vm577_vm0, %v579_v4, %v581_v5  ;;  %v648_v15 = vrot.slane %v8149_v2, 2  ;;  %v583_v16 = vrot.slane %v516_v7, 1  ;;  %v520_v35 = vld [vmem:[%s8140_s16 + $0x38] sm:$0xff]  ;;  %v8193_v40 = vld [vmem:[%s8140_s16 + $0x40] sm:$0xff]  ;;  %s7912_s21 = smov 80   ;;  %s11193_s20 = sld [smem:[#allocation13_spill]] }
  0x7b   : > { %v6953_v17 = vpack.i.bf16 %v582_v14, %v580_v13  ;;  %v714_v18 = vsel %vm711_vm1, %v712_v6, %v713_v8  ;;  %v716_v19 = vsel %vm711_vm1, %v713_v8, %v715_v9  ;;  %v647_v20 = vsel %vm644_vm2, %v645_v10, %v646_v11  ;;  %v7521_v13 = vld [vmem:[#allocation2 + $0x20] ss:$8 sps:$4 sm:$0xff]   ;;  %s11194_s19 = sld [smem:[#allocation18_spill]] }
  0x7c   : > { %v6963_v23 = vpack.i.bf16 %v716_v19, %v714_v18  ;;  %v649_v24 = vsel %vm644_vm2, %v646_v11, %v648_v15  ;;  %v584_v25 = vsel %vm577_vm0, %v581_v5, %v583_v16  ;;  %v585_v26 = vrot.slane %v8161_v12, 1  ;;  %v522_v11 = vld [vmem:[%s8140_s16 + $0x48] sm:$0xff]  ;;  %1483 = vmatpush1.bf16.msra.mxu0 %v7521_v13  ;;  %v8258_v60 = vld [vmem:[%s8140_s16 + $0x80] sm:$0xff] }
  0x7d   : > { %6954 = vrot.lane.b32.xlu0 %v6953_v17, %s7905_s23  ;;  %v6958_v27 = vpack.i.bf16 %v649_v24, %v647_v20  ;;  %v650_v28 = vrot.slane %v516_v7, 2  ;;  %v652_v29 = vrot.slane %v8161_v12, 2  ;;  %v717_v30 = vrot.slane %v516_v7, 3 }
  0x7e   : > { %6964 = vrot.lane.b32.xlu1 %v6963_v23, %s7906_s29  ;;  %v586_v31 = vsel %vm577_vm0, %v583_v16, %v585_v26  ;;  %v719_v32 = vrot.slane %v8161_v12, 3  ;;  %v587_v33 = vrot.slane %v518_v21, 1  ;;  %v589_v34 = vrot.slane %v8177_v22, 1  ;;  %v8215_v12 = vld [vmem:[%s8140_s16 + $0x50] sm:$0xff] }
  0x7f   : > { %v6968_v36 = vpack.i.bf16 %v586_v31, %v584_v25  ;;  %v651_v37 = vsel %vm644_vm2, %v648_v15, %v650_v28  ;;  %v653_v38 = vsel %vm644_vm2, %v650_v28, %v652_v29  ;;  %v718_v39 = vsel %vm711_vm1, %v715_v9, %v717_v30  ;;  %v7522_v16 = vld [vmem:[#allocation2 + $0x34] ss:$8 sps:$4 sm:$0xff]  }
  0x80   : > { %v6973_v41 = vpack.i.bf16 %v653_v38, %v651_v37  ;;  %v720_v42 = vsel %vm711_vm1, %v717_v30, %v719_v32  ;;  %v588_v43 = vsel %vm577_vm0, %v585_v26, %v587_v33  ;;  %v590_v47 = vsel %vm577_vm0, %v587_v33, %v589_v34  ;;  %v524_v25 = vld [vmem:[%s8140_s16 + $0x58] sm:$0xff]  ;;  %v8227_v26 = vld [vmem:[%s8140_s16 + $0x60] sm:$0xff]  ;;  %1484 = vmatprep.subr.bf16.mxu0 %v7522_v16 }
  0x81   : > { %6959 = vrot.lane.b32.xlu0 %v6958_v27, %s7907_s15  ;;  %v6978_v46 = vpack.i.bf16 %v720_v42, %v718_v39  ;;  %v654_v48 = vrot.slane %v518_v21, 2  ;;  %v656_v49 = vrot.slane %v8177_v22, 2  ;;  %v721_v50 = vrot.slane %v518_v21, 3  ;;  %v7524_v27 = vld [vmem:[#allocation2 + $0x30] ss:$8 sps:$4 sm:$0xff]   ;;  %v8239_v42 = vld [vmem:[%s8140_s16 + $0x68] sm:$0xff] }
  0x82   : > { %6969 = vrot.lane.b32.xlu1 %v6968_v36, %s7905_s23  ;;  %v723_v51 = vrot.slane %v8177_v22, 3  ;;  %v591_v52 = vrot.slane %v520_v35, 1  ;;  %v593_v53 = vrot.slane %v8193_v40, 1  ;;  %v6983_v58 = vpack.i.bf16 %v590_v47, %v588_v43  ;;  %v7525_v30 = vld [vmem:[#allocation2 + $0x44] ss:$8 sps:$4 sm:$0xff]   ;;  %1485 = vmatpush1.bf16.msra.mxu0 %v7524_v27  ;;  %p11197_p1 = scmp.ne.s32.totalorder %s11194_s19, 0 }
  0x83   : > { %v655_v55 = vsel %vm644_vm2, %v652_v29, %v654_v48  ;;  %v657_v56 = vsel %vm644_vm2, %v654_v48, %v656_v49  ;;  %v658_v59 = vrot.slane %v520_v35, 2  ;;  %v722_v62 = vsel %vm711_vm1, %v719_v32, %v721_v50  ;;  %v7527_v39 = vld [vmem:[#allocation2 + $0x40] ss:$8 sps:$4 sm:$0xff]   ;;  %1486 = vmatprep.subr.bf16.mxu0 %v7525_v30  ;;  %v7528_v43 = vld [vmem:[#allocation2 + $0x54] ss:$8 sps:$4 sm:$0xff]  }
  0x84   : > { %v6988_v61 = vpack.i.bf16 %v657_v56, %v655_v55  ;;  %v724_v63 = vsel %vm711_vm1, %v721_v50, %v723_v51  ;;  %v660_v4 = vrot.slane %v8193_v40, 2  ;;  %v592_v5 = vsel %vm577_vm0, %v589_v34, %v591_v52  ;;  %v8245_v48 = vld [vmem:[%s8140_s16 + $0x70] sm:$0xff] }
  0x85   : > { %6974 = vrot.lane.b32.xlu0 %v6973_v41, %s7907_s15  ;;  %v594_v7 = vsel %vm577_vm0, %v591_v52, %v593_v53  ;;  %v725_v8 = vrot.slane %v520_v35, 3  ;;  %v727_v9 = vrot.slane %v8193_v40, 3  ;;  %v6993_v14 = vpack.i.bf16 %v724_v63, %v722_v62 }
  0x86   : > { %6979 = vrot.lane.b32.xlu1 %v6978_v46, %s7906_s29  ;;  %v659_v15 = vsel %vm644_vm2, %v656_v49, %v658_v59  ;;  %v6998_v17 = vpack.i.bf16 %v594_v7, %v592_v5  ;;  %v661_v18 = vsel %vm644_vm2, %v658_v59, %v660_v4  ;;  %v595_v19 = vrot.slane %v522_v11, 1  ;;  %1487 = vmatpush1.bf16.msra.mxu0 %v7527_v39  ;;  %v8255_v59 = vld [vmem:[%s8140_s16 + $0x78] sm:$0xff] }
  0x87   : > { %v597_v20 = vrot.slane %v8215_v12, 1  ;;  %v726_v21 = vsel %vm711_vm1, %v723_v51, %v725_v8  ;;  %v728_v22 = vsel %vm711_vm1, %v725_v8, %v727_v9  ;;  %v662_v23 = vrot.slane %v522_v11, 2  ;;  %1488 = vmatprep.subr.bf16.mxu0 %v7528_v43  ;;  %v7534_v7 = vld [vmem:[#allocation2 + $0x74] ss:$8 sps:$4 sm:$0xff]  }
  0x88   : > { %v664_v24 = vrot.slane %v8215_v12, 2  ;;  %v7003_v28 = vpack.i.bf16 %v661_v18, %v659_v15  ;;  %v729_v29 = vrot.slane %v522_v11, 3  ;;  %v7008_v31 = vpack.i.bf16 %v728_v22, %v726_v21  ;;  %v7536_v15 = vld [vmem:[#allocation2 + $0x70] ss:$8 sps:$4 sm:$0xff]   ;;  %v7540_v39 = vld [vmem:[#allocation2 + $0x94] ss:$8 sps:$4 sm:$0xff]  }
  0x89   : > { %6984 = vrot.lane.b32.xlu0 %v6983_v58, %s7905_s23  ;;  %v596_v32 = vsel %vm577_vm0, %v593_v53, %v595_v19  ;;  %v598_v33 = vsel %vm577_vm0, %v595_v19, %v597_v20  ;;  %v731_v34 = vrot.slane %v8215_v12, 3  ;;  %v663_v35 = vsel %vm644_vm2, %v660_v4, %v662_v23  ;;  %v7530_v53 = vld [vmem:[#allocation2 + $0x50] ss:$8 sps:$4 sm:$0xff]  }
  0x8a   : > { %6989 = vrot.lane.b32.xlu1 %v6988_v61, %s7907_s15  ;;  %v665_v36 = vsel %vm644_vm2, %v662_v23, %v664_v24  ;;  %v599_v37 = vrot.slane %v524_v25, 1  ;;  %v601_v38 = vrot.slane %v8227_v26, 1  ;;  %v7013_v40 = vpack.i.bf16 %v598_v33, %v596_v32  ;;  %v7533_v61 = vld [vmem:[#allocation2 + $0x60] ss:$8 sps:$4 sm:$0xff]   ;;  %1489 = vmatpush1.bf16.msra.mxu0 %v7530_v53 }
  0x8b   : > { %v730_v41 = vsel %vm711_vm1, %v727_v9, %v729_v29  ;;  %v7018_v44 = vpack.i.bf16 %v665_v36, %v663_v35  ;;  %v732_v45 = vsel %vm711_vm1, %v729_v29, %v731_v34  ;;  %v666_v46 = vrot.slane %v524_v25, 2  ;;  %1490 = vmatprep.subr.bf16.mxu0 %v7531_v54  ;;  %v7539_v35 = vld [vmem:[#allocation2 + $0x80] ss:$8 sps:$4 sm:$0xff]  }
  0x8c   : > { %v668_v47 = vrot.slane %v8227_v26, 2  ;;  %v600_v49 = vsel %vm577_vm0, %v597_v20, %v599_v37  ;;  %v602_v50 = vsel %vm577_vm0, %v599_v37, %v601_v38  ;;  %v733_v51 = vrot.slane %v524_v25, 3  ;;  %v8281_v25 = vld [vmem:[%s8140_s16 + $0x90] sm:$0xff] }
  0x8d   : > { %6994 = vrot.lane.b32.xlu0 %v6993_v14, %s7906_s29  ;;  %v735_v52 = vrot.slane %v8227_v26, 3  ;;  %v7023_v55 = vpack.i.bf16 %v732_v45, %v730_v41  ;;  %v7028_v56 = vpack.i.bf16 %v602_v50, %v600_v49  ;;  %v603_v57 = vrot.slane %v8239_v42, 1  ;;  %v7537_v26 = vld [vmem:[#allocation2 + $0x84] ss:$8 sps:$4 sm:$0xff]  }
  0x8e   : > { %6999 = vrot.lane.b32.xlu1 %v6998_v17, %s7905_s23  ;;  %v605_v58 = vrot.slane %v8245_v48, 1  ;;  %v667_v62 = vsel %vm644_vm2, %v664_v24, %v666_v46  ;;  %v669_v63 = vsel %vm644_vm2, %v666_v46, %v668_v47  ;;  %v670_v4 = vrot.slane %v8239_v42, 2  ;;  %v530_v24 = vld [vmem:[%s8140_s16 + $0x88] sm:$0xff]  ;;  %1491 = vmatpush1.bf16.msra.mxu0 %v7533_v61  ;;  %v8298_v45 = vld [vmem:[%s8140_s16 + $0xa0] sm:$0xff]  ;;  %v7542_v46 = vld [vmem:[#allocation2 + $0x90] ss:$8 sps:$4 sm:$0xff]  }
  0x8f   : > { %v672_v5 = vrot.slane %v8245_v48, 2  ;;  %v734_v8 = vsel %vm711_vm1, %v731_v34, %v733_v51  ;;  %v736_v9 = vsel %vm711_vm1, %v733_v51, %v735_v52  ;;  %v737_v11 = vrot.slane %v8239_v42, 3  ;;  %1492 = vmatprep.subr.bf16.mxu0 %v7534_v7  ;;  %v8313_v61 = vld [vmem:[%s8140_s16 + $0xb0] sm:$0xff] }
  0x90   : > { %v739_v12 = vrot.slane %v8245_v48, 3  ;;  %v7033_v13 = vpack.i.bf16 %v669_v63, %v667_v62  ;;  %v604_v14 = vsel %vm577_vm0, %v601_v38, %v603_v57  ;;  %v7038_v16 = vpack.i.bf16 %v736_v9, %v734_v8 }
  0x91   : > { %7004 = vrot.lane.b32.xlu0 %v7003_v28, %s7907_s15  ;;  %v606_v17 = vsel %vm577_vm0, %v603_v57, %v605_v58  ;;  %v607_v18 = vrot.slane %v8255_v59, 1  ;;  %v609_v19 = vrot.slane %v8258_v60, 1  ;;  %v671_v20 = vsel %vm644_vm2, %v668_v47, %v670_v4 }
  0x92   : > { %7009 = vrot.lane.b32.xlu1 %v7008_v31, %s7906_s29  ;;  %v673_v21 = vsel %vm644_vm2, %v670_v4, %v672_v5  ;;  %v674_v22 = vrot.slane %v8255_v59, 2  ;;  %v676_v23 = vrot.slane %v8258_v60, 2  ;;  %v741_v27 = vrot.slane %v8255_v59, 3  ;;  %1493 = vmatpush1.bf16.msra.mxu0 %v7536_v15 }
  0x93   : > { %v743_v28 = vrot.slane %v8258_v60, 3  ;;  %v7043_v29 = vpack.i.bf16 %v606_v17, %v604_v14  ;;  %v738_v30 = vsel %vm711_vm1, %v735_v52, %v737_v11  ;;  %v740_v31 = vsel %vm711_vm1, %v737_v11, %v739_v12  ;;  %1494 = vmatprep.subr.bf16.mxu0 %v7537_v26  ;;  %v534_v60 = vld [vmem:[%s8140_s16 + $0xa8] sm:$0xff]  ;;  %v8328_v17 = vld [vmem:[%s8140_s16 + $0xc0] sm:$0xff]  ;;  %v8338_v26 = vld [vmem:[%s8140_s16 + $0xf0] sm:$0xff] }
  0x94   : > { %v7048_v32 = vpack.i.bf16 %v673_v21, %v671_v20  ;;  %v608_v33 = vsel %vm577_vm0, %v605_v58, %v607_v18  ;;  %v610_v34 = vsel %vm577_vm0, %v607_v18, %v609_v19  ;;  %v7053_v36 = vpack.i.bf16 %v740_v31, %v738_v30 }
  0x95   : > { %7014 = vrot.lane.b32.xlu0 %v7013_v40, %s7905_s23  ;;  %v611_v37 = vrot.slane %v530_v24, 1  ;;  %v613_v38 = vrot.slane %v8281_v25, 1  ;;  %v675_v40 = vsel %vm644_vm2, %v672_v5, %v674_v22  ;;  %v677_v41 = vsel %vm644_vm2, %v674_v22, %v676_v23 }
  0x96   : > { %7019 = vrot.lane.b32.xlu1 %v7018_v44, %s7907_s15  ;;  %v678_v42 = vrot.slane %v530_v24, 2  ;;  %v680_v43 = vrot.slane %v8281_v25, 2  ;;  %v532_v44 = vld [vmem:[%s8140_s16 + $0x98] sm:$0xff]  ;;  %v7058_v47 = vpack.i.bf16 %v610_v34, %v608_v33  ;;  %v742_v48 = vsel %vm711_vm1, %v739_v12, %v741_v27  ;;  %1495 = vmatpush1.bf16.msra.mxu0 %v7539_v35 }
  0x97   : > { %v744_v49 = vsel %vm711_vm1, %v741_v27, %v743_v28  ;;  %v7063_v50 = vpack.i.bf16 %v677_v41, %v675_v40  ;;  %v745_v51 = vrot.slane %v530_v24, 3  ;;  %1496 = vmatprep.subr.bf16.mxu0 %v7540_v39  ;;  %v612_v53 = vsel %vm577_vm0, %v609_v19, %v611_v37  ;;  %v8355_v41 = vld [vmem:[%s8140_s16 + $0xc8] sm:$0xff] }
  0x98   : > { %v7068_v52 = vpack.i.bf16 %v744_v49, %v742_v48  ;;  %v614_v54 = vsel %vm577_vm0, %v611_v37, %v613_v38  ;;  %v681_v57 = vsel %vm644_vm2, %v678_v42, %v680_v43  ;;  %v615_v58 = vrot.slane %v532_v44, 1  ;;  %v8372_v48 = vld [vmem:[%s8140_s16 + $0xd0] sm:$0xff] }
  0x99   : > { %7024 = vrot.lane.b32.xlu0 %v7023_v55, %s7906_s29  ;;  %v747_v55 = vrot.slane %v8281_v25, 3  ;;  %v617_v59 = vrot.slane %v8298_v45, 1  ;;  %v7073_v62 = vpack.i.bf16 %v614_v54, %v612_v53  ;;  %v746_v63 = vsel %vm711_vm1, %v743_v28, %v745_v51 }
  0x9a   : > { %7029 = vrot.lane.b32.xlu1 %v7028_v56, %s7905_s23  ;;  %v679_v56 = vsel %vm644_vm2, %v676_v23, %v678_v42  ;;  %1497 = vmatpush1.bf16.msra.mxu0 %v7542_v46  ;;  %v682_v7 = vrot.slane %v532_v44, 2  ;;  %v684_v8 = vrot.slane %v8298_v45, 2  ;;  %v616_v9 = vsel %vm577_vm0, %v613_v38, %v615_v58 }
  0x9b   : > { %v7078_v4 = vpack.i.bf16 %v681_v57, %v679_v56  ;;  %v748_v5 = vsel %vm711_vm1, %v745_v51, %v747_v55  ;;  %v618_v11 = vsel %vm577_vm0, %v615_v58, %v617_v59  ;;  %v749_v12 = vrot.slane %v532_v44, 3  ;;  %v8387_v58 = vld [vmem:[%s8140_s16 + $0xe0] sm:$0xff] }
  0x9c   : > { %v619_v14 = vrot.slane %v534_v60, 1  ;;  %v621_v15 = vrot.slane %v8313_v61, 1  ;;  %v7083_v18 = vpack.i.bf16 %v748_v5, %v746_v63  ;;  %v7088_v19 = vpack.i.bf16 %v618_v11, %v616_v9 }
  0x9d   : > { %7034 = vrot.lane.b32.xlu0 %v7033_v13, %s7907_s15  ;;  %v751_v13 = vrot.slane %v8298_v45, 3  ;;  %v683_v20 = vsel %vm644_vm2, %v680_v43, %v682_v7  ;;  %v685_v21 = vsel %vm644_vm2, %v682_v7, %v684_v8  ;;  %v750_v22 = vsel %vm711_vm1, %v747_v55, %v749_v12  ;;  %v540_v55 = vld [vmem:[%s8140_s16 + $0xd8] sm:$0xff] }
  0x9e   : > { %7039 = vrot.lane.b32.xlu1 %v7038_v16, %s7906_s29  ;;  %v8325_v16 = vld [vmem:[%s8140_s16 + $0xb8] sm:$0xff]  ;;  %v686_v24 = vrot.slane %v534_v60, 2  ;;  %v688_v25 = vrot.slane %v8313_v61, 2  ;;  %v620_v27 = vsel %vm577_vm0, %v617_v59, %v619_v14  ;;  %v622_v28 = vsel %vm577_vm0, %v619_v14, %v621_v15 }
  0x9f   : > { %v752_v23 = vsel %vm711_vm1, %v749_v12, %v751_v13  ;;  %v7093_v30 = vpack.i.bf16 %v685_v21, %v683_v20  ;;  %v753_v31 = vrot.slane %v534_v60, 3  ;;  %v623_v35 = vrot.slane %v8325_v16, 1 }
  0xa0   : > { %v7098_v34 = vpack.i.bf16 %v752_v23, %v750_v22  ;;  %v771_v37 = vrot.slane %v8338_v26, 3  ;;  %v7103_v38 = vpack.i.bf16 %v622_v28, %v620_v27  ;;  %v687_v39 = vsel %vm644_vm2, %v684_v8, %v686_v24 }
  0xa1   : > { %7044 = vrot.lane.b32.xlu0 %v7043_v29, %s7905_s23  ;;  %v8343_v29 = vld [vmem:[%s8140_s16 + $0xf8] sm:$0xff]  ;;  %v689_v40 = vsel %vm644_vm2, %v686_v24, %v688_v25  ;;  %v779_v42 = vrot.slane %v8143_v0, 4  ;;  %v690_v43 = vrot.slane %v8325_v16, 2  ;;  %v692_v44 = vrot.slane %v8328_v17, 2 }
  0xa2   : > { %7049 = vrot.lane.b32.xlu1 %v7048_v32, %s7907_s15  ;;  %v755_v32 = vrot.slane %v8313_v61, 3  ;;  %v773_v33 = vrot.slane %v8343_v29, 3  ;;  %v782_v51 = vrot.slane %v8149_v2, 4  ;;  %v624_v53 = vsel %vm577_vm0, %v621_v15, %v623_v35 }
  0xa3   : > { %v757_v54 = vrot.slane %v8325_v16, 3  ;;  %v7108_v56 = vpack.i.bf16 %v689_v40, %v687_v39  ;;  %v759_v57 = vrot.slane %v8328_v17, 3  ;;  %v627_v60 = vrot.slane %v8355_v41, 1  ;;  %v542_v16 = vld [vmem:[%s8140_s16 + $0xe8] sm:$0xff] }
  0xa4   : > { %v8363_v45 = vsel %vm711_vm1, %v771_v37, %v773_v33  ;;  %v8368_v46 = vsel %vm711_vm1, %v773_v33, %v712_v6  ;;  %v693_v5 = vsel %vm644_vm2, %v690_v43, %v692_v44  ;;  %v629_v8 = vrot.slane %v8372_v48, 1 }
  0xa5   : > { %7054 = vrot.lane.b32.xlu0 %v7053_v36, %s7906_s29  ;;  %v625_v36 = vrot.slane %v8328_v17, 1  ;;  %v7188_v49 = vpack.i.bf16 %v8368_v46, %v8363_v45  ;;  %v758_v7 = vsel %vm711_vm1, %v755_v32, %v757_v54  ;;  %v694_v9 = vrot.slane %v8355_v41, 2 }
  0xa6   : > { %7059 = vrot.lane.b32.xlu1 %v7058_v47, %s7905_s23  ;;  %v754_v47 = vsel %vm711_vm1, %v751_v13, %v753_v31  ;;  %v696_v11 = vrot.slane %v8372_v48, 2  ;;  %v760_v12 = vsel %vm711_vm1, %v757_v54, %v759_v57  ;;  %v761_v13 = vrot.slane %v8355_v41, 3 }
  0xa7   : > { %v626_v6 = vsel %vm577_vm0, %v623_v35, %v625_v36  ;;  %v763_v14 = vrot.slane %v8372_v48, 3  ;;  %v631_v15 = vrot.slane %v540_v55, 1  ;;  %v633_v17 = vrot.slane %v8387_v58, 1 }
  0xa8   : > { %v7118_v63 = vpack.i.bf16 %v626_v6, %v624_v53  ;;  %v7128_v20 = vpack.i.bf16 %v760_v12, %v758_v7  ;;  %v628_v21 = vsel %vm577_vm0, %v625_v36, %v627_v60  ;;  %v630_v22 = vsel %vm577_vm0, %v627_v60, %v629_v8 }
  0xa9   : > { %7064 = vrot.lane.b32.xlu0 %v7063_v50, %s7907_s15  ;;  %v780_v50 = vrot.slane %v8146_v1, 4  ;;  %v700_v23 = vrot.slane %v8387_v58, 2  ;;  %v765_v24 = vrot.slane %v540_v55, 3  ;;  %v635_v27 = vrot.slane %v542_v16, 1 }
  0xaa   : > { %7069 = vrot.lane.b32.xlu1 %v7068_v52, %s7906_s29  ;;  %v756_v52 = vsel %vm711_vm1, %v753_v31, %v755_v32  ;;  %v695_v28 = vsel %vm644_vm2, %v692_v44, %v694_v9  ;;  %v637_v31 = vrot.slane %v8338_v26, 1  ;;  %v702_v32 = vrot.slane %v542_v16, 2 }
  0xab   : > { %v781_v1 = vsel %vm778_vm3, %v779_v42, %v780_v50  ;;  %v783_v59 = vsel %vm778_vm3, %v780_v50, %v782_v51  ;;  %v7133_v33 = vpack.i.bf16 %v630_v22, %v628_v21  ;;  %v764_v36 = vsel %vm711_vm1, %v761_v13, %v763_v14  ;;  %v7546_v22 = vld [vmem:[#allocation5 + $0x8] sm:$0xff]  }
  0xac   : > { %v1287_v61 = vpack.c.bf16 %v783_v59, %v781_v1  ;;  %v769_v39 = vrot.slane %v542_v16, 3  ;;  %v632_v40 = vsel %vm577_vm0, %v629_v8, %v631_v15  ;;  %v634_v41 = vsel %vm577_vm0, %v631_v15, %v633_v17  ;;  %v7710_v8 = vld [vmem:[%s8140_s16 + $0x18] sm:$0xff]  ;;  %v7545_v15 = vld [vmem:[#allocation5] sm:$0xff]  }
  0xad   : > { %7074 = vrot.lane.b32.xlu0 %v7073_v62, %s7905_s23  ;;  %v7113_v62 = vpack.i.bf16 %v756_v52, %v754_v47  ;;  %v7148_v44 = vpack.i.bf16 %v634_v41, %v632_v40  ;;  %v766_v50 = vsel %vm711_vm1, %v763_v14, %v765_v24  ;;  %v636_v6 = vsel %vm577_vm0, %v633_v17, %v635_v27  ;;  %v7543_v41 = vld [vmem:[#allocation5 + $0x54] sm:$0xff]  }
  0xae   : > { %7079 = vrot.lane.b32.xlu1 %v7078_v4, %s7907_s15  ;;  %v691_v4 = vsel %vm644_vm2, %v688_v25, %v690_v43  ;;  %6312 = vmatprep.mubr.msk.bf16.mxu0 %vm1167_vm4, %v1287_v61  ;;  %v767_v25 = vrot.slane %v8387_v58, 3  ;;  %v703_v58 = vsel %vm644_vm2, %v700_v23, %v702_v32  ;;  %vm5651_vm14 = vcmask 916480  }
  0xaf   : > { %vm7915_vm15 = vmmov 0  }
  0xb0   : > { %v768_v52 = vsel %vm711_vm1, %v765_v24, %v767_v25  ;;  %v770_v61 = vsel %vm711_vm1, %v767_v25, %v769_v39  ;;  %v7713_v24 = vld [vmem:[%s8140_s16] sm:$0xff] }
  0xb1   : > { %7084 = vrot.lane.b32.xlu0 %v7083_v18, %s7906_s29  ;;  %v698_v18 = vrot.slane %v540_v55, 2  ;;  %v7158_v54 = vpack.i.bf16 %v768_v52, %v766_v50  ;;  %v638_v55 = vsel %vm577_vm0, %v635_v27, %v637_v31  ;;  %v8488_v50 = vld [vmem:[%s8140_s16 + $0x30] sm:$0xff] }
  0xb2   : > { %7089 = vrot.lane.b32.xlu1 %v7088_v19, %s7905_s23  ;;  %v7123_v19 = vpack.i.bf16 %v693_v5, %v691_v4  ;;  %v7163_v59 = vpack.i.bf16 %v638_v55, %v636_v6  ;;  %v790_v52 = vrot.slane %v8488_v50, 4 }
  0xb3   : > { %v699_v47 = vsel %vm644_vm2, %v696_v11, %v698_v18  ;;  %v701_v48 = vsel %vm644_vm2, %v698_v18, %v700_v23  ;;  %v7712_v23 = vld [vmem:[%s8140_s16 + $0x8] sm:$0xff] }
  0xb4   : > { %v7153_v53 = vpack.i.bf16 %v701_v48, %v699_v47 }
  0xb5   : > { %7094 = vrot.lane.b32.xlu0 %v7093_v30, %s7907_s15  ;;  %v697_v30 = vsel %vm644_vm2, %v694_v9, %v696_v11  ;;  %v784_v9 = vrot.slane %v7710_v8, 4  ;;  %v8465_v11 = vld [vmem:[%s8140_s16 + $0x20] sm:$0xff] }
  0xb6   : > { %7099 = vrot.lane.b32.xlu1 %v7098_v34, %s7906_s29  ;;  %v762_v34 = vsel %vm711_vm1, %v759_v57, %v761_v13  ;;  %v7138_v35 = vpack.i.bf16 %v697_v30, %v695_v28  ;;  %v706_v57 = vrot.slane %v8343_v29, 2  ;;  %v786_v12 = vrot.slane %v8465_v11, 4 }
  0xb7   : > { %v7143_v43 = vpack.i.bf16 %v764_v36, %v762_v34  ;;  %v785_v45 = vsel %vm778_vm3, %v782_v51, %v784_v9 }
  0xb8   : > { %v787_v46 = vsel %vm778_vm3, %v784_v9, %v786_v12  ;;  %v7547_v9 = vld [vmem:[#allocation5 + $0x64] sm:$0xff]  }
  0xb9   : > { %7104 = vrot.lane.b32.xlu0 %v7103_v38, %s7905_s23  ;;  %v704_v38 = vrot.slane %v8338_v26, 2  ;;  %v710_v26 = vsel %vm644_vm2, %v706_v57, %v645_v10 }
  0xba   : > { %7109 = vrot.lane.b32.xlu1 %v7108_v56, %s7907_s15  ;;  %v639_v56 = vrot.slane %v8343_v29, 1 }
  0xbb   : > { %v705_v1 = vsel %vm644_vm2, %v702_v32, %v704_v38  ;;  %v707_v7 = vsel %vm644_vm2, %v704_v38, %v706_v57  ;;  %v7714_v32 = vld [vmem:[%s8140_s16 + $0x28] sm:$0xff] }
  0xbc   : > { %v7168_v60 = vpack.i.bf16 %v705_v1, %v703_v58  ;;  %v643_v29 = vsel %vm577_vm0, %v639_v56, %v578_v3  ;;  %v7544_v58 = vld [vmem:[#allocation5 + $0x5c] sm:$0xff]  }
  0xbd   : > { %7114 = vrot.lane.b32.xlu0 %v7113_v62, %s7906_s29  ;;  %v772_v62 = vsel %vm711_vm1, %v769_v39, %v771_v37  ;;  %v7183_v37 = vpack.i.bf16 %v710_v26, %v707_v7 }
  0xbe   : > { %7119 = vrot.lane.b32.xlu1 %v7118_v63, %s7905_s23  ;;  %v640_v63 = vsel %vm577_vm0, %v637_v31, %v639_v56  ;;  %v7173_v4 = vpack.i.bf16 %v772_v62, %v770_v61  ;;  %v1289_v31 = vpack.c.bf16 %v787_v46, %v785_v45 }
  0xbf   : > { %v7178_v5 = vpack.i.bf16 %v643_v29, %v640_v63  ;;  %v7549_v63 = vld [vmem:[#allocation5 + $0x18] sm:$0xff]  }
  0xc1   : > { %7124 = vrot.lane.b32.xlu0 %v7123_v19, %s7907_s15 }
  0xc2   : > { %7129 = vrot.lane.b32.xlu1 %v7128_v20, %s7906_s29 }
  0xc5   : > { %7134 = vrot.lane.b32.xlu0 %v7133_v33, %s7905_s23  ;;  %v788_v33 = vrot.slane %v7714_v32, 4 }
  0xc6   : > { %7139 = vrot.lane.b32.xlu1 %v7138_v35, %s7907_s15  ;;  %v7715_v35 = vld [vmem:[%s8140_s16 + $0x10] sm:$0xff] }
  0xc7   : > { %v789_v61 = vsel %vm778_vm3, %v786_v12, %v788_v33  ;;  %v791_v62 = vsel %vm778_vm3, %v788_v33, %v790_v52 }
  0xc9   : > { %7144 = vrot.lane.b32.xlu0 %v7143_v43, %s7906_s29 }
  0xca   : > { %7149 = vrot.lane.b32.xlu1 %v7148_v44, %s7905_s23 }
  0xcd   : > { %7154 = vrot.lane.b32.xlu0 %v7153_v53, %s7907_s15  ;;  %v7548_v53 = vld [vmem:[#allocation5 + $0x10] sm:$0xff]  }
  0xce   : > { %7159 = vrot.lane.b32.xlu1 %v7158_v54, %s7906_s29 }
  0xd1   : > { %7164 = vrot.lane.b32.xlu0 %v7163_v59, %s7905_s23 }
  0xd2   : > { %7169 = vrot.lane.b32.xlu1 %v7168_v60, %s7907_s15 }
  0xd5   : > { %7174 = vrot.lane.b32.xlu0 %v7173_v4, %s7906_s29 }
  0xd6   : > { %7179 = vrot.lane.b32.xlu1 %v7178_v5, %s7905_s23 }
  0xd9   : > { %7184 = vrot.lane.b32.xlu0 %v7183_v37, %s7907_s15 }
  0xda   : > { %7189 = vrot.lane.b32.xlu1 %v7188_v49, %s7906_s29  ;;  %v11057_v49 = vmov 0  }
  0xdb   : > { %2474 = vmatprep.subr.bf16.mxu0 %v11057_v49  ;;  %2225 = vmatprep.subr.bf16.mxu1 %v11057_v49 }
  0xdc   : > { %2226 = vmatpush1.bf16.msra.mxu1 %v7545_v15  ;;  %v8506_v15 = vld [vmem:[%s8140_s16 + $0x40] sm:$0xff] }
  0xdd   : > { %2227 = vmatprep.subr.bf16.mxu1 %v11057_v49 }
  0xe0   : > { %2228 = vmatpush1.bf16.msra.mxu1 %v7546_v22  ;;  %v7550_v22 = vld [vmem:[#allocation5 + $0x6c] sm:$0xff]  }
  0xe1   : > { %2229 = vmatprep.subr.bf16.mxu1 %v11057_v49 }
  0xe4   : > { %2230 = vmatpush1.bf16.msra.mxu1 %v7548_v53 }
  0xe5   : > { %2231 = vmatprep.subr.bf16.mxu1 %v11057_v49 }
  0xe8   : > { %2232 = vmatpush1.bf16.msra.mxu1 %v7549_v63 }
  0xe9   : > { %2233 = vmatprep.subr.bf16.mxu1 %v11057_v49 }
  0xef   : > { %v6955_v3 = vpop.permute.xlu0 %6954 }
  0xf0   : > { %v6965_v10 = vpop.permute.xlu1 %6964  ;;  %v6957_v13 = vunpack.i.h.bf16 %v6955_v3  ;;  %v6956_v14 = vunpack.i.l.bf16 %v6955_v3 }
  0xf1   : > { %v6967_v16 = vunpack.i.h.bf16 %v6965_v10  ;;  %v6966_v17 = vunpack.i.l.bf16 %v6965_v10 }
  0xf2   : > { %v1169_v2 = vsel %vm1167_vm4, %v7712_v23, %v6957_v13  ;;  %v1168_v51 = vsel %vm1167_vm4, %v7713_v24, %v6956_v14  ;;  %v7717_v13 = vld [vmem:[%s8140_s16 + $0x38] sm:$0xff]  ;;  %v7553_v24 = vld [vmem:[#allocation5 + $0x28] sm:$0xff]  }
  0xf3   : > { %v6960_v18 = vpop.permute.xlu0 %6959  ;;  %v792_v14 = vrot.slane %v7717_v13, 4 }
  0xf4   : > { %v6962_v19 = vunpack.i.h.bf16 %v6960_v18  ;;  %v6961_v20 = vunpack.i.l.bf16 %v6960_v18  ;;  %v6970_v21 = vpop.permute.xlu1 %6969 }
  0xf5   : > { %v6972_v25 = vunpack.i.h.bf16 %v6970_v21  ;;  %v6971_v27 = vunpack.i.l.bf16 %v6970_v21  ;;  %v793_v23 = vsel %vm778_vm3, %v790_v52, %v792_v14 }
  0xf6   : > { %v1201_v28 = vsel %vm1200_vm5, %v1168_v51, %v6961_v20  ;;  %v1202_v30 = vsel %vm1200_vm5, %v1169_v2, %v6962_v19 }
  0xf7   : > { %v1171_v34 = vsel %vm1167_vm4, %v7710_v8, %v6972_v25  ;;  %v1170_v36 = vsel %vm1167_vm4, %v7715_v35, %v6971_v27  ;;  %v6975_v38 = vpop.permute.xlu0 %6974  ;;  %v1234_v39 = vsel %vm1233_vm6, %v1201_v28, %v6966_v17  ;;  %v1235_v40 = vsel %vm1233_vm6, %v1202_v30, %v6967_v16  ;;  %v7551_v17 = vld [vmem:[#allocation5 + $0x20] sm:$0xff]  }
  0xf8   : > { %v6977_v43 = vunpack.i.h.bf16 %v6975_v38  ;;  %v6976_v44 = vunpack.i.l.bf16 %v6975_v38  ;;  %v6980_v47 = vpop.permute.xlu1 %6979  ;;  %v1286_v48 = vpack.c.bf16 %v1235_v40, %v1234_v39  ;;  %v1291_v8 = vpack.c.bf16 %v791_v62, %v789_v61  ;;  %2234 = vmatpush1.bf16.msra.mxu1 %v7551_v17  ;;  %v7719_v38 = vld [vmem:[%s8140_s16 + $0x48] sm:$0xff]  ;;  %v7720_v40 = vld [vmem:[%s8140_s16 + $0x50] sm:$0xff] }
  0xf9   : > { %v6982_v6 = vunpack.i.h.bf16 %v6980_v47  ;;  %v6981_v54 = vunpack.i.l.bf16 %v6980_v47  ;;  %v794_v16 = vrot.slane %v8506_v15, 4  ;;  %2235 = vmatprep.subr.bf16.mxu1 %v11057_v49  ;;  %v796_v39 = vrot.slane %v7719_v38, 4 }
  0xfa   : > { %1511 = vmatmul.mubr.bf16.vlgmr.msra.gmra.mrb[0].mxu0 %v1286_v48  ;;  %v1203_v55 = vsel %vm1200_vm5, %v1170_v36, %v6976_v44  ;;  %v1204_v56 = vsel %vm1200_vm5, %v1171_v34, %v6977_v43  ;;  %v7552_v34 = vld [vmem:[#allocation5 + $0x74] sm:$0xff]  }
  0xfb   : > { %v6985_v57 = vpop.permute.xlu0 %6984  ;;  %6313 = vmatprep.mubr.msk.bf16.mxu0 %vm1167_vm4, %v1289_v31  ;;  %2475 = vmatpush1.bf16.msra.mxu0 %v7543_v41  ;;  %v1236_v29 = vsel %vm1233_vm6, %v1203_v55, %v6981_v54  ;;  %v1237_v4 = vsel %vm1233_vm6, %v1204_v56, %v6982_v6  ;;  %v795_v2 = vsel %vm778_vm3, %v792_v14, %v794_v16  ;;  %v798_v41 = vrot.slane %v7720_v40, 4  ;;  %v7554_v6 = vld [vmem:[#allocation5 + $0x7c] sm:$0xff]  }
  0xfc   : > { %v6987_v1 = vunpack.i.h.bf16 %v6985_v57  ;;  %v6986_v59 = vunpack.i.l.bf16 %v6985_v57  ;;  %v6990_v60 = vpop.permute.xlu1 %6989  ;;  %2476 = vmatprep.subr.bf16.mxu0 %v11057_v49  ;;  %v1288_v12 = vpack.c.bf16 %v1237_v4, %v1236_v29  ;;  %v1293_v33 = vpack.c.bf16 %v795_v2, %v793_v23  ;;  %2236 = vmatpush1.bf16.msra.mxu1 %v7553_v24  ;;  %v7721_v4 = vld [vmem:[%s8140_s16 + $0x58] sm:$0xff]  ;;  %v7723_v23 = vld [vmem:[%s8140_s16 + $0x68] sm:$0xff]  ;;  %v7724_v24 = vld [vmem:[%s8140_s16 + $0x70] sm:$0xff] }
  0xfd   : > { %v6992_v5 = vunpack.i.h.bf16 %v6990_v60  ;;  %v6991_v7 = vunpack.i.l.bf16 %v6990_v60  ;;  %2237 = vmatprep.subr.bf16.mxu1 %v11057_v49  ;;  %v797_v54 = vsel %vm778_vm3, %v794_v16, %v796_v39  ;;  %v799_v55 = vsel %vm778_vm3, %v796_v39, %v798_v41 }
  0xfe   : > { %v1173_v26 = vsel %vm1167_vm4, %v7714_v32, %v6987_v1  ;;  %v1172_v37 = vsel %vm1167_vm4, %v8465_v11, %v6986_v59  ;;  %v1295_v62 = vpack.c.bf16 %v799_v55, %v797_v54  ;;  %v804_v2 = vrot.slane %v7723_v23, 4 }
  0xff   : > { %v6995_v3 = vpop.permute.xlu0 %6994  ;;  %2477 = vmatpush1.bf16.msra.mxu0 %v7544_v58  ;;  %v1205_v11 = vsel %vm1200_vm5, %v1172_v37, %v6991_v7  ;;  %v1206_v46 = vsel %vm1200_vm5, %v1173_v26, %v6992_v5  ;;  %v800_v5 = vrot.slane %v7721_v4, 4  ;;  %v7722_v7 = vld [vmem:[%s8140_s16 + $0x60] sm:$0xff] }
 0x100   : > { %v7000_v10 = vpop.permute.xlu1 %6999  ;;  %2478 = vmatprep.subr.bf16.mxu0 %v11057_v49  ;;  %v6997_v18 = vunpack.i.h.bf16 %v6995_v3  ;;  %v6996_v45 = vunpack.i.l.bf16 %v6995_v3  ;;  %v802_v26 = vrot.slane %v7722_v7, 4 }
 0x101   : > { %v7002_v19 = vunpack.i.h.bf16 %v7000_v10  ;;  %v7001_v20 = vunpack.i.l.bf16 %v7000_v10  ;;  %v801_v14 = vsel %vm778_vm3, %v798_v41, %v800_v5 }
 0x102   : > { %1521 = vmatmul.mubr.bf16.gmra.mrb[4].mxu0 %v1288_v12  ;;  %v1238_v51 = vsel %vm1233_vm6, %v1205_v11, %v6996_v45  ;;  %v1239_v25 = vsel %vm1233_vm6, %v1206_v46, %v6997_v18 }
 0x103   : > { %v7005_v21 = vpop.permute.xlu0 %7004  ;;  %6314 = vmatprep.mubr.msk.bf16.mxu0 %vm1167_vm4, %v1291_v8  ;;  %2479 = vmatpush1.bf16.msra.mxu0 %v7547_v9  ;;  %v1175_v31 = vsel %vm1167_vm4, %v7717_v13, %v7002_v19  ;;  %v1174_v32 = vsel %vm1167_vm4, %v8488_v50, %v7001_v20  ;;  %v1290_v35 = vpack.c.bf16 %v1239_v25, %v1238_v51  ;;  %v806_v51 = vrot.slane %v7724_v24, 4 }
 0x104   : > { %2480 = vmatprep.subr.bf16.mxu0 %v11057_v49  ;;  %v7007_v27 = vunpack.i.h.bf16 %v7005_v21  ;;  %v7006_v28 = vunpack.i.l.bf16 %v7005_v21  ;;  %v7010_v30 = vpop.permute.xlu1 %7009 }
 0x105   : > { %v7012_v43 = vunpack.i.h.bf16 %v7010_v30  ;;  %v7011_v44 = vunpack.i.l.bf16 %v7010_v30 }
 0x106   : > { %v1207_v48 = vsel %vm1200_vm5, %v1174_v32, %v7006_v28  ;;  %v1208_v50 = vsel %vm1200_vm5, %v1175_v31, %v7007_v27 }
 0x107   : > { %2481 = vmatpush1.bf16.msra.mxu0 %v7550_v22  ;;  %v7015_v36 = vpop.permute.xlu0 %7014  ;;  %v1240_v56 = vsel %vm1233_vm6, %v1207_v48, %v7011_v44  ;;  %v1241_v57 = vsel %vm1233_vm6, %v1208_v50, %v7012_v43 }
 0x108   : > { %2482 = vmatprep.subr.bf16.mxu0 %v11057_v49  ;;  %v7020_v47 = vpop.permute.xlu1 %7019  ;;  %v7017_v52 = vunpack.i.h.bf16 %v7015_v36  ;;  %v7016_v53 = vunpack.i.l.bf16 %v7015_v36  ;;  %v1292_v63 = vpack.c.bf16 %v1241_v57, %v1240_v56 }
 0x109   : > { %v7022_v58 = vunpack.i.h.bf16 %v7020_v47  ;;  %v7021_v1 = vunpack.i.l.bf16 %v7020_v47 }
 0x10a   : > { %1531 = vmatmul.mubr.bf16.gmra.mrb[8].mxu0 %v1290_v35  ;;  %v1177_v60 = vsel %vm1167_vm4, %v7719_v38, %v7017_v52  ;;  %v1176_v61 = vsel %vm1167_vm4, %v8506_v15, %v7016_v53  ;;  %v803_v15 = vsel %vm778_vm3, %v800_v5, %v802_v26  ;;  %v807_v35 = vsel %vm778_vm3, %v804_v2, %v806_v51  ;;  %v7725_v52 = vld [vmem:[%s8140_s16 + $0x78] sm:$0xff] }
 0x10b   : > { %6315 = vmatprep.mubr.msk.bf16.mxu0 %vm1167_vm4, %v1293_v33  ;;  %2483 = vmatpush1.bf16.msra.mxu0 %v7552_v34  ;;  %v7025_v59 = vpop.permute.xlu0 %7024  ;;  %v1209_v9 = vsel %vm1200_vm5, %v1176_v61, %v7021_v1  ;;  %v1210_v12 = vsel %vm1200_vm5, %v1177_v60, %v7022_v58  ;;  %v1297_v20 = vpack.c.bf16 %v803_v15, %v801_v14  ;;  %v808_v53 = vrot.slane %v7725_v52, 4 }
 0x10c   : > { %2484 = vmatprep.subr.bf16.mxu0 %v11057_v49  ;;  %v7030_v29 = vpop.permute.xlu1 %7029  ;;  %v7027_v37 = vunpack.i.h.bf16 %v7025_v59  ;;  %v7026_v3 = vunpack.i.l.bf16 %v7025_v59  ;;  %v805_v34 = vsel %vm778_vm3, %v802_v26, %v804_v2 }
 0x10d   : > { %v7032_v10 = vunpack.i.h.bf16 %v7030_v29  ;;  %v7031_v13 = vunpack.i.l.bf16 %v7030_v29  ;;  %v1299_v47 = vpack.c.bf16 %v807_v35, %v805_v34  ;;  %v809_v61 = vsel %vm778_vm3, %v806_v51, %v808_v53  ;;  %v7729_v51 = vld [vmem:[%s8140_s16 + $0x98] sm:$0xff] }
 0x10e   : > { %v1242_v16 = vsel %vm1233_vm6, %v1209_v9, %v7026_v3  ;;  %v1243_v17 = vsel %vm1233_vm6, %v1210_v12, %v7027_v37  ;;  %v7727_v12 = vld [vmem:[%s8140_s16 + $0x88] sm:$0xff] }
 0x10f   : > { %2485 = vmatpush1.bf16.msra.mxu0 %v7554_v6  ;;  %v7035_v8 = vpop.permute.xlu0 %7034  ;;  %v1179_v46 = vsel %vm1167_vm4, %v7721_v4, %v7032_v10  ;;  %v1178_v19 = vsel %vm1167_vm4, %v7720_v40, %v7031_v13  ;;  %v1294_v21 = vpack.c.bf16 %v1243_v17, %v1242_v16  ;;  %v7726_v6 = vld [vmem:[%s8140_s16 + $0x80] sm:$0xff]  ;;  %v812_v10 = vrot.slane %v7727_v12, 4  ;;  %v7728_v13 = vld [vmem:[%s8140_s16 + $0x90] sm:$0xff] }
 0x110   : > { %2486 = vmatprep.subr.bf16.mxu0 %v11057_v49  ;;  %v7037_v18 = vunpack.i.h.bf16 %v7035_v8  ;;  %v7036_v45 = vunpack.i.l.bf16 %v7035_v8  ;;  %v7040_v11 = vpop.permute.xlu1 %7039  ;;  %v810_v54 = vrot.slane %v7726_v6, 4  ;;  %v814_v14 = vrot.slane %v7728_v13, 4 }
 0x111   : > { %v7042_v25 = vunpack.i.h.bf16 %v7040_v11  ;;  %v7041_v27 = vunpack.i.l.bf16 %v7040_v11 }
 0x112   : > { %1541 = vmatmul.mubr.bf16.gmra.mrb[12].mxu0 %v1292_v63  ;;  %v1211_v30 = vsel %vm1200_vm5, %v1178_v19, %v7036_v45  ;;  %v1212_v31 = vsel %vm1200_vm5, %v1179_v46, %v7037_v18  ;;  %v813_v19 = vsel %vm778_vm3, %v810_v54, %v812_v10 }
 0x113   : > { %6316 = vmatprep.mubr.msk.bf16.mxu0 %vm1167_vm4, %v1295_v62  ;;  %v7045_v22 = vpop.permute.xlu0 %7044  ;;  %v1244_v36 = vsel %vm1233_vm6, %v1211_v30, %v7041_v27  ;;  %v1245_v38 = vsel %vm1233_vm6, %v1212_v31, %v7042_v25  ;;  %v811_v62 = vsel %vm778_vm3, %v808_v53, %v810_v54  ;;  %v816_v25 = vrot.slane %v7729_v51, 4  ;;  %v7730_v31 = vld [vmem:[%s8140_s16 + $0xa0] sm:$0xff] }
 0x114   : > { %v7050_v28 = vpop.permute.xlu1 %7049  ;;  %v7047_v32 = vunpack.i.h.bf16 %v7045_v22  ;;  %v7046_v33 = vunpack.i.l.bf16 %v7045_v22  ;;  %v1296_v48 = vpack.c.bf16 %v1245_v38, %v1244_v36  ;;  %v1301_v3 = vpack.c.bf16 %v811_v62, %v809_v61 }
 0x115   : > { %v7052_v39 = vunpack.i.h.bf16 %v7050_v28  ;;  %v7051_v40 = vunpack.i.l.bf16 %v7050_v28 }
 0x116   : > { %v1181_v43 = vsel %vm1167_vm4, %v7723_v23, %v7047_v32  ;;  %v1180_v44 = vsel %vm1167_vm4, %v7722_v7, %v7046_v33  ;;  %v818_v32 = vrot.slane %v7730_v31, 4 }
 0x117   : > { %v7055_v41 = vpop.permute.xlu0 %7054  ;;  %v1213_v58 = vsel %vm1200_vm5, %v1180_v44, %v7051_v40  ;;  %v1214_v1 = vsel %vm1200_vm5, %v1181_v43, %v7052_v39  ;;  %v817_v44 = vsel %vm778_vm3, %v814_v14, %v816_v25 }
 0x118   : > { %v7060_v50 = vpop.permute.xlu1 %7059  ;;  %v7057_v55 = vunpack.i.h.bf16 %v7055_v41  ;;  %v7056_v56 = vunpack.i.l.bf16 %v7055_v41 }
 0x119   : > { %v7062_v59 = vunpack.i.h.bf16 %v7060_v50  ;;  %v7061_v60 = vunpack.i.l.bf16 %v7060_v50 }
 0x11a   : > { %1551 = vmatmul.mubr.bf16.gmra.mrb[16].mxu0 %v1294_v21  ;;  %v1246_v63 = vsel %vm1233_vm6, %v1213_v58, %v7056_v56  ;;  %v1247_v29 = vsel %vm1233_vm6, %v1214_v1, %v7057_v55  ;;  %v7732_v1 = vld [vmem:[%s8140_s16 + $0xb0] sm:$0xff] }
 0x11b   : > { %6317 = vmatprep.mubr.msk.bf16.mxu0 %vm1167_vm4, %v1297_v20  ;;  %v7065_v57 = vpop.permute.xlu0 %7064  ;;  %v1183_v26 = vsel %vm1167_vm4, %v7725_v52, %v7062_v59  ;;  %v1182_v37 = vsel %vm1167_vm4, %v7724_v24, %v7061_v60  ;;  %v1298_v8 = vpack.c.bf16 %v1247_v29, %v1246_v63  ;;  %v815_v20 = vsel %vm778_vm3, %v812_v10, %v814_v14 }
 0x11c   : > { %v7067_v4 = vunpack.i.h.bf16 %v7065_v57  ;;  %v7066_v5 = vunpack.i.l.bf16 %v7065_v57  ;;  %v7070_v7 = vpop.permute.xlu1 %7069  ;;  %v1303_v30 = vpack.c.bf16 %v815_v20, %v813_v19  ;;  %v7731_v57 = vld [vmem:[%s8140_s16 + $0xa8] sm:$0xff]  ;;  %v822_v59 = vrot.slane %v7732_v1, 4 }
 0x11d   : > { %v7072_v15 = vunpack.i.h.bf16 %v7070_v7  ;;  %v7071_v16 = vunpack.i.l.bf16 %v7070_v7  ;;  %v820_v58 = vrot.slane %v7731_v57, 4 }
 0x11e   : > { %v1216_v17 = vsel %vm1200_vm5, %v1183_v26, %v7067_v4  ;;  %v1215_v18 = vsel %vm1200_vm5, %v1182_v37, %v7066_v5 }
 0x11f   : > { %v7075_v9 = vpop.permute.xlu0 %7074  ;;  %v1248_v21 = vsel %vm1233_vm6, %v1215_v18, %v7071_v16  ;;  %v1249_v22 = vsel %vm1233_vm6, %v1216_v17, %v7072_v15  ;;  %v821_v37 = vsel %vm778_vm3, %v818_v32, %v820_v58  ;;  %v7733_v17 = vld [vmem:[%s8140_s16 + $0xb8] sm:$0xff] }
 0x120   : > { %v7080_v45 = vpop.permute.xlu1 %7079  ;;  %v7077_v11 = vunpack.i.h.bf16 %v7075_v9  ;;  %v7076_v46 = vunpack.i.l.bf16 %v7075_v9  ;;  %v1300_v33 = vpack.c.bf16 %v1249_v22, %v1248_v21  ;;  %v824_v18 = vrot.slane %v7733_v17, 4 }
 0x121   : > { %v7082_v23 = vunpack.i.h.bf16 %v7080_v45  ;;  %v7081_v2 = vunpack.i.l.bf16 %v7080_v45  ;;  %v7734_v45 = vld [vmem:[%s8140_s16 + $0xc0] sm:$0xff] }
 0x122   : > { %1561 = vmatmul.mubr.bf16.gmra.mrb[20].mxu0 %v1296_v48  ;;  %v1185_v27 = vsel %vm1167_vm4, %v7727_v12, %v7077_v11  ;;  %v1184_v28 = vsel %vm1167_vm4, %v7726_v6, %v7076_v46  ;;  %v826_v11 = vrot.slane %v7734_v45, 4 }
 0x123   : > { %6318 = vmatprep.mubr.msk.bf16.mxu0 %vm1167_vm4, %v1299_v47  ;;  %v7085_v24 = vpop.permute.xlu0 %7084  ;;  %v1217_v38 = vsel %vm1200_vm5, %v1184_v28, %v7081_v2  ;;  %v1218_v39 = vsel %vm1200_vm5, %v1185_v27, %v7082_v23  ;;  %v819_v47 = vsel %vm778_vm3, %v816_v25, %v818_v32  ;;  %v825_v25 = vsel %vm778_vm3, %v822_v59, %v824_v18 }
 0x124   : > { %v7090_v34 = vpop.permute.xlu1 %7089  ;;  %v7087_v35 = vunpack.i.h.bf16 %v7085_v24  ;;  %v7086_v36 = vunpack.i.l.bf16 %v7085_v24  ;;  %v1305_v54 = vpack.c.bf16 %v819_v47, %v817_v44  ;;  %v827_v27 = vsel %vm778_vm3, %v824_v18, %v826_v11 }
 0x125   : > { %v7092_v41 = vunpack.i.h.bf16 %v7090_v34  ;;  %v7091_v43 = vunpack.i.l.bf16 %v7090_v34  ;;  %v1309_v34 = vpack.c.bf16 %v827_v27, %v825_v25  ;;  %v7739_v27 = vld [vmem:[%s8140_s16 + $0xe8] sm:$0xff] }
 0x126   : > { %v1250_v48 = vsel %vm1233_vm6, %v1217_v38, %v7086_v36  ;;  %v1251_v50 = vsel %vm1233_vm6, %v1218_v39, %v7087_v35  ;;  %v7735_v38 = vld [vmem:[%s8140_s16 + $0xc8] sm:$0xff] }
 0x127   : > { %v7095_v40 = vpop.permute.xlu0 %7094  ;;  %v1187_v55 = vsel %vm1167_vm4, %v7729_v51, %v7092_v41  ;;  %v1186_v56 = vsel %vm1167_vm4, %v7728_v13, %v7091_v43  ;;  %v1302_v60 = vpack.c.bf16 %v1251_v50, %v1250_v48  ;;  %v828_v39 = vrot.slane %v7735_v38, 4 }
 0x128   : > { %v7097_v52 = vunpack.i.h.bf16 %v7095_v40  ;;  %v7096_v53 = vunpack.i.l.bf16 %v7095_v40  ;;  %v7100_v6 = vpop.permute.xlu1 %7099  ;;  %v7736_v40 = vld [vmem:[%s8140_s16 + $0xd0] sm:$0xff] }
 0x129   : > { %v7102_v62 = vunpack.i.h.bf16 %v7100_v6  ;;  %v7101_v63 = vunpack.i.l.bf16 %v7100_v6  ;;  %v830_v41 = vrot.slane %v7736_v40, 4 }
 0x12a   : > { %1571 = vmatmul.mubr.bf16.gmra.mrb[24].mxu0 %v1298_v8  ;;  %v1220_v29 = vsel %vm1200_vm5, %v1187_v55, %v7097_v52  ;;  %v1219_v4 = vsel %vm1200_vm5, %v1186_v56, %v7096_v53  ;;  %v829_v55 = vsel %vm778_vm3, %v826_v11, %v828_v39 }
 0x12b   : > { %6319 = vmatprep.mubr.msk.bf16.mxu0 %vm1167_vm4, %v1301_v3  ;;  %v7105_v61 = vpop.permute.xlu0 %7104  ;;  %v823_v3 = vsel %vm778_vm3, %v820_v58, %v822_v59  ;;  %v1252_v8 = vsel %vm1233_vm6, %v1219_v4, %v7101_v63  ;;  %v1253_v9 = vsel %vm1233_vm6, %v1220_v29, %v7102_v62  ;;  %v831_v56 = vsel %vm778_vm3, %v828_v39, %v830_v41  ;;  %v7555_v62 = vld [vmem:[#allocation5 + $0x30] sm:$0xff]   ;;  %v7556_v63 = vld [vmem:[#allocation5 + $0x84] sm:$0xff]  }
 0x12c   : > { %v7110_v5 = vpop.permute.xlu1 %7109  ;;  %v7107_v7 = vunpack.i.h.bf16 %v7105_v61  ;;  %v7106_v26 = vunpack.i.l.bf16 %v7105_v61  ;;  %v1307_v14 = vpack.c.bf16 %v823_v3, %v821_v37  ;;  %v1304_v46 = vpack.c.bf16 %v1253_v9, %v1252_v8  ;;  %2238 = vmatpush1.bf16.msra.mxu1 %v7555_v62  ;;  %2487 = vmatpush1.bf16.msra.mxu0 %v7556_v63  ;;  %v7741_v63 = vld [vmem:[%s8140_s16 + $0xf8] sm:$0xff] }
 0x12d   : > { %v7112_v12 = vunpack.i.h.bf16 %v7110_v5  ;;  %v7111_v10 = vunpack.i.l.bf16 %v7110_v5  ;;  %v1311_v61 = vpack.c.bf16 %v831_v56, %v829_v55  ;;  %v7737_v5 = vld [vmem:[%s8140_s16 + $0xd8] sm:$0xff]  ;;  %2239 = vmatprep.subr.bf16.mxu1 %v11057_v49  ;;  %2488 = vmatprep.subr.bf16.mxu0 %v11057_v49 }
 0x12e   : > { %v1189_v15 = vsel %vm1167_vm4, %v7731_v57, %v7107_v7  ;;  %v1188_v16 = vsel %vm1167_vm4, %v7730_v31, %v7106_v26  ;;  %v832_v7 = vrot.slane %v7737_v5, 4  ;;  %v8629_v26 = vld [vmem:[%s8140_s16 + $0xe0] sm:$0xff] }
 0x12f   : > { %v7115_v13 = vpop.permute.xlu0 %7114  ;;  %v1221_v22 = vsel %vm1200_vm5, %v1188_v16, %v7111_v10  ;;  %v1222_v23 = vsel %vm1200_vm5, %v1189_v15, %v7112_v12  ;;  %v834_v37 = vrot.slane %v8629_v26, 4  ;;  %v7557_v15 = vld [vmem:[#allocation5 + $0x38] sm:$0xff]   ;;  %v7558_v16 = vld [vmem:[#allocation5 + $0x8c] sm:$0xff]  }
 0x130   : > { %v7120_v19 = vpop.permute.xlu1 %7119  ;;  %v7117_v20 = vunpack.i.h.bf16 %v7115_v13  ;;  %v7116_v21 = vunpack.i.l.bf16 %v7115_v13  ;;  %2240 = vmatpush1.bf16.msra.mxu1 %v7557_v15  ;;  %2489 = vmatpush1.bf16.msra.mxu0 %v7558_v16 }
 0x131   : > { %v7122_v24 = vunpack.i.h.bf16 %v7120_v19  ;;  %v7121_v51 = vunpack.i.l.bf16 %v7120_v19  ;;  %v835_v11 = vsel %vm778_vm3, %v832_v7, %v834_v37  ;;  %2241 = vmatprep.subr.bf16.mxu1 %v11057_v49  ;;  %2490 = vmatprep.subr.bf16.mxu0 %v11057_v49 }
 0x132   : > { %1581 = vmatmul.mubr.bf16.gmra.mrb[28].mxu0 %v1300_v33  ;;  %v1254_v28 = vsel %vm1233_vm6, %v1221_v22, %v7116_v21 }
 0x133   : > { %6320 = vmatprep.mubr.msk.bf16.mxu0 %vm1167_vm4, %v1303_v30  ;;  %v7125_v2 = vpop.permute.xlu0 %7124  ;;  %v1255_v30 = vsel %vm1233_vm6, %v1222_v23, %v7117_v20  ;;  %v1191_v35 = vsel %vm1167_vm4, %v7733_v17, %v7122_v24  ;;  %v1190_v36 = vsel %vm1167_vm4, %v7732_v1, %v7121_v51  ;;  %v7560_v24 = vld [vmem:[#allocation5 + $0x94] sm:$0xff]  }
 0x134   : > { %v7127_v31 = vunpack.i.h.bf16 %v7125_v2  ;;  %v7126_v32 = vunpack.i.l.bf16 %v7125_v2  ;;  %v7130_v33 = vpop.permute.xlu1 %7129  ;;  %v1306_v43 = vpack.c.bf16 %v1255_v30, %v1254_v28  ;;  %v7559_v2 = vld [vmem:[#allocation5 + $0x40] sm:$0xff]   ;;  %v836_v28 = vrot.slane %v7739_v27, 4  ;;  %v7740_v30 = vld [vmem:[%s8140_s16 + $0xf0] sm:$0xff]  ;;  %2491 = vmatpush1.bf16.msra.mxu0 %v7560_v24  ;;  %s11195_s16 = sld [smem:[#allocation40_spill]] }
 0x135   : > { %v7132_v47 = vunpack.i.h.bf16 %v7130_v33  ;;  %v7131_v48 = vunpack.i.l.bf16 %v7130_v33  ;;  %2242 = vmatpush1.bf16.msra.mxu1 %v7559_v2  ;;  %2492 = vmatprep.subr.bf16.mxu0 %v11057_v49 }
 0x136   : > { %v1224_v50 = vsel %vm1200_vm5, %v1191_v35, %v7127_v31  ;;  %v1223_v52 = vsel %vm1200_vm5, %v1190_v36, %v7126_v32  ;;  %v838_v31 = vrot.slane %v7740_v30, 4  ;;  %2243 = vmatprep.subr.bf16.mxu1 %v11057_v49 }
 0x137   : > { %v7135_v44 = vpop.permute.xlu0 %7134  ;;  %v1256_v57 = vsel %vm1233_vm6, %v1223_v52, %v7131_v48  ;;  %v1257_v58 = vsel %vm1233_vm6, %v1224_v50, %v7132_v47  ;;  %v837_v47 = vsel %vm778_vm3, %v834_v37, %v836_v28 }
 0x138   : > { %v7140_v53 = vpop.permute.xlu1 %7139  ;;  %v7137_v6 = vunpack.i.h.bf16 %v7135_v44  ;;  %v1308_v3 = vpack.c.bf16 %v1257_v58, %v1256_v57  ;;  %v839_v48 = vsel %vm778_vm3, %v836_v28, %v838_v31 }
 0x139   : > { %v7142_v1 = vunpack.i.h.bf16 %v7140_v53  ;;  %v7141_v59 = vunpack.i.l.bf16 %v7140_v53  ;;  %v7563_v53 = vld [vmem:[#allocation5 + $0x50] ss:$0 sps:$4 sm:$0xff]   ;;  %v1315_v57 = vpack.c.bf16 %v839_v48, %v837_v47 }
 0x13a   : > { %1591 = vmatmul.mubr.bf16.gmra.mrb[32].mxu0 %v1302_v60  ;;  %v1193_v29 = vsel %vm1167_vm4, %v7735_v38, %v7137_v6  ;;  %v7564_v6 = vld [vmem:[#allocation5 + $0xa4] ss:$0 sps:$4 sm:$0xff]   ;;  %s11196_s18 = smov %s11195_s16 }
 0x13b   : > { %6321 = vmatprep.mubr.msk.bf16.mxu0 %vm1167_vm4, %v1305_v54  ;;  %v7136_v54 = vunpack.i.l.bf16 %v7135_v44  ;;  %v7145_v60 = vpop.permute.xlu0 %7144  ;;  %v1226_v13 = vsel %vm1200_vm5, %v1193_v29, %v7142_v1  ;;  %v840_v29 = vrot.slane %v7741_v63, 4 }
 0x13c   : > { %v7150_v8 = vpop.permute.xlu1 %7149  ;;  %v7147_v9 = vunpack.i.h.bf16 %v7145_v60  ;;  %v7146_v12 = vunpack.i.l.bf16 %v7145_v60  ;;  %v2472_v60 = vsel %vm778_vm3, %v7564_v6, 0 }
 0x13d   : > { %v1192_v4 = vsel %vm1167_vm4, %v7734_v45, %v7136_v54  ;;  %v7152_v17 = vunpack.i.h.bf16 %v7150_v8  ;;  %v7151_v18 = vunpack.i.l.bf16 %v7150_v8  ;;  %v833_v45 = vsel %vm778_vm3, %v830_v41, %v832_v7  ;;  %v7562_v41 = vld [vmem:[#allocation5 + $0x9c] sm:$0xff]  }
 0x13e   : > { %v1225_v10 = vsel %vm1200_vm5, %v1192_v4, %v7141_v59  ;;  %v1259_v19 = vsel %vm1233_vm6, %v1226_v13, %v7147_v9  ;;  %v1313_v23 = vpack.c.bf16 %v835_v11, %v833_v45  ;;  %2493 = vmatpush1.bf16.msra.mxu0 %v7562_v41  ;;  %v2223_v59 = vsel %vm778_vm3, %v7563_v53, 0 }
 0x13f   : > { %v1195_v51 = vsel %vm1167_vm4, %v7737_v5, %v7152_v17  ;;  %v1194_v25 = vsel %vm1167_vm4, %v7736_v40, %v7151_v18  ;;  %v7561_v40 = vld [vmem:[#allocation5 + $0x48] sm:$0xff]   ;;  %2494 = vmatprep.subr.bf16.mxu0 %v11057_v49  ;;  %v841_v9 = vsel %vm778_vm3, %v838_v31, %v840_v29 }
 0x140   : > { %v7160_v22 = vpop.permute.xlu1 %7159  ;;  %2244 = vmatpush1.bf16.msra.mxu1 %v7561_v40 }
 0x141   : > { %v7161_v35 = vunpack.i.l.bf16 %v7160_v22  ;;  %2245 = vmatprep.subr.bf16.mxu1 %v11057_v49 }
 0x142   : > { %1601 = vmatmul.mubr.bf16.gmra.mrb[36].mxu0 %v1304_v46  ;;  %v1258_v46 = vsel %vm1233_vm6, %v1225_v10, %v7146_v12  ;;  %v875_v12 = vsel %vm778_vm3, %v840_v29, %v779_v42 }
 0x143   : > { %6322 = vmatprep.mubr.msk.bf16.mxu0 %vm1167_vm4, %v1307_v14  ;;  %v7155_v14 = vpop.permute.xlu0 %7154  ;;  %v1310_v32 = vpack.c.bf16 %v1259_v19, %v1258_v46  ;;  %2495 = vmatpush1.bf16.msra.mxu0 %v2472_v60  ;;  %v1317_v45 = vpack.c.bf16 %v875_v12, %v841_v9 }
 0x144   : > { %v7157_v20 = vunpack.i.h.bf16 %v7155_v14  ;;  %v7156_v21 = vunpack.i.l.bf16 %v7155_v14  ;;  %v7170_v39 = vpop.permute.xlu1 %7169  ;;  %2246 = vmatpush1.bf16.msra.mxu1 %v2223_v59  ;;  %4797 = vmatprep.subr.bf16.mxu0 %v11057_v49 }
 0x145   : > { %v7172_v54 = vunpack.i.h.bf16 %v7170_v39  ;;  %v7171_v55 = vunpack.i.l.bf16 %v7170_v39 }
 0x146   : > { %v1228_v36 = vsel %vm1200_vm5, %v1195_v51, %v7157_v20  ;;  %v1227_v38 = vsel %vm1200_vm5, %v1194_v25, %v7156_v21  ;;  %v1318_v51 = vld [vmem:[%s11022_s2] sm:$0x3] }
 0x147   : > { %v7165_v33 = vpop.permute.xlu0 %7164  ;;  %v1260_v50 = vsel %vm1233_vm6, %v1227_v38, %v7161_v35 }
 0x148   : > { %v7166_v44 = vunpack.i.l.bf16 %v7165_v33  ;;  %v7180_v62 = vpop.permute.xlu1 %7179 }
 0x14a   : > { %1611 = vmatmul.mubr.bf16.gmra.mrb[40].mxu0 %v1306_v43  ;;  %v7167_v43 = vunpack.i.h.bf16 %v7165_v33  ;;  %v1196_v1 = vsel %vm1167_vm4, %v8629_v26, %v7166_v44  ;;  %v7182_v26 = vunpack.i.h.bf16 %v7180_v62 }
 0x14b   : > { %6323 = vmatprep.mubr.msk.bf16.mxu0 %vm1167_vm4, %v1309_v34  ;;  %v7162_v34 = vunpack.i.h.bf16 %v7160_v22  ;;  %v7175_v56 = vpop.permute.xlu0 %7174  ;;  %v1229_v7 = vsel %vm1200_vm5, %v1196_v1, %v7171_v55 }
 0x14c   : > { %v1197_v58 = vsel %vm1167_vm4, %v7739_v27, %v7167_v43  ;;  %v7177_v4 = vunpack.i.h.bf16 %v7175_v56  ;;  %v7176_v5 = vunpack.i.l.bf16 %v7175_v56  ;;  %v7190_v16 = vpop.permute.xlu1 %7189  ;;  %v1199_v17 = vsel %vm1167_vm4, %v7741_v63, %v7182_v26 }
 0x14d   : > { %v1261_v52 = vsel %vm1233_vm6, %v1228_v36, %v7162_v34  ;;  %v1230_v37 = vsel %vm1200_vm5, %v1197_v58, %v7172_v54  ;;  %v7192_v46 = vunpack.i.h.bf16 %v7190_v16  ;;  %v7191_v19 = vunpack.i.l.bf16 %v7190_v16 }
 0x14e   : > { %v1262_v10 = vsel %vm1233_vm6, %v1229_v7, %v7176_v5  ;;  %v1263_v13 = vsel %vm1233_vm6, %v1230_v37, %v7177_v4 }
 0x14f   : > { %v7185_v8 = vpop.permute.xlu0 %7184  ;;  %v1314_v11 = vpack.c.bf16 %v1263_v13, %v1262_v10 }
 0x150   : > { %v7187_v14 = vunpack.i.h.bf16 %v7185_v8  ;;  %v7186_v15 = vunpack.i.l.bf16 %v7185_v8 }
 0x152   : > { %1621 = vmatmul.mubr.bf16.gmra.mrb[44].mxu0 %v1308_v3  ;;  %v7181_v3 = vunpack.i.l.bf16 %v7180_v62  ;;  %v1232_v20 = vsel %vm1200_vm5, %v1199_v17, %v7187_v14 }
 0x153   : > { %6324 = vmatprep.mubr.msk.bf16.mxu0 %vm1167_vm4, %v1311_v61  ;;  %v1312_v61 = vpack.c.bf16 %v1261_v52, %v1260_v50  ;;  %v1265_v21 = vsel %vm1233_vm6, %v1232_v20, %v7192_v46 }
 0x154   : > { %v1198_v18 = vsel %vm1167_vm4, %v7740_v30, %v7181_v3 }
 0x155   : > { %v1231_v0 = vsel %vm1200_vm5, %v1198_v18, %v7186_v15 }
 0x156   : > { %v1264_v42 = vsel %vm1233_vm6, %v1231_v0, %v7191_v19 }
 0x157   : > { %v1316_v22 = vpack.c.bf16 %v1265_v21, %v1264_v42 }
 0x15a   : > { %1631 = vmatmul.mubr.bf16.gmra.mrb[48].mxu0 %v1310_v32 }
 0x15b   : > { %6325 = vmatprep.mubr.msk.bf16.mxu0 %vm1167_vm4, %v1313_v23  ;;  %v1320_v23 = vlaneseq }
 0x15d   : > { %v8681_v2 = vshrl.u32 %v1320_v23, 7 }
 0x15f   : > { %v11051_v24 = vsub.s32 0, %v8681_v2  ;;  %v11050_v25 = vsub.s32 1, %v8681_v2 }
 0x161   : > { %v8690_v27 = vrot.slane %v1318_v51, %v11051_v24  ;;  %v8694_v28 = vrot.slane %v1318_v51, %v11050_v25 }
 0x162   : > { %1641 = vmatmul.mubr.bf16.gmra.mrb[52].mxu0 %v1312_v61 }
 0x163   : > { %6326 = vmatprep.mubr.msk.bf16.mxu0 %vm1167_vm4, %v1315_v57 }
 0x16a   : > { %1651 = vmatmul.mubr.bf16.gmra.mrb[56].mxu0 %v1314_v11 }
 0x16b   : > { %6327 = vmatprep.mubr.msk.bf16.mxu0 %vm1167_vm4, %v1317_v45 }
 0x172   : > { %1661 = vmatmul.mubr.bf16.gmra.mrb[60].mxu0 %v1316_v22 }
 0x1cd   : > { %v1512_v30 = vpop.f32.mrb[0].mxu0 }
 0x1ce   : > { %v1513_v31 = vadd.f32 %v1512_v30, %v8690_v27  ;;  %v1514_v32 = vpop.f32.mrb[1].mxu0 }
 0x1cf   : > { %v1515_v33 = vadd.f32 %v1514_v32, %v8694_v28  ;;  %v1516_v34 = vpop.f32.mrb[2].mxu0 }
 0x1d0   : > { %v1671_v35 = vmax.f32 %v1513_v31, 0.0  ;;  %v1517_v36 = vadd.f32 %v1516_v34, %v8690_v27  ;;  %v1518_v38 = vpop.f32.mrb[3].mxu0 }
 0x1d1   : > { %v1672_v39 = vmax.f32 %v1515_v33, 0.0  ;;  %v1519_v40 = vadd.f32 %v1518_v38, %v8694_v28 }
 0x1d2   : > { %v1673_v41 = vmax.f32 %v1517_v36, 0.0  ;;  %v8700_v44 = vrot.slane %v1671_v35, 1 }
 0x1d3   : > { %v1674_v43 = vmax.f32 %v1519_v40, 0.0  ;;  %v8702_v48 = vrot.slane %v1672_v39, 1 }
 0x1d4   : > { %v1800_v47 = vrot.slane %v1673_v41, 1 }
 0x1d5   : > { %v1803_v50 = vrot.slane %v1674_v43, 1  ;;  %v1522_v52 = vpop.f32.mrb[4].mxu0 }
 0x1d6   : > { %v1523_v53 = vadd.f32 %v1522_v52, %v8690_v27  ;;  %v1524_v6 = vpop.f32.mrb[5].mxu0  ;;  %v1801_v54 = vsel %vm577_vm0, %v8700_v44, %v1800_v47 }
 0x1d7   : > { %v1525_v55 = vadd.f32 %v1524_v6, %v8694_v28  ;;  %v1526_v56 = vpop.f32.mrb[6].mxu0  ;;  %v1804_v57 = vsel %vm577_vm0, %v8702_v48, %v1803_v50  ;;  %v1993_v58 = vmax.f32 %v1671_v35, %v1801_v54 }
 0x1d8   : > { %v1675_v1 = vmax.f32 %v1523_v53, 0.0  ;;  %v1527_v59 = vadd.f32 %v1526_v56, %v8690_v27  ;;  %v1528_v60 = vpop.f32.mrb[7].mxu0  ;;  %v1994_v61 = vmax.f32 %v1672_v39, %v1804_v57 }
 0x1d9   : > { %v1676_v62 = vmax.f32 %v1525_v55, 0.0  ;;  %v1529_v63 = vadd.f32 %v1528_v60, %v8694_v28 }
 0x1da   : > { %v1805_v29 = vrot.slane %v1675_v1, 1  ;;  %v1677_v4 = vmax.f32 %v1527_v59, 0.0 }
 0x1db   : > { %v1807_v5 = vrot.slane %v1676_v62, 1  ;;  %v1678_v7 = vmax.f32 %v1529_v63, 0.0 }
 0x1dc   : > { %v1809_v37 = vrot.slane %v1677_v4, 1  ;;  %v1806_v26 = vsel %vm577_vm0, %v1800_v47, %v1805_v29 }
 0x1dd   : > { %v1811_v3 = vrot.slane %v1678_v7, 1  ;;  %v1532_v8 = vpop.f32.mrb[8].mxu0  ;;  %v1808_v9 = vsel %vm577_vm0, %v1803_v50, %v1807_v5  ;;  %v1995_v12 = vmax.f32 %v1673_v41, %v1806_v26 }
 0x1de   : > { %v1533_v10 = vadd.f32 %v1532_v8, %v8690_v27  ;;  %v1534_v13 = vpop.f32.mrb[9].mxu0  ;;  %v1996_v14 = vmax.f32 %v1674_v43, %v1808_v9  ;;  %v1810_v15 = vsel %vm577_vm0, %v1805_v29, %v1809_v37 }
 0x1df   : > { %v1535_v16 = vadd.f32 %v1534_v13, %v8694_v28  ;;  %v1536_v17 = vpop.f32.mrb[10].mxu0  ;;  %v2078_v18 = vpack.c.bf16 %v1995_v12, %v1993_v58  ;;  %v1812_v45 = vsel %vm577_vm0, %v1807_v5, %v1811_v3  ;;  %v1997_v11 = vmax.f32 %v1675_v1, %v1810_v15 }
 0x1e0   : > { %v1679_v46 = vmax.f32 %v1533_v10, 0.0  ;;  %v1537_v19 = vadd.f32 %v1536_v17, %v8690_v27  ;;  %v1538_v20 = vpop.f32.mrb[11].mxu0  ;;  %v2079_v0 = vpack.c.bf16 %v1996_v14, %v1994_v61  ;;  %v1998_v42 = vmax.f32 %v1676_v62, %v1812_v45 }
 0x1e1   : > { %v1680_v21 = vmax.f32 %v1535_v16, 0.0  ;;  %v1539_v22 = vadd.f32 %v1538_v20, %v8694_v28 }
 0x1e2   : > { %v1813_v23 = vrot.slane %v1679_v46, 1  ;;  %v1681_v51 = vmax.f32 %v1537_v19, 0.0  ;;  %6339 = vmatprep.mubr.msk.bf16.mxu1 %vm2173_vm7, %v2079_v0  ;;  %6366 = vmatprep.mubr.msk.bf16.mxu0 %vm2173_vm7, %v2079_v0 }
 0x1e3   : > { %v1815_v30 = vrot.slane %v1680_v21, 1  ;;  %v1682_v31 = vmax.f32 %v1539_v22, 0.0  ;;  %2258 = vmatmul.mubr.bf16.vlgmr.msra.gmra.mrb[0].mxu1 %v2078_v18  ;;  %2507 = vmatmul.mubr.bf16.vlgmr.msra.gmra.mrb[64].mxu0 %v2078_v18 }
 0x1e4   : > { %v1817_v32 = vrot.slane %v1681_v51, 1  ;;  %v1814_v33 = vsel %vm577_vm0, %v1809_v37, %v1813_v23 }
 0x1e5   : > { %v1819_v34 = vrot.slane %v1682_v31, 1  ;;  %v1542_v35 = vpop.f32.mrb[12].mxu0  ;;  %v1816_v36 = vsel %vm577_vm0, %v1811_v3, %v1815_v30  ;;  %v1999_v38 = vmax.f32 %v1677_v4, %v1814_v33 }
 0x1e6   : > { %v1543_v39 = vadd.f32 %v1542_v35, %v8690_v27  ;;  %v1544_v40 = vpop.f32.mrb[13].mxu0  ;;  %v2000_v41 = vmax.f32 %v1678_v7, %v1816_v36  ;;  %v1818_v43 = vsel %vm577_vm0, %v1813_v23, %v1817_v32 }
 0x1e7   : > { %v1545_v47 = vadd.f32 %v1544_v40, %v8694_v28  ;;  %v1546_v50 = vpop.f32.mrb[14].mxu0  ;;  %v2080_v52 = vpack.c.bf16 %v1999_v38, %v1997_v11  ;;  %v1820_v53 = vsel %vm577_vm0, %v1815_v30, %v1819_v34  ;;  %v2001_v6 = vmax.f32 %v1679_v46, %v1818_v43 }
 0x1e8   : > { %v1683_v54 = vmax.f32 %v1543_v39, 0.0  ;;  %v1547_v55 = vadd.f32 %v1546_v50, %v8690_v27  ;;  %v1548_v56 = vpop.f32.mrb[15].mxu0  ;;  %v2081_v57 = vpack.c.bf16 %v2000_v41, %v1998_v42  ;;  %v2002_v58 = vmax.f32 %v1680_v21, %v1820_v53 }
 0x1e9   : > { %v1684_v1 = vmax.f32 %v1545_v47, 0.0  ;;  %v1549_v59 = vadd.f32 %v1548_v56, %v8694_v28 }
 0x1ea   : > { %v1821_v60 = vrot.slane %v1683_v54, 1  ;;  %v1685_v61 = vmax.f32 %v1547_v55, 0.0  ;;  %6340 = vmatprep.mubr.msk.bf16.mxu1 %vm2173_vm7, %v2081_v57  ;;  %6367 = vmatprep.mubr.msk.bf16.mxu0 %vm2173_vm7, %v2081_v57 }
 0x1eb   : > { %v1823_v62 = vrot.slane %v1684_v1, 1  ;;  %v1686_v63 = vmax.f32 %v1549_v59, 0.0  ;;  %2266 = vmatmul.mubr.bf16.gmra.mrb[4].mxu1 %v2080_v52  ;;  %2515 = vmatmul.mubr.bf16.gmra.mrb[68].mxu0 %v2080_v52 }
 0x1ec   : > { %v1825_v29 = vrot.slane %v1685_v61, 1  ;;  %v1822_v4 = vsel %vm577_vm0, %v1817_v32, %v1821_v60 }
 0x1ed   : > { %v1824_v5 = vsel %vm577_vm0, %v1819_v34, %v1823_v62  ;;  %v1827_v7 = vrot.slane %v1686_v63, 1  ;;  %v1552_v37 = vpop.f32.mrb[16].mxu0  ;;  %v2003_v26 = vmax.f32 %v1681_v51, %v1822_v4 }
 0x1ee   : > { %v2004_v3 = vmax.f32 %v1682_v31, %v1824_v5  ;;  %v1553_v8 = vadd.f32 %v1552_v37, %v8690_v27  ;;  %v1554_v9 = vpop.f32.mrb[17].mxu0  ;;  %v1826_v12 = vsel %vm577_vm0, %v1821_v60, %v1825_v29 }
 0x1ef   : > { %v1828_v10 = vsel %vm577_vm0, %v1823_v62, %v1827_v7  ;;  %v1555_v13 = vadd.f32 %v1554_v9, %v8694_v28  ;;  %v1556_v14 = vpop.f32.mrb[18].mxu0  ;;  %v2082_v15 = vpack.c.bf16 %v2003_v26, %v2001_v6  ;;  %v2005_v16 = vmax.f32 %v1683_v54, %v1826_v12 }
 0x1f0   : > { %v2006_v17 = vmax.f32 %v1684_v1, %v1828_v10  ;;  %v1687_v18 = vmax.f32 %v1553_v8, 0.0  ;;  %v1557_v45 = vadd.f32 %v1556_v14, %v8690_v27  ;;  %v1558_v11 = vpop.f32.mrb[19].mxu0  ;;  %v2083_v46 = vpack.c.bf16 %v2004_v3, %v2002_v58 }
 0x1f1   : > { %v1688_v19 = vmax.f32 %v1555_v13, 0.0  ;;  %v1559_v20 = vadd.f32 %v1558_v11, %v8694_v28 }
 0x1f2   : > { %v1829_v0 = vrot.slane %v1687_v18, 1  ;;  %v1689_v42 = vmax.f32 %v1557_v45, 0.0  ;;  %6341 = vmatprep.mubr.msk.bf16.mxu1 %vm2173_vm7, %v2083_v46  ;;  %6368 = vmatprep.mubr.msk.bf16.mxu0 %vm2173_vm7, %v2083_v46 }
 0x1f3   : > { %v1831_v21 = vrot.slane %v1688_v19, 1  ;;  %v1690_v22 = vmax.f32 %v1559_v20, 0.0  ;;  %2274 = vmatmul.mubr.bf16.gmra.mrb[8].mxu1 %v2082_v15  ;;  %2523 = vmatmul.mubr.bf16.gmra.mrb[72].mxu0 %v2082_v15 }
 0x1f4   : > { %v1833_v23 = vrot.slane %v1689_v42, 1  ;;  %v1830_v51 = vsel %vm577_vm0, %v1825_v29, %v1829_v0 }
 0x1f5   : > { %v1832_v30 = vsel %vm577_vm0, %v1827_v7, %v1831_v21  ;;  %v1835_v31 = vrot.slane %v1690_v22, 1  ;;  %v1562_v32 = vpop.f32.mrb[20].mxu0  ;;  %v2007_v33 = vmax.f32 %v1685_v61, %v1830_v51 }
 0x1f6   : > { %v2008_v34 = vmax.f32 %v1686_v63, %v1832_v30  ;;  %v1563_v35 = vadd.f32 %v1562_v32, %v8690_v27  ;;  %v1564_v36 = vpop.f32.mrb[21].mxu0  ;;  %v1834_v38 = vsel %vm577_vm0, %v1829_v0, %v1833_v23 }
 0x1f7   : > { %v1836_v39 = vsel %vm577_vm0, %v1831_v21, %v1835_v31  ;;  %v1565_v40 = vadd.f32 %v1564_v36, %v8694_v28  ;;  %v1566_v41 = vpop.f32.mrb[22].mxu0  ;;  %v2084_v43 = vpack.c.bf16 %v2007_v33, %v2005_v16  ;;  %v2009_v47 = vmax.f32 %v1687_v18, %v1834_v38 }
 0x1f8   : > { %v2010_v50 = vmax.f32 %v1688_v19, %v1836_v39  ;;  %v1691_v52 = vmax.f32 %v1563_v35, 0.0  ;;  %v1567_v53 = vadd.f32 %v1566_v41, %v8690_v27  ;;  %v1568_v6 = vpop.f32.mrb[23].mxu0  ;;  %v2085_v54 = vpack.c.bf16 %v2008_v34, %v2006_v17 }
 0x1f9   : > { %v1692_v55 = vmax.f32 %v1565_v40, 0.0  ;;  %v1569_v56 = vadd.f32 %v1568_v6, %v8694_v28 }
 0x1fa   : > { %v1837_v57 = vrot.slane %v1691_v52, 1  ;;  %v1693_v58 = vmax.f32 %v1567_v53, 0.0  ;;  %6342 = vmatprep.mubr.msk.bf16.mxu1 %vm2173_vm7, %v2085_v54  ;;  %6369 = vmatprep.mubr.msk.bf16.mxu0 %vm2173_vm7, %v2085_v54 }
 0x1fb   : > { %v1839_v1 = vrot.slane %v1692_v55, 1  ;;  %v1694_v59 = vmax.f32 %v1569_v56, 0.0  ;;  %2282 = vmatmul.mubr.bf16.gmra.mrb[12].mxu1 %v2084_v43  ;;  %2531 = vmatmul.mubr.bf16.gmra.mrb[76].mxu0 %v2084_v43 }
 0x1fc   : > { %v1841_v60 = vrot.slane %v1693_v58, 1  ;;  %v1838_v61 = vsel %vm577_vm0, %v1833_v23, %v1837_v57 }
 0x1fd   : > { %v1840_v62 = vsel %vm577_vm0, %v1835_v31, %v1839_v1  ;;  %v1843_v63 = vrot.slane %v1694_v59, 1  ;;  %v1572_v29 = vpop.f32.mrb[24].mxu0  ;;  %v2011_v4 = vmax.f32 %v1689_v42, %v1838_v61 }
 0x1fe   : > { %v2012_v5 = vmax.f32 %v1690_v22, %v1840_v62  ;;  %v1573_v7 = vadd.f32 %v1572_v29, %v8690_v27  ;;  %v1574_v37 = vpop.f32.mrb[25].mxu0  ;;  %v1842_v26 = vsel %vm577_vm0, %v1837_v57, %v1841_v60 }
 0x1ff   : > { %v1844_v3 = vsel %vm577_vm0, %v1839_v1, %v1843_v63  ;;  %v1575_v8 = vadd.f32 %v1574_v37, %v8694_v28  ;;  %v1576_v9 = vpop.f32.mrb[26].mxu0  ;;  %v2086_v12 = vpack.c.bf16 %v2011_v4, %v2009_v47  ;;  %v2013_v10 = vmax.f32 %v1691_v52, %v1842_v26 }
 0x200   : > { %v2014_v13 = vmax.f32 %v1692_v55, %v1844_v3  ;;  %v1695_v14 = vmax.f32 %v1573_v7, 0.0  ;;  %v1577_v15 = vadd.f32 %v1576_v9, %v8690_v27  ;;  %v1578_v16 = vpop.f32.mrb[27].mxu0  ;;  %v2087_v17 = vpack.c.bf16 %v2012_v5, %v2010_v50 }
 0x201   : > { %v1696_v18 = vmax.f32 %v1575_v8, 0.0  ;;  %v1579_v45 = vadd.f32 %v1578_v16, %v8694_v28 }
 0x202   : > { %v1845_v11 = vrot.slane %v1695_v14, 1  ;;  %v1697_v46 = vmax.f32 %v1577_v15, 0.0  ;;  %6343 = vmatprep.mubr.msk.bf16.mxu1 %vm2173_vm7, %v2087_v17  ;;  %6370 = vmatprep.mubr.msk.bf16.mxu0 %vm2173_vm7, %v2087_v17 }
 0x203   : > { %v1847_v19 = vrot.slane %v1696_v18, 1  ;;  %v1698_v20 = vmax.f32 %v1579_v45, 0.0  ;;  %2290 = vmatmul.mubr.bf16.gmra.mrb[16].mxu1 %v2086_v12  ;;  %2539 = vmatmul.mubr.bf16.gmra.mrb[80].mxu0 %v2086_v12 }
 0x204   : > { %v1849_v0 = vrot.slane %v1697_v46, 1  ;;  %v1846_v42 = vsel %vm577_vm0, %v1841_v60, %v1845_v11 }
 0x205   : > { %v1848_v21 = vsel %vm577_vm0, %v1843_v63, %v1847_v19  ;;  %v1851_v22 = vrot.slane %v1698_v20, 1  ;;  %v1582_v23 = vpop.f32.mrb[28].mxu0  ;;  %v2015_v51 = vmax.f32 %v1693_v58, %v1846_v42 }
 0x206   : > { %v2016_v30 = vmax.f32 %v1694_v59, %v1848_v21  ;;  %v1583_v31 = vadd.f32 %v1582_v23, %v8690_v27  ;;  %v1584_v32 = vpop.f32.mrb[29].mxu0  ;;  %v1850_v33 = vsel %vm577_vm0, %v1845_v11, %v1849_v0 }
 0x207   : > { %v1852_v34 = vsel %vm577_vm0, %v1847_v19, %v1851_v22  ;;  %v1585_v35 = vadd.f32 %v1584_v32, %v8694_v28  ;;  %v1586_v36 = vpop.f32.mrb[30].mxu0  ;;  %v2088_v38 = vpack.c.bf16 %v2015_v51, %v2013_v10  ;;  %v2017_v39 = vmax.f32 %v1695_v14, %v1850_v33 }
 0x208   : > { %v2018_v40 = vmax.f32 %v1696_v18, %v1852_v34  ;;  %v1699_v41 = vmax.f32 %v1583_v31, 0.0  ;;  %v1587_v43 = vadd.f32 %v1586_v36, %v8690_v27  ;;  %v1588_v47 = vpop.f32.mrb[31].mxu0  ;;  %v2089_v50 = vpack.c.bf16 %v2016_v30, %v2014_v13 }
 0x209   : > { %v1700_v52 = vmax.f32 %v1585_v35, 0.0  ;;  %v1589_v53 = vadd.f32 %v1588_v47, %v8694_v28 }
 0x20a   : > { %v1853_v6 = vrot.slane %v1699_v41, 1  ;;  %v1701_v54 = vmax.f32 %v1587_v43, 0.0  ;;  %6344 = vmatprep.mubr.msk.bf16.mxu1 %vm2173_vm7, %v2089_v50  ;;  %6371 = vmatprep.mubr.msk.bf16.mxu0 %vm2173_vm7, %v2089_v50 }
 0x20b   : > { %v1855_v55 = vrot.slane %v1700_v52, 1  ;;  %v1702_v56 = vmax.f32 %v1589_v53, 0.0  ;;  %2298 = vmatmul.mubr.bf16.gmra.mrb[20].mxu1 %v2088_v38  ;;  %2547 = vmatmul.mubr.bf16.gmra.mrb[84].mxu0 %v2088_v38 }
 0x20c   : > { %v1857_v57 = vrot.slane %v1701_v54, 1  ;;  %v1854_v58 = vsel %vm577_vm0, %v1849_v0, %v1853_v6 }
 0x20d   : > { %v1856_v1 = vsel %vm577_vm0, %v1851_v22, %v1855_v55  ;;  %v1859_v59 = vrot.slane %v1702_v56, 1  ;;  %v1592_v60 = vpop.f32.mrb[32].mxu0  ;;  %v2019_v61 = vmax.f32 %v1697_v46, %v1854_v58 }
 0x20e   : > { %v2020_v62 = vmax.f32 %v1698_v20, %v1856_v1  ;;  %v1593_v63 = vadd.f32 %v1592_v60, %v8690_v27  ;;  %v1594_v29 = vpop.f32.mrb[33].mxu0  ;;  %v1858_v4 = vsel %vm577_vm0, %v1853_v6, %v1857_v57 }
 0x20f   : > { %v1860_v5 = vsel %vm577_vm0, %v1855_v55, %v1859_v59  ;;  %v1595_v7 = vadd.f32 %v1594_v29, %v8694_v28  ;;  %v1596_v37 = vpop.f32.mrb[34].mxu0  ;;  %v2090_v26 = vpack.c.bf16 %v2019_v61, %v2017_v39  ;;  %v2021_v3 = vmax.f32 %v1699_v41, %v1858_v4 }
 0x210   : > { %v2022_v8 = vmax.f32 %v1700_v52, %v1860_v5  ;;  %v1703_v9 = vmax.f32 %v1593_v63, 0.0  ;;  %v1597_v12 = vadd.f32 %v1596_v37, %v8690_v27  ;;  %v1598_v10 = vpop.f32.mrb[35].mxu0  ;;  %v2091_v13 = vpack.c.bf16 %v2020_v62, %v2018_v40 }
 0x211   : > { %v1704_v14 = vmax.f32 %v1595_v7, 0.0  ;;  %v1599_v15 = vadd.f32 %v1598_v10, %v8694_v28 }
 0x212   : > { %v1861_v16 = vrot.slane %v1703_v9, 1  ;;  %v1705_v17 = vmax.f32 %v1597_v12, 0.0  ;;  %6345 = vmatprep.mubr.msk.bf16.mxu1 %vm2173_vm7, %v2091_v13  ;;  %6372 = vmatprep.mubr.msk.bf16.mxu0 %vm2173_vm7, %v2091_v13 }
 0x213   : > { %v1863_v18 = vrot.slane %v1704_v14, 1  ;;  %v1706_v45 = vmax.f32 %v1599_v15, 0.0  ;;  %2306 = vmatmul.mubr.bf16.gmra.mrb[24].mxu1 %v2090_v26  ;;  %2555 = vmatmul.mubr.bf16.gmra.mrb[88].mxu0 %v2090_v26 }
 0x214   : > { %v1865_v11 = vrot.slane %v1705_v17, 1  ;;  %v1862_v46 = vsel %vm577_vm0, %v1857_v57, %v1861_v16 }
 0x215   : > { %v1864_v19 = vsel %vm577_vm0, %v1859_v59, %v1863_v18  ;;  %v1867_v20 = vrot.slane %v1706_v45, 1  ;;  %v1602_v0 = vpop.f32.mrb[36].mxu0  ;;  %v2023_v42 = vmax.f32 %v1701_v54, %v1862_v46 }
 0x216   : > { %v2024_v21 = vmax.f32 %v1702_v56, %v1864_v19  ;;  %v1603_v22 = vadd.f32 %v1602_v0, %v8690_v27  ;;  %v1604_v23 = vpop.f32.mrb[37].mxu0  ;;  %v1866_v51 = vsel %vm577_vm0, %v1861_v16, %v1865_v11 }
 0x217   : > { %v1868_v30 = vsel %vm577_vm0, %v1863_v18, %v1867_v20  ;;  %v1605_v31 = vadd.f32 %v1604_v23, %v8694_v28  ;;  %v1606_v32 = vpop.f32.mrb[38].mxu0  ;;  %v2092_v33 = vpack.c.bf16 %v2023_v42, %v2021_v3  ;;  %v2025_v34 = vmax.f32 %v1703_v9, %v1866_v51 }
 0x218   : > { %v2026_v35 = vmax.f32 %v1704_v14, %v1868_v30  ;;  %v1707_v36 = vmax.f32 %v1603_v22, 0.0  ;;  %v1607_v38 = vadd.f32 %v1606_v32, %v8690_v27  ;;  %v1608_v39 = vpop.f32.mrb[39].mxu0  ;;  %v2093_v40 = vpack.c.bf16 %v2024_v21, %v2022_v8 }
 0x219   : > { %v1708_v41 = vmax.f32 %v1605_v31, 0.0  ;;  %v1609_v43 = vadd.f32 %v1608_v39, %v8694_v28 }
 0x21a   : > { %v1869_v47 = vrot.slane %v1707_v36, 1  ;;  %v1709_v50 = vmax.f32 %v1607_v38, 0.0  ;;  %6346 = vmatprep.mubr.msk.bf16.mxu1 %vm2173_vm7, %v2093_v40  ;;  %6373 = vmatprep.mubr.msk.bf16.mxu0 %vm2173_vm7, %v2093_v40 }
 0x21b   : > { %v1871_v52 = vrot.slane %v1708_v41, 1  ;;  %v1710_v53 = vmax.f32 %v1609_v43, 0.0  ;;  %2314 = vmatmul.mubr.bf16.gmra.mrb[28].mxu1 %v2092_v33  ;;  %2563 = vmatmul.mubr.bf16.gmra.mrb[92].mxu0 %v2092_v33 }
 0x21c   : > { %v1873_v6 = vrot.slane %v1709_v50, 1  ;;  %v1870_v54 = vsel %vm577_vm0, %v1865_v11, %v1869_v47 }
 0x21d   : > { %v1872_v55 = vsel %vm577_vm0, %v1867_v20, %v1871_v52  ;;  %v1875_v56 = vrot.slane %v1710_v53, 1  ;;  %v1612_v57 = vpop.f32.mrb[40].mxu0  ;;  %v2027_v58 = vmax.f32 %v1705_v17, %v1870_v54 }
 0x21e   : > { %v2028_v1 = vmax.f32 %v1706_v45, %v1872_v55  ;;  %v1613_v59 = vadd.f32 %v1612_v57, %v8690_v27  ;;  %v1614_v60 = vpop.f32.mrb[41].mxu0  ;;  %v1874_v61 = vsel %vm577_vm0, %v1869_v47, %v1873_v6 }
 0x21f   : > { %v1876_v62 = vsel %vm577_vm0, %v1871_v52, %v1875_v56  ;;  %v1615_v63 = vadd.f32 %v1614_v60, %v8694_v28  ;;  %v1616_v29 = vpop.f32.mrb[42].mxu0  ;;  %v2094_v4 = vpack.c.bf16 %v2027_v58, %v2025_v34  ;;  %v2029_v5 = vmax.f32 %v1707_v36, %v1874_v61 }
 0x220   : > { %v2030_v7 = vmax.f32 %v1708_v41, %v1876_v62  ;;  %v1711_v37 = vmax.f32 %v1613_v59, 0.0  ;;  %v1617_v26 = vadd.f32 %v1616_v29, %v8690_v27  ;;  %v1618_v3 = vpop.f32.mrb[43].mxu0  ;;  %v2095_v8 = vpack.c.bf16 %v2028_v1, %v2026_v35 }
 0x221   : > { %v1712_v9 = vmax.f32 %v1615_v63, 0.0  ;;  %v1619_v12 = vadd.f32 %v1618_v3, %v8694_v28 }
 0x222   : > { %v1877_v10 = vrot.slane %v1711_v37, 1  ;;  %v1713_v13 = vmax.f32 %v1617_v26, 0.0  ;;  %6347 = vmatprep.mubr.msk.bf16.mxu1 %vm2173_vm7, %v2095_v8  ;;  %6374 = vmatprep.mubr.msk.bf16.mxu0 %vm2173_vm7, %v2095_v8 }
 0x223   : > { %v1879_v14 = vrot.slane %v1712_v9, 1  ;;  %v1714_v15 = vmax.f32 %v1619_v12, 0.0  ;;  %2322 = vmatmul.mubr.bf16.gmra.mrb[32].mxu1 %v2094_v4  ;;  %2571 = vmatmul.mubr.bf16.gmra.mrb[96].mxu0 %v2094_v4 }
 0x224   : > { %v1881_v16 = vrot.slane %v1713_v13, 1  ;;  %v1878_v17 = vsel %vm577_vm0, %v1873_v6, %v1877_v10 }
 0x225   : > { %v1880_v18 = vsel %vm577_vm0, %v1875_v56, %v1879_v14  ;;  %v1883_v45 = vrot.slane %v1714_v15, 1  ;;  %v1622_v11 = vpop.f32.mrb[44].mxu0  ;;  %v2031_v46 = vmax.f32 %v1709_v50, %v1878_v17 }
 0x226   : > { %v2032_v19 = vmax.f32 %v1710_v53, %v1880_v18  ;;  %v1623_v20 = vadd.f32 %v1622_v11, %v8690_v27  ;;  %v1624_v0 = vpop.f32.mrb[45].mxu0  ;;  %v1882_v42 = vsel %vm577_vm0, %v1877_v10, %v1881_v16 }
 0x227   : > { %v1884_v21 = vsel %vm577_vm0, %v1879_v14, %v1883_v45  ;;  %v1625_v22 = vadd.f32 %v1624_v0, %v8694_v28  ;;  %v1626_v23 = vpop.f32.mrb[46].mxu0  ;;  %v2096_v51 = vpack.c.bf16 %v2031_v46, %v2029_v5  ;;  %v2033_v30 = vmax.f32 %v1711_v37, %v1882_v42 }
 0x228   : > { %v2034_v31 = vmax.f32 %v1712_v9, %v1884_v21  ;;  %v1715_v32 = vmax.f32 %v1623_v20, 0.0  ;;  %v1627_v33 = vadd.f32 %v1626_v23, %v8690_v27  ;;  %v1628_v34 = vpop.f32.mrb[47].mxu0  ;;  %v2097_v35 = vpack.c.bf16 %v2032_v19, %v2030_v7 }
 0x229   : > { %v1716_v36 = vmax.f32 %v1625_v22, 0.0  ;;  %v1629_v38 = vadd.f32 %v1628_v34, %v8694_v28 }
 0x22a   : > { %v1885_v39 = vrot.slane %v1715_v32, 1  ;;  %v1717_v40 = vmax.f32 %v1627_v33, 0.0  ;;  %6348 = vmatprep.mubr.msk.bf16.mxu1 %vm2173_vm7, %v2097_v35  ;;  %6375 = vmatprep.mubr.msk.bf16.mxu0 %vm2173_vm7, %v2097_v35 }
 0x22b   : > { %v1887_v41 = vrot.slane %v1716_v36, 1  ;;  %v1718_v43 = vmax.f32 %v1629_v38, 0.0  ;;  %2330 = vmatmul.mubr.bf16.gmra.mrb[36].mxu1 %v2096_v51  ;;  %2579 = vmatmul.mubr.bf16.gmra.mrb[100].mxu0 %v2096_v51 }
 0x22c   : > { %v1889_v47 = vrot.slane %v1717_v40, 1  ;;  %v1886_v50 = vsel %vm577_vm0, %v1881_v16, %v1885_v39 }
 0x22d   : > { %v1888_v52 = vsel %vm577_vm0, %v1883_v45, %v1887_v41  ;;  %v1891_v53 = vrot.slane %v1718_v43, 1  ;;  %v1632_v6 = vpop.f32.mrb[48].mxu0  ;;  %v2035_v54 = vmax.f32 %v1713_v13, %v1886_v50 }
 0x22e   : > { %v2036_v55 = vmax.f32 %v1714_v15, %v1888_v52  ;;  %v1633_v56 = vadd.f32 %v1632_v6, %v8690_v27  ;;  %v1634_v57 = vpop.f32.mrb[49].mxu0  ;;  %v1890_v58 = vsel %vm577_vm0, %v1885_v39, %v1889_v47 }
 0x22f   : > { %v1892_v1 = vsel %vm577_vm0, %v1887_v41, %v1891_v53  ;;  %v1635_v59 = vadd.f32 %v1634_v57, %v8694_v28  ;;  %v1636_v60 = vpop.f32.mrb[50].mxu0  ;;  %v2098_v61 = vpack.c.bf16 %v2035_v54, %v2033_v30  ;;  %v2037_v62 = vmax.f32 %v1715_v32, %v1890_v58 }
 0x230   : > { %v2038_v63 = vmax.f32 %v1716_v36, %v1892_v1  ;;  %v1719_v29 = vmax.f32 %v1633_v56, 0.0  ;;  %v1637_v4 = vadd.f32 %v1636_v60, %v8690_v27  ;;  %v1638_v5 = vpop.f32.mrb[51].mxu0  ;;  %v2099_v7 = vpack.c.bf16 %v2036_v55, %v2034_v31 }
 0x231   : > { %v1720_v37 = vmax.f32 %v1635_v59, 0.0  ;;  %v1639_v26 = vadd.f32 %v1638_v5, %v8694_v28 }
 0x232   : > { %v1893_v3 = vrot.slane %v1719_v29, 1  ;;  %v1721_v8 = vmax.f32 %v1637_v4, 0.0  ;;  %6349 = vmatprep.mubr.msk.bf16.mxu1 %vm2173_vm7, %v2099_v7  ;;  %6376 = vmatprep.mubr.msk.bf16.mxu0 %vm2173_vm7, %v2099_v7 }
 0x233   : > { %v1895_v9 = vrot.slane %v1720_v37, 1  ;;  %v1722_v12 = vmax.f32 %v1639_v26, 0.0  ;;  %2338 = vmatmul.mubr.bf16.gmra.mrb[40].mxu1 %v2098_v61  ;;  %2587 = vmatmul.mubr.bf16.gmra.mrb[104].mxu0 %v2098_v61 }
 0x234   : > { %v1897_v10 = vrot.slane %v1721_v8, 1  ;;  %v1894_v13 = vsel %vm577_vm0, %v1889_v47, %v1893_v3 }
 0x235   : > { %v1896_v14 = vsel %vm577_vm0, %v1891_v53, %v1895_v9  ;;  %v1899_v15 = vrot.slane %v1722_v12, 1  ;;  %v1642_v16 = vpop.f32.mrb[52].mxu0  ;;  %v2039_v17 = vmax.f32 %v1717_v40, %v1894_v13 }
 0x236   : > { %v2040_v18 = vmax.f32 %v1718_v43, %v1896_v14  ;;  %v1643_v45 = vadd.f32 %v1642_v16, %v8690_v27  ;;  %v1644_v11 = vpop.f32.mrb[53].mxu0  ;;  %v1898_v46 = vsel %vm577_vm0, %v1893_v3, %v1897_v10 }
 0x237   : > { %v1900_v19 = vsel %vm577_vm0, %v1895_v9, %v1899_v15  ;;  %v1645_v20 = vadd.f32 %v1644_v11, %v8694_v28  ;;  %v1646_v0 = vpop.f32.mrb[54].mxu0  ;;  %v2100_v42 = vpack.c.bf16 %v2039_v17, %v2037_v62  ;;  %v2041_v21 = vmax.f32 %v1719_v29, %v1898_v46 }
 0x238   : > { %v2042_v22 = vmax.f32 %v1720_v37, %v1900_v19  ;;  %v1723_v23 = vmax.f32 %v1643_v45, 0.0  ;;  %v1647_v51 = vadd.f32 %v1646_v0, %v8690_v27  ;;  %v1648_v30 = vpop.f32.mrb[55].mxu0  ;;  %v2101_v31 = vpack.c.bf16 %v2040_v18, %v2038_v63 }
 0x239   : > { %v1724_v32 = vmax.f32 %v1645_v20, 0.0  ;;  %v1649_v33 = vadd.f32 %v1648_v30, %v8694_v28 }
 0x23a   : > { %v1901_v34 = vrot.slane %v1723_v23, 1  ;;  %v1725_v35 = vmax.f32 %v1647_v51, 0.0  ;;  %6350 = vmatprep.mubr.msk.bf16.mxu1 %vm2173_vm7, %v2101_v31  ;;  %6377 = vmatprep.mubr.msk.bf16.mxu0 %vm2173_vm7, %v2101_v31 }
 0x23b   : > { %v1903_v36 = vrot.slane %v1724_v32, 1  ;;  %v1726_v38 = vmax.f32 %v1649_v33, 0.0  ;;  %2346 = vmatmul.mubr.bf16.gmra.mrb[44].mxu1 %v2100_v42  ;;  %2595 = vmatmul.mubr.bf16.gmra.mrb[108].mxu0 %v2100_v42 }
 0x23c   : > { %v1905_v39 = vrot.slane %v1725_v35, 1  ;;  %v1902_v40 = vsel %vm577_vm0, %v1897_v10, %v1901_v34 }
 0x23d   : > { %v1904_v41 = vsel %vm577_vm0, %v1899_v15, %v1903_v36  ;;  %v1907_v43 = vrot.slane %v1726_v38, 1  ;;  %v1652_v47 = vpop.f32.mrb[56].mxu0  ;;  %v2043_v50 = vmax.f32 %v1721_v8, %v1902_v40 }
 0x23e   : > { %v2044_v52 = vmax.f32 %v1722_v12, %v1904_v41  ;;  %v1653_v53 = vadd.f32 %v1652_v47, %v8690_v27  ;;  %v1654_v6 = vpop.f32.mrb[57].mxu0  ;;  %v1906_v54 = vsel %vm577_vm0, %v1901_v34, %v1905_v39 }
 0x23f   : > { %v1908_v55 = vsel %vm577_vm0, %v1903_v36, %v1907_v43  ;;  %v1655_v56 = vadd.f32 %v1654_v6, %v8694_v28  ;;  %v1656_v57 = vpop.f32.mrb[58].mxu0  ;;  %v2102_v58 = vpack.c.bf16 %v2043_v50, %v2041_v21  ;;  %v2045_v1 = vmax.f32 %v1723_v23, %v1906_v54 }
 0x240   : > { %v2046_v59 = vmax.f32 %v1724_v32, %v1908_v55  ;;  %v1727_v60 = vmax.f32 %v1653_v53, 0.0  ;;  %v1657_v61 = vadd.f32 %v1656_v57, %v8690_v27  ;;  %v1658_v62 = vpop.f32.mrb[59].mxu0  ;;  %v2103_v63 = vpack.c.bf16 %v2044_v52, %v2042_v22  ;;  %v7568_v57 = vld [vmem:[%s11024_s4 + $0x10] ss:$8 sps:$4 sm:$0xff]  }
 0x241   : > { %v1728_v29 = vmax.f32 %v1655_v56, 0.0  ;;  %v1659_v4 = vadd.f32 %v1658_v62, %v8694_v28  ;;  %v7577_v62 = vld [vmem:[%s11024_s4 + $0x40] ss:$8 sps:$4 sm:$0xff]  }
 0x242   : > { %v1909_v5 = vrot.slane %v1727_v60, 1  ;;  %v1729_v7 = vmax.f32 %v1657_v61, 0.0  ;;  %6351 = vmatprep.mubr.msk.bf16.mxu1 %vm2173_vm7, %v2103_v63  ;;  %6378 = vmatprep.mubr.msk.bf16.mxu0 %vm2173_vm7, %v2103_v63  ;;  %v7576_v61 = vld [vmem:[%s11024_s4 + $0x34] ss:$8 sps:$4 sm:$0xff]   ;;  %v7579_v63 = vld [vmem:[%s11024_s4 + $0x44] ss:$8 sps:$4 sm:$0xff]  }
 0x243   : > { %v1911_v37 = vrot.slane %v1728_v29, 1  ;;  %v1730_v26 = vmax.f32 %v1659_v4, 0.0  ;;  %2354 = vmatmul.mubr.bf16.gmra.mrb[48].mxu1 %v2102_v58  ;;  %2603 = vmatmul.mubr.bf16.gmra.mrb[112].mxu0 %v2102_v58  ;;  %v7570_v58 = vld [vmem:[%s11024_s4 + $0x14] ss:$8 sps:$4 sm:$0xff]  }
 0x244   : > { %v1913_v3 = vrot.slane %v1729_v7, 1  ;;  %v1910_v8 = vsel %vm577_vm0, %v1905_v39, %v1909_v5  ;;  %v7582_v4 = vld [vmem:[%s11024_s4 + $0x54] ss:$8 sps:$4 sm:$0xff]  }
 0x245   : > { %v1912_v9 = vsel %vm577_vm0, %v1907_v43, %v1911_v37  ;;  %v1915_v12 = vrot.slane %v1730_v26, 1  ;;  %v1662_v10 = vpop.f32.mrb[60].mxu0  ;;  %v2047_v13 = vmax.f32 %v1725_v35, %v1910_v8  ;;  %v7591_v8 = vld [vmem:[%s11024_s4 + $0x84] ss:$8 sps:$4 sm:$0xff]  }
 0x246   : > { %v2048_v14 = vmax.f32 %v1726_v38, %v1912_v9  ;;  %v1663_v15 = vadd.f32 %v1662_v10, %v8690_v27  ;;  %v1664_v16 = vpop.f32.mrb[61].mxu0  ;;  %v1914_v17 = vsel %vm577_vm0, %v1909_v5, %v1913_v3  ;;  %v7583_v5 = vld [vmem:[%s11024_s4 + $0x60] ss:$8 sps:$4 sm:$0xff]   ;;  %v7592_v9 = vld [vmem:[%s11024_s4 + $0x90] ss:$8 sps:$4 sm:$0xff]  }
 0x247   : > { %v1916_v18 = vsel %vm577_vm0, %v1911_v37, %v1915_v12  ;;  %v1665_v45 = vadd.f32 %v1664_v16, %v8694_v28  ;;  %v1666_v11 = vpop.f32.mrb[62].mxu0  ;;  %v2104_v46 = vpack.c.bf16 %v2047_v13, %v2045_v1  ;;  %v2049_v19 = vmax.f32 %v1727_v60, %v1914_v17  ;;  %v7571_v1 = vld [vmem:[%s11024_s4 + $0x20] ss:$8 sps:$4 sm:$0xff]   ;;  %v7574_v60 = vld [vmem:[%s11024_s4 + $0x30] ss:$8 sps:$4 sm:$0xff]  }
 0x248   : > { %v2050_v20 = vmax.f32 %v1728_v29, %v1916_v18  ;;  %v1731_v0 = vmax.f32 %v1663_v15, 0.0  ;;  %v1667_v42 = vadd.f32 %v1666_v11, %v8690_v27  ;;  %v1668_v21 = vpop.f32.mrb[63].mxu0  ;;  %v2105_v22 = vpack.c.bf16 %v2048_v14, %v2046_v59  ;;  %v7573_v59 = vld [vmem:[%s11024_s4 + $0x24] ss:$8 sps:$4 sm:$0xff]   ;;  %v7580_v29 = vld [vmem:[%s11024_s4 + $0x50] ss:$8 sps:$4 sm:$0xff]  }
 0x249   : > { %v1732_v23 = vmax.f32 %v1665_v45, 0.0  ;;  %v1669_v51 = vadd.f32 %v1668_v21, %v8694_v28  ;;  %v7586_v37 = vld [vmem:[%s11024_s4 + $0x70] ss:$8 sps:$4 sm:$0xff]   ;;  %v7595_v10 = vld [vmem:[%s11024_s4 + $0xa0] ss:$8 sps:$4 sm:$0xff]  }
 0x24a   : > { %v1917_v30 = vrot.slane %v1731_v0, 1  ;;  %v1733_v31 = vmax.f32 %v1667_v42, 0.0  ;;  %6352 = vmatprep.mubr.msk.bf16.mxu1 %vm2173_vm7, %v2105_v22  ;;  %6379 = vmatprep.mubr.msk.bf16.mxu0 %vm2173_vm7, %v2105_v22  ;;  %v7597_v13 = vld [vmem:[%s11024_s4 + $0xa4] ss:$8 sps:$4 sm:$0xff]   ;;  %v7598_v14 = vld [vmem:[%s11024_s4 + $0xb0] ss:$8 sps:$4 sm:$0xff]  }
 0x24b   : > { %v1919_v32 = vrot.slane %v1732_v23, 1  ;;  %v1734_v33 = vmax.f32 %v1669_v51, 0.0  ;;  %2362 = vmatmul.mubr.bf16.gmra.mrb[52].mxu1 %v2104_v46  ;;  %2611 = vmatmul.mubr.bf16.gmra.mrb[116].mxu0 %v2104_v46  ;;  %v7600_v15 = vld [vmem:[%s11024_s4 + $0xb4] ss:$8 sps:$4 sm:$0xff]   ;;  %v7601_v16 = vld [vmem:[%s11024_s4 + $0xc0] ss:$8 sps:$4 sm:$0xff]  }
 0x24c   : > { %v1921_v34 = vrot.slane %v1733_v31, 1  ;;  %v1918_v35 = vsel %vm577_vm0, %v1913_v3, %v1917_v30  ;;  %v7589_v3 = vld [vmem:[%s11024_s4 + $0x80] ss:$8 sps:$4 sm:$0xff]   ;;  %v7603_v17 = vld [vmem:[%s11024_s4 + $0xc4] ss:$8 sps:$4 sm:$0xff]  }
 0x24d   : > { %v1920_v27 = vsel %vm577_vm0, %v1915_v12, %v1919_v32  ;;  %v1923_v36 = vrot.slane %v1734_v33, 1  ;;  %v2051_v38 = vmax.f32 %v1729_v7, %v1918_v35  ;;  %v7585_v7 = vld [vmem:[%s11024_s4 + $0x64] ss:$8 sps:$4 sm:$0xff]   ;;  %v7594_v12 = vld [vmem:[%s11024_s4 + $0x94] ss:$8 sps:$4 sm:$0xff]  }
 0x24e   : > { %v2052_v39 = vmax.f32 %v1730_v26, %v1920_v27  ;;  %v1991_v28 = vsel %vm577_vm0, %v1921_v34, %v8700_v44  ;;  %v1922_v40 = vsel %vm577_vm0, %v1917_v30, %v1921_v34  ;;  %v7565_v44 = vld [vmem:[%s11024_s4] ss:$8 sps:$4 sm:$0xff]   ;;  %v7588_v26 = vld [vmem:[%s11024_s4 + $0x74] ss:$8 sps:$4 sm:$0xff]   ;;  %v7604_v11 = vld [vmem:[%s11024_s4 + $0xd0] ss:$8 sps:$4 sm:$0xff]  }
 0x24f   : > { %v2055_v41 = vmax.f32 %v1733_v31, %v1991_v28  ;;  %v1924_v43 = vsel %vm577_vm0, %v1919_v32, %v1923_v36  ;;  %v1992_v47 = vsel %vm577_vm0, %v1923_v36, %v8702_v48  ;;  %v2106_v50 = vpack.c.bf16 %v2051_v38, %v2049_v19  ;;  %v7567_v48 = vld [vmem:[%s11024_s4 + $0x4] ss:$8 sps:$4 sm:$0xff]   ;;  %v7606_v46 = vld [vmem:[%s11024_s4 + $0xd4] ss:$8 sps:$4 sm:$0xff]   ;;  %v7607_v31 = vld [vmem:[%s11024_s4 + $0xe0] ss:$8 sps:$4 sm:$0xff]  }
 0x250   : > { %v2054_v52 = vmax.f32 %v1732_v23, %v1924_v43  ;;  %v2056_v53 = vmax.f32 %v1734_v33, %v1992_v47  ;;  %v2107_v6 = vpack.c.bf16 %v2052_v39, %v2050_v20  ;;  %v2053_v54 = vmax.f32 %v1731_v0, %v1922_v40  ;;  %3865 = vmatprep.subr.bf16.mxu1 %v7567_v48  ;;  %v7609_v30 = vld [vmem:[%s11024_s4 + $0xe4] ss:$8 sps:$4 sm:$0xff]   ;;  %v7610_v34 = vld [vmem:[%s11024_s4 + $0xf0] ss:$8 sps:$4 sm:$0xff]   ;;  %v7612_v35 = vld [vmem:[%s11024_s4 + $0xf4] ss:$8 sps:$4 sm:$0xff]  }
 0x251   : > { %3866 = vmatpush1.bf16.msra.mxu1 %v7565_v44  ;;  %vm6018_vm0 = vcmask 982016  }
 0x252   : > { %v2109_v55 = vpack.c.bf16 %v2056_v53, %v2054_v52  ;;  %6353 = vmatprep.mubr.msk.bf16.mxu1 %vm2173_vm7, %v2107_v6  ;;  %6380 = vmatprep.mubr.msk.bf16.mxu0 %vm2173_vm7, %v2107_v6  ;;  %v2108_v56 = vpack.c.bf16 %v2055_v41, %v2053_v54 }
 0x253   : > { %2370 = vmatmul.mubr.bf16.gmra.mrb[56].mxu1 %v2106_v50  ;;  %2619 = vmatmul.mubr.bf16.gmra.mrb[120].mxu0 %v2106_v50 }
 0x254   : > { %6354 = vmatprep.mubr.msk.bf16.mxu1 %vm2173_vm7, %v2109_v55  ;;  %6381 = vmatprep.mubr.msk.bf16.mxu0 %vm2173_vm7, %v2109_v55 }
 0x255   : > { %3867 = vmatprep.subr.bf16.mxu1 %v7570_v58 }
 0x256   : > { %3868 = vmatpush1.bf16.msra.mxu1 %v7568_v57 }
 0x257   : > { %3869 = vmatprep.subr.bf16.mxu1 %v7573_v59 }
 0x25a   : > { %3870 = vmatpush1.bf16.msra.mxu1 %v7571_v1 }
 0x25b   : > { %2378 = vmatmul.mubr.bf16.gmra.mrb[60].mxu1 %v2108_v56  ;;  %2627 = vmatmul.mubr.bf16.gmra.mrb[124].mxu0 %v2108_v56 }
 0x25c   : > { %3871 = vmatprep.subr.bf16.mxu1 %v7576_v61 }
 0x25e   : > { %3872 = vmatpush1.bf16.msra.mxu1 %v7574_v60 }
 0x25f   : > { %3873 = vmatprep.subr.bf16.mxu1 %v7579_v63 }
 0x262   : > { %3874 = vmatpush1.bf16.msra.mxu1 %v7577_v62 }
 0x263   : > { %3875 = vmatprep.subr.bf16.mxu1 %v7582_v4 }
 0x266   : > { %3876 = vmatpush1.bf16.msra.mxu1 %v7580_v29 }
 0x267   : > { %3877 = vmatprep.subr.bf16.mxu1 %v7585_v7 }
 0x26a   : > { %3878 = vmatpush1.bf16.msra.mxu1 %v7583_v5 }
 0x26b   : > { %3879 = vmatprep.subr.bf16.mxu1 %v7588_v26 }
 0x26e   : > { %3880 = vmatpush1.bf16.msra.mxu1 %v7586_v37 }
 0x26f   : > { %3881 = vmatprep.subr.bf16.mxu1 %v7591_v8 }
 0x272   : > { %3882 = vmatpush1.bf16.msra.mxu1 %v7589_v3 }
 0x273   : > { %3883 = vmatprep.subr.bf16.mxu1 %v7594_v12 }
 0x276   : > { %3884 = vmatpush1.bf16.msra.mxu1 %v7592_v9 }
 0x277   : > { %3885 = vmatprep.subr.bf16.mxu1 %v7597_v13 }
 0x27a   : > { %3886 = vmatpush1.bf16.msra.mxu1 %v7595_v10 }
 0x27b   : > { %3887 = vmatprep.subr.bf16.mxu1 %v7600_v15 }
 0x27e   : > { %3888 = vmatpush1.bf16.msra.mxu1 %v7598_v14 }
 0x27f   : > { %3889 = vmatprep.subr.bf16.mxu1 %v7603_v17 }
 0x282   : > { %3890 = vmatpush1.bf16.msra.mxu1 %v7601_v16 }
 0x283   : > { %3891 = vmatprep.subr.bf16.mxu1 %v7606_v46 }
 0x286   : > { %3892 = vmatpush1.bf16.msra.mxu1 %v7604_v11 }
 0x287   : > { %3893 = vmatprep.subr.bf16.mxu1 %v7609_v30 }
 0x28a   : > { %3894 = vmatpush1.bf16.msra.mxu1 %v7607_v31 }
 0x28b   : > { %3895 = vmatprep.subr.bf16.mxu1 %v7612_v35 }
 0x28e   : > { %3896 = vmatpush1.bf16.msra.mxu1 %v7610_v34 }
 0x2b6   : > { %v2259_v18 = vpop.f32.mrb[0].mxu1  ;;  %v2508_v45 = vpop.f32.mrb[64].mxu0 }
 0x2b7   : > { %v8948_v19 = vmax.f32 %v2259_v18, %v2508_v45  ;;  %v2261_v20 = vpop.f32.mrb[1].mxu1  ;;  %v2510_v0 = vpop.f32.mrb[65].mxu0 }
 0x2b8   : > { %v2262_v42 = vpop.f32.mrb[2].mxu1  ;;  %v2511_v21 = vpop.f32.mrb[66].mxu0 }
 0x2b9   : > { %v8950_v22 = vmax.f32 %v2262_v42, %v2511_v21  ;;  %v2264_v23 = vpop.f32.mrb[3].mxu1  ;;  %v2513_v51 = vpop.f32.mrb[67].mxu0  ;;  %v2765_v43 = vrot.slane %v8948_v19, 4  ;;  %v2699_v47 = vrot.slane %v8948_v19, 2  ;;  %v2832_v60 = vrot.slane %v8948_v19, 6 }
 0x2bb   : > { %v2766_v39 = vrot.slane %v8950_v22, 4  ;;  %v2700_v28 = vrot.slane %v8950_v22, 2  ;;  %v2833_v56 = vrot.slane %v8950_v22, 6 }
 0x2bd   : > { %v2767_v44 = vsel %vm778_vm3, %v2765_v43, %v2766_v39  ;;  %v2701_v57 = vsel %vm644_vm2, %v2699_v47, %v2700_v28  ;;  %v2834_v37 = vsel %vm2831_vm8, %v2832_v60, %v2833_v56 }
 0x2be   : > { %v2267_v32 = vpop.f32.mrb[4].mxu1  ;;  %v2516_v33 = vpop.f32.mrb[68].mxu0 }
 0x2bf   : > { %v8964_v27 = vmax.f32 %v2267_v32, %v2516_v33  ;;  %v2269_v36 = vpop.f32.mrb[5].mxu1  ;;  %v2518_v38 = vpop.f32.mrb[69].mxu0 }
 0x2c0   : > { %v2270_v40 = vpop.f32.mrb[6].mxu1  ;;  %v2519_v41 = vpop.f32.mrb[70].mxu0 }
 0x2c1   : > { %v8970_v50 = vmax.f32 %v2270_v40, %v2519_v41  ;;  %v2272_v52 = vpop.f32.mrb[7].mxu1  ;;  %v2521_v53 = vpop.f32.mrb[71].mxu0  ;;  %v2768_v6 = vrot.slane %v8964_v27, 4  ;;  %v2702_v54 = vrot.slane %v8964_v27, 2  ;;  %v2835_v55 = vrot.slane %v8964_v27, 6 }
 0x2c3   : > { %v2769_v48 = vsel %vm778_vm3, %v2766_v39, %v2768_v6  ;;  %v2703_v58 = vsel %vm644_vm2, %v2700_v28, %v2702_v54  ;;  %v2836_v61 = vsel %vm2831_vm8, %v2833_v56, %v2835_v55  ;;  %v2770_v29 = vrot.slane %v8970_v50, 4 }
 0x2c4   : > { %v7198_v1 = vpack.i.bf16 %v2769_v48, %v2767_v44  ;;  %v7193_v59 = vpack.i.bf16 %v2703_v58, %v2701_v57  ;;  %v2704_v26 = vrot.slane %v8970_v50, 2  ;;  %v7203_v9 = vpack.i.bf16 %v2836_v61, %v2834_v37 }
 0x2c5   : > { %v2771_v17 = vsel %vm778_vm3, %v2768_v6, %v2770_v29  ;;  %v2837_v46 = vrot.slane %v8970_v50, 6 }
 0x2c6   : > { %v2524_v62 = vpop.f32.mrb[72].mxu0  ;;  %7199 = vrot.lane.b32.xlu1 %v7198_v1, %s7909_s14  ;;  %7194 = vrot.lane.b32.xlu0 %v7193_v59, %s7910_s3  ;;  %v2275_v63 = vpop.f32.mrb[8].mxu1  ;;  %v2705_v45 = vsel %vm644_vm2, %v2702_v54, %v2704_v26 }
 0x2c7   : > { %v8989_v4 = vmax.f32 %v2275_v63, %v2524_v62  ;;  %v2277_v5 = vpop.f32.mrb[9].mxu1  ;;  %v2526_v7 = vpop.f32.mrb[73].mxu0  ;;  %v2838_v33 = vsel %vm2831_vm8, %v2835_v55, %v2837_v46 }
 0x2c8   : > { %v2278_v3 = vpop.f32.mrb[10].mxu1  ;;  %v2527_v8 = vpop.f32.mrb[74].mxu0 }
 0x2c9   : > { %v8995_v12 = vmax.f32 %v2278_v3, %v2527_v8  ;;  %v2280_v10 = vpop.f32.mrb[11].mxu1  ;;  %v2529_v13 = vpop.f32.mrb[75].mxu0  ;;  %v2772_v14 = vrot.slane %v8989_v4, 4  ;;  %v2706_v15 = vrot.slane %v8989_v4, 2  ;;  %v2839_v16 = vrot.slane %v8989_v4, 6 }
 0x2ca   : > { %7204 = vrot.lane.b32.xlu0 %v7203_v9, %s7911_s24 }
 0x2cb   : > { %v2773_v18 = vsel %vm778_vm3, %v2770_v29, %v2772_v14  ;;  %v2707_v11 = vsel %vm644_vm2, %v2704_v26, %v2706_v15  ;;  %v2840_v42 = vsel %vm2831_vm8, %v2837_v46, %v2839_v16  ;;  %v2774_v51 = vrot.slane %v8995_v12, 4 }
 0x2cc   : > { %v7213_v20 = vpack.i.bf16 %v2773_v18, %v2771_v17  ;;  %v7208_v0 = vpack.i.bf16 %v2707_v11, %v2705_v45  ;;  %v2708_v34 = vrot.slane %v8995_v12, 2  ;;  %v7218_v38 = vpack.i.bf16 %v2840_v42, %v2838_v33 }
 0x2cd   : > { %v2775_v6 = vsel %vm778_vm3, %v2772_v14, %v2774_v51  ;;  %v2841_v44 = vrot.slane %v8995_v12, 6 }
 0x2ce   : > { %v2532_v21 = vpop.f32.mrb[76].mxu0  ;;  %7214 = vrot.lane.b32.xlu0 %v7213_v20, %s7909_s14  ;;  %7209 = vrot.lane.b32.xlu1 %v7208_v0, %s7910_s3  ;;  %v2283_v23 = vpop.f32.mrb[12].mxu1  ;;  %v2709_v55 = vsel %vm644_vm2, %v2706_v15, %v2708_v34 }
 0x2cf   : > { %v9010_v30 = vmax.f32 %v2283_v23, %v2532_v21  ;;  %v2285_v31 = vpop.f32.mrb[13].mxu1  ;;  %v2534_v32 = vpop.f32.mrb[77].mxu0  ;;  %v2842_v5 = vsel %vm2831_vm8, %v2839_v16, %v2841_v44 }
 0x2d0   : > { %v2286_v35 = vpop.f32.mrb[14].mxu1  ;;  %v2535_v36 = vpop.f32.mrb[78].mxu0 }
 0x2d1   : > { %v9014_v39 = vmax.f32 %v2286_v35, %v2535_v36  ;;  %v2288_v28 = vpop.f32.mrb[15].mxu1  ;;  %v2537_v40 = vpop.f32.mrb[79].mxu0  ;;  %v2776_v41 = vrot.slane %v9010_v30, 4  ;;  %v2710_v52 = vrot.slane %v9010_v30, 2  ;;  %v2843_v53 = vrot.slane %v9010_v30, 6 }
 0x2d2   : > { %7219 = vrot.lane.b32.xlu1 %v7218_v38, %s7911_s24 }
 0x2d3   : > { %v2777_v54 = vsel %vm778_vm3, %v2774_v51, %v2776_v41  ;;  %v2711_v56 = vsel %vm644_vm2, %v2708_v34, %v2710_v52  ;;  %v2844_v58 = vsel %vm2831_vm8, %v2841_v44, %v2843_v53  ;;  %v2778_v61 = vrot.slane %v9014_v39, 4 }
 0x2d4   : > { %v7228_v48 = vpack.i.bf16 %v2777_v54, %v2775_v6  ;;  %v7223_v57 = vpack.i.bf16 %v2711_v56, %v2709_v55  ;;  %v2712_v7 = vrot.slane %v9014_v39, 2  ;;  %v7233_v3 = vpack.i.bf16 %v2844_v58, %v2842_v5 }
 0x2d5   : > { %v2779_v17 = vsel %vm778_vm3, %v2776_v41, %v2778_v61  ;;  %v2845_v11 = vrot.slane %v9014_v39, 6 }
 0x2d6   : > { %v2540_v1 = vpop.f32.mrb[80].mxu0  ;;  %7229 = vrot.lane.b32.xlu1 %v7228_v48, %s7909_s14  ;;  %7224 = vrot.lane.b32.xlu0 %v7223_v57, %s7910_s3  ;;  %v2291_v59 = vpop.f32.mrb[16].mxu1  ;;  %v2713_v18 = vsel %vm644_vm2, %v2710_v52, %v2712_v7 }
 0x2d7   : > { %v9029_v62 = vmax.f32 %v2291_v59, %v2540_v1  ;;  %v2293_v63 = vpop.f32.mrb[17].mxu1  ;;  %v2542_v29 = vpop.f32.mrb[81].mxu0  ;;  %v2846_v33 = vsel %vm2831_vm8, %v2843_v53, %v2845_v11 }
 0x2d8   : > { %v2294_v37 = vpop.f32.mrb[18].mxu1  ;;  %v2543_v26 = vpop.f32.mrb[82].mxu0 }
 0x2d9   : > { %v9033_v8 = vmax.f32 %v2294_v37, %v2543_v26  ;;  %v2296_v9 = vpop.f32.mrb[19].mxu1  ;;  %v2545_v10 = vpop.f32.mrb[83].mxu0  ;;  %v2780_v13 = vrot.slane %v9029_v62, 4  ;;  %v2714_v14 = vrot.slane %v9029_v62, 2  ;;  %v2847_v15 = vrot.slane %v9029_v62, 6 }
 0x2da   : > { %7234 = vrot.lane.b32.xlu0 %v7233_v3, %s7911_s24 }
 0x2db   : > { %v2781_v16 = vsel %vm778_vm3, %v2778_v61, %v2780_v13  ;;  %v2715_v45 = vsel %vm644_vm2, %v2712_v7, %v2714_v14  ;;  %v2848_v0 = vsel %vm2831_vm8, %v2845_v11, %v2847_v15  ;;  %v2782_v23 = vrot.slane %v9033_v8, 4 }
 0x2dc   : > { %v7243_v46 = vpack.i.bf16 %v2781_v16, %v2779_v17  ;;  %v7238_v20 = vpack.i.bf16 %v2715_v45, %v2713_v18  ;;  %v2716_v34 = vrot.slane %v9033_v8, 2  ;;  %v7248_v38 = vpack.i.bf16 %v2848_v0, %v2846_v33 }
 0x2dd   : > { %v2783_v55 = vsel %vm778_vm3, %v2780_v13, %v2782_v23  ;;  %v2849_v48 = vrot.slane %v9033_v8, 6 }
 0x2de   : > { %v2548_v42 = vpop.f32.mrb[84].mxu0  ;;  %7244 = vrot.lane.b32.xlu0 %v7243_v46, %s7909_s14  ;;  %7239 = vrot.lane.b32.xlu1 %v7238_v20, %s7910_s3  ;;  %v2299_v21 = vpop.f32.mrb[20].mxu1  ;;  %v2717_v56 = vsel %vm644_vm2, %v2714_v14, %v2716_v34 }
 0x2df   : > { %v9048_v51 = vmax.f32 %v2299_v21, %v2548_v42  ;;  %v2301_v31 = vpop.f32.mrb[21].mxu1  ;;  %v2550_v32 = vpop.f32.mrb[85].mxu0  ;;  %v2850_v37 = vsel %vm2831_vm8, %v2847_v15, %v2849_v48 }
 0x2e0   : > { %v2302_v35 = vpop.f32.mrb[22].mxu1  ;;  %v2551_v36 = vpop.f32.mrb[86].mxu0 }
 0x2e1   : > { %v9052_v28 = vmax.f32 %v2302_v35, %v2551_v36  ;;  %v2304_v40 = vpop.f32.mrb[23].mxu1  ;;  %v2553_v41 = vpop.f32.mrb[87].mxu0  ;;  %v2784_v52 = vrot.slane %v9048_v51, 4  ;;  %v2718_v6 = vrot.slane %v9048_v51, 2  ;;  %v2851_v54 = vrot.slane %v9048_v51, 6 }
 0x2e2   : > { %7249 = vrot.lane.b32.xlu1 %v7248_v38, %s7911_s24 }
 0x2e3   : > { %v2785_v53 = vsel %vm778_vm3, %v2782_v23, %v2784_v52  ;;  %v2719_v44 = vsel %vm644_vm2, %v2716_v34, %v2718_v6  ;;  %v2852_v1 = vsel %vm2831_vm8, %v2849_v48, %v2851_v54  ;;  %v2786_v63 = vrot.slane %v9052_v28, 4 }
 0x2e4   : > { %v7258_v57 = vpack.i.bf16 %v2785_v53, %v2783_v55  ;;  %v7253_v58 = vpack.i.bf16 %v2719_v44, %v2717_v56  ;;  %v2720_v26 = vrot.slane %v9052_v28, 2  ;;  %v7263_v10 = vpack.i.bf16 %v2852_v1, %v2850_v37 }
 0x2e5   : > { %v2787_v11 = vsel %vm778_vm3, %v2784_v52, %v2786_v63  ;;  %v2853_v0 = vrot.slane %v9052_v28, 6 }
 0x2e6   : > { %v2556_v59 = vpop.f32.mrb[88].mxu0  ;;  %7259 = vrot.lane.b32.xlu1 %v7258_v57, %s7909_s14  ;;  %7254 = vrot.lane.b32.xlu0 %v7253_v58, %s7910_s3  ;;  %v2307_v61 = vpop.f32.mrb[24].mxu1  ;;  %v2721_v46 = vsel %vm644_vm2, %v2718_v6, %v2720_v26 }
 0x2e7   : > { %v9067_v29 = vmax.f32 %v2307_v61, %v2556_v59  ;;  %v2309_v5 = vpop.f32.mrb[25].mxu1  ;;  %v2558_v7 = vpop.f32.mrb[89].mxu0  ;;  %v2854_v38 = vsel %vm2831_vm8, %v2851_v54, %v2853_v0 }
 0x2e8   : > { %v2310_v3 = vpop.f32.mrb[26].mxu1  ;;  %v2559_v9 = vpop.f32.mrb[90].mxu0 }
 0x2e9   : > { %v9071_v13 = vmax.f32 %v2310_v3, %v2559_v9  ;;  %v2312_v14 = vpop.f32.mrb[27].mxu1  ;;  %v2561_v17 = vpop.f32.mrb[91].mxu0  ;;  %v2788_v16 = vrot.slane %v9067_v29, 4  ;;  %v2722_v18 = vrot.slane %v9067_v29, 2  ;;  %v2855_v45 = vrot.slane %v9067_v29, 6 }
 0x2ea   : > { %7264 = vrot.lane.b32.xlu0 %v7263_v10, %s7911_s24 }
 0x2eb   : > { %v2789_v15 = vsel %vm778_vm3, %v2786_v63, %v2788_v16  ;;  %v2723_v20 = vsel %vm644_vm2, %v2720_v26, %v2722_v18  ;;  %v2856_v23 = vsel %vm2831_vm8, %v2853_v0, %v2855_v45  ;;  %v2790_v33 = vrot.slane %v9071_v13, 4 }
 0x2ec   : > { %v7273_v42 = vpack.i.bf16 %v2789_v15, %v2787_v11  ;;  %v7268_v21 = vpack.i.bf16 %v2723_v20, %v2721_v46  ;;  %v2724_v40 = vrot.slane %v9071_v13, 2  ;;  %v7278_v6 = vpack.i.bf16 %v2856_v23, %v2854_v38 }
 0x2ed   : > { %v2791_v58 = vsel %vm778_vm3, %v2788_v16, %v2790_v33  ;;  %v2857_v61 = vrot.slane %v9071_v13, 6 }
 0x2ee   : > { %v2564_v31 = vpop.f32.mrb[92].mxu0  ;;  %7274 = vrot.lane.b32.xlu0 %v7273_v42, %s7909_s14  ;;  %7269 = vrot.lane.b32.xlu1 %v7268_v21, %s7910_s3  ;;  %v2315_v32 = vpop.f32.mrb[28].mxu1  ;;  %v2725_v1 = vsel %vm644_vm2, %v2722_v18, %v2724_v40 }
 0x2ef   : > { %v9086_v34 = vmax.f32 %v2315_v32, %v2564_v31  ;;  %v2317_v35 = vpop.f32.mrb[29].mxu1  ;;  %v2566_v36 = vpop.f32.mrb[93].mxu0  ;;  %v2858_v17 = vsel %vm2831_vm8, %v2855_v45, %v2857_v61 }
 0x2f0   : > { %v2318_v41 = vpop.f32.mrb[30].mxu1  ;;  %v2567_v52 = vpop.f32.mrb[94].mxu0 }
 0x2f1   : > { %v9090_v55 = vmax.f32 %v2318_v41, %v2567_v52  ;;  %v2320_v53 = vpop.f32.mrb[31].mxu1  ;;  %v2569_v56 = vpop.f32.mrb[95].mxu0  ;;  %v2792_v44 = vrot.slane %v9086_v34, 4  ;;  %v2726_v48 = vrot.slane %v9086_v34, 2  ;;  %v2859_v57 = vrot.slane %v9086_v34, 6 }
 0x2f2   : > { %7279 = vrot.lane.b32.xlu1 %v7278_v6, %s7911_s24 }
 0x2f3   : > { %v2793_v54 = vsel %vm778_vm3, %v2790_v33, %v2792_v44  ;;  %v2727_v59 = vsel %vm644_vm2, %v2724_v40, %v2726_v48  ;;  %v2860_v7 = vsel %vm2831_vm8, %v2857_v61, %v2859_v57  ;;  %v2794_v3 = vrot.slane %v9090_v55, 4 }
 0x2f4   : > { %v7288_v63 = vpack.i.bf16 %v2793_v54, %v2791_v58  ;;  %v7283_v5 = vpack.i.bf16 %v2727_v59, %v2725_v1  ;;  %v2728_v16 = vrot.slane %v9090_v55, 2  ;;  %v7293_v15 = vpack.i.bf16 %v2860_v7, %v2858_v17 }
 0x2f5   : > { %v2795_v31 = vsel %vm778_vm3, %v2792_v44, %v2794_v3  ;;  %v2861_v35 = vrot.slane %v9090_v55, 6 }
 0x2f6   : > { %v2572_v37 = vpop.f32.mrb[96].mxu0  ;;  %7289 = vrot.lane.b32.xlu1 %v7288_v63, %s7909_s14  ;;  %7284 = vrot.lane.b32.xlu0 %v7283_v5, %s7910_s3  ;;  %v2323_v26 = vpop.f32.mrb[32].mxu1  ;;  %v2729_v32 = vsel %vm644_vm2, %v2726_v48, %v2728_v16 }
 0x2f7   : > { %v9105_v9 = vmax.f32 %v2323_v26, %v2572_v37  ;;  %v2325_v10 = vpop.f32.mrb[33].mxu1  ;;  %v2574_v14 = vpop.f32.mrb[97].mxu0  ;;  %v2862_v48 = vsel %vm2831_vm8, %v2859_v57, %v2861_v35 }
 0x2f8   : > { %v2326_v18 = vpop.f32.mrb[34].mxu1  ;;  %v2575_v11 = vpop.f32.mrb[98].mxu0 }
 0x2f9   : > { %v9109_v46 = vmax.f32 %v2326_v18, %v2575_v11  ;;  %v2328_v20 = vpop.f32.mrb[35].mxu1  ;;  %v2577_v0 = vpop.f32.mrb[99].mxu0  ;;  %v2796_v42 = vrot.slane %v9105_v9, 4  ;;  %v2730_v21 = vrot.slane %v9105_v9, 2  ;;  %v2863_v23 = vrot.slane %v9105_v9, 6 }
 0x2fa   : > { %7294 = vrot.lane.b32.xlu0 %v7293_v15, %s7911_s24  ;;  %v7615_v15 = vld [vmem:[%s11024_s4 + $0x104] ss:$8 sps:$4 sm:$0xff]  }
 0x2fb   : > { %v2797_v45 = vsel %vm778_vm3, %v2794_v3, %v2796_v42  ;;  %v2731_v33 = vsel %vm644_vm2, %v2728_v16, %v2730_v21  ;;  %v2864_v40 = vsel %vm2831_vm8, %v2861_v35, %v2863_v23  ;;  %v2798_v6 = vrot.slane %v9109_v46, 4  ;;  %4058 = vmatprep.subr.bf16.mxu1 %v7615_v15 }
 0x2fc   : > { %v7303_v36 = vpack.i.bf16 %v2797_v45, %v2795_v31  ;;  %v7298_v38 = vpack.i.bf16 %v2731_v33, %v2729_v32  ;;  %v2732_v58 = vrot.slane %v9109_v46, 2  ;;  %v7308_v59 = vpack.i.bf16 %v2864_v40, %v2862_v48 }
 0x2fd   : > { %v2799_v3 = vsel %vm778_vm3, %v2796_v42, %v2798_v6  ;;  %v2865_v17 = vrot.slane %v9109_v46, 6 }
 0x2fe   : > { %v2580_v41 = vpop.f32.mrb[100].mxu0  ;;  %7304 = vrot.lane.b32.xlu0 %v7303_v36, %s7909_s14  ;;  %7299 = vrot.lane.b32.xlu1 %v7298_v38, %s7910_s3  ;;  %v2331_v52 = vpop.f32.mrb[36].mxu1  ;;  %v2733_v10 = vsel %vm644_vm2, %v2730_v21, %v2732_v58 }
 0x2ff   : > { %v9124_v53 = vmax.f32 %v2331_v52, %v2580_v41  ;;  %v2333_v56 = vpop.f32.mrb[37].mxu1  ;;  %v2582_v44 = vpop.f32.mrb[101].mxu0  ;;  %v2866_v32 = vsel %vm2831_vm8, %v2863_v23, %v2865_v17 }
 0x300   : > { %v2334_v54 = vpop.f32.mrb[38].mxu1  ;;  %v2583_v1 = vpop.f32.mrb[102].mxu0 }
 0x301   : > { %v9128_v61 = vmax.f32 %v2334_v54, %v2583_v1  ;;  %v2336_v63 = vpop.f32.mrb[39].mxu1  ;;  %v2585_v5 = vpop.f32.mrb[103].mxu0  ;;  %v2800_v7 = vrot.slane %v9124_v53, 4  ;;  %v2734_v37 = vrot.slane %v9124_v53, 2  ;;  %v2867_v26 = vrot.slane %v9124_v53, 6 }
 0x302   : > { %7309 = vrot.lane.b32.xlu1 %v7308_v59, %s7911_s24 }
 0x303   : > { %v2801_v57 = vsel %vm778_vm3, %v2798_v6, %v2800_v7  ;;  %v2735_v14 = vsel %vm644_vm2, %v2732_v58, %v2734_v37  ;;  %v2868_v11 = vsel %vm2831_vm8, %v2865_v17, %v2867_v26  ;;  %v2802_v42 = vrot.slane %v9128_v61, 4 }
 0x304   : > { %v7318_v16 = vpack.i.bf16 %v2801_v57, %v2799_v3  ;;  %v7313_v18 = vpack.i.bf16 %v2735_v14, %v2733_v10  ;;  %v2736_v33 = vrot.slane %v9128_v61, 2  ;;  %v7323_v38 = vpack.i.bf16 %v2868_v11, %v2866_v32 }
 0x305   : > { %v2803_v23 = vsel %vm778_vm3, %v2800_v7, %v2802_v42  ;;  %v2869_v1 = vrot.slane %v9128_v61, 6 }
 0x306   : > { %v2588_v20 = vpop.f32.mrb[104].mxu0  ;;  %7319 = vrot.lane.b32.xlu1 %v7318_v16, %s7909_s14  ;;  %7314 = vrot.lane.b32.xlu0 %v7313_v18, %s7910_s3  ;;  %v2339_v0 = vpop.f32.mrb[40].mxu1  ;;  %v2737_v58 = vsel %vm644_vm2, %v2734_v37, %v2736_v33 }
 0x307   : > { %v9146_v21 = vmax.f32 %v2339_v0, %v2588_v20  ;;  %v2341_v31 = vpop.f32.mrb[41].mxu1  ;;  %v2590_v45 = vpop.f32.mrb[105].mxu0  ;;  %v2870_v17 = vsel %vm2831_vm8, %v2867_v26, %v2869_v1 }
 0x308   : > { %v2342_v35 = vpop.f32.mrb[42].mxu1  ;;  %v2591_v36 = vpop.f32.mrb[106].mxu0 }
 0x309   : > { %v9150_v40 = vmax.f32 %v2342_v35, %v2591_v36  ;;  %v2344_v41 = vpop.f32.mrb[43].mxu1  ;;  %v2593_v52 = vpop.f32.mrb[107].mxu0  ;;  %v2804_v6 = vrot.slane %v9146_v21, 4  ;;  %v2738_v56 = vrot.slane %v9146_v21, 2  ;;  %v2871_v44 = vrot.slane %v9146_v21, 6 }
 0x30a   : > { %7324 = vrot.lane.b32.xlu0 %v7323_v38, %s7911_s24 }
 0x30b   : > { %v2805_v48 = vsel %vm778_vm3, %v2802_v42, %v2804_v6  ;;  %v2739_v54 = vsel %vm644_vm2, %v2736_v33, %v2738_v56  ;;  %v2872_v5 = vsel %vm2831_vm8, %v2869_v1, %v2871_v44  ;;  %v2806_v7 = vrot.slane %v9150_v40, 4 }
 0x30c   : > { %v7333_v59 = vpack.i.bf16 %v2805_v48, %v2803_v23  ;;  %v7328_v63 = vpack.i.bf16 %v2739_v54, %v2737_v58  ;;  %v2740_v16 = vrot.slane %v9150_v40, 2  ;;  %v7338_v15 = vpack.i.bf16 %v2872_v5, %v2870_v17 }
 0x30d   : > { %v2807_v33 = vsel %vm778_vm3, %v2804_v6, %v2806_v7  ;;  %v2873_v38 = vrot.slane %v9150_v40, 6 }
 0x30e   : > { %v2596_v3 = vpop.f32.mrb[108].mxu0  ;;  %7334 = vrot.lane.b32.xlu0 %v7333_v59, %s7909_s14  ;;  %7329 = vrot.lane.b32.xlu1 %v7328_v63, %s7910_s3  ;;  %v2347_v57 = vpop.f32.mrb[44].mxu1  ;;  %v2741_v35 = vsel %vm644_vm2, %v2738_v56, %v2740_v16 }
 0x30f   : > { %v9165_v10 = vmax.f32 %v2347_v57, %v2596_v3  ;;  %v2349_v14 = vpop.f32.mrb[45].mxu1  ;;  %v2598_v37 = vpop.f32.mrb[109].mxu0  ;;  %v2874_v59 = vsel %vm2831_vm8, %v2871_v44, %v2873_v38 }
 0x310   : > { %v2350_v18 = vpop.f32.mrb[46].mxu1  ;;  %v2599_v11 = vpop.f32.mrb[110].mxu0 }
 0x311   : > { %v9169_v20 = vmax.f32 %v2350_v18, %v2599_v11  ;;  %v2352_v0 = vpop.f32.mrb[47].mxu1  ;;  %v2601_v42 = vpop.f32.mrb[111].mxu0  ;;  %v2808_v31 = vrot.slane %v9165_v10, 4  ;;  %v2742_v45 = vrot.slane %v9165_v10, 2  ;;  %v2875_v32 = vrot.slane %v9165_v10, 6 }
 0x312   : > { %7339 = vrot.lane.b32.xlu1 %v7338_v15, %s7911_s24 }
 0x313   : > { %v2809_v26 = vsel %vm778_vm3, %v2806_v7, %v2808_v31  ;;  %v2743_v36 = vsel %vm644_vm2, %v2740_v16, %v2742_v45  ;;  %v2876_v23 = vsel %vm2831_vm8, %v2873_v38, %v2875_v32  ;;  %v2810_v6 = vrot.slane %v9169_v20, 4 }
 0x314   : > { %v7348_v41 = vpack.i.bf16 %v2809_v26, %v2807_v33  ;;  %v7343_v52 = vpack.i.bf16 %v2743_v36, %v2741_v35  ;;  %v2744_v63 = vrot.slane %v9169_v20, 2  ;;  %v7353_v57 = vpack.i.bf16 %v2876_v23, %v2874_v59 }
 0x315   : > { %v2811_v11 = vsel %vm778_vm3, %v2808_v31, %v2810_v6  ;;  %v2877_v42 = vrot.slane %v9169_v20, 6 }
 0x316   : > { %v2604_v48 = vpop.f32.mrb[112].mxu0  ;;  %7349 = vrot.lane.b32.xlu1 %v7348_v41, %s7909_s14  ;;  %7344 = vrot.lane.b32.xlu0 %v7343_v52, %s7910_s3  ;;  %v2355_v58 = vpop.f32.mrb[48].mxu1  ;;  %v2745_v15 = vsel %vm644_vm2, %v2742_v45, %v2744_v63 }
 0x317   : > { %v9184_v54 = vmax.f32 %v2355_v58, %v2604_v48  ;;  %v2357_v1 = vpop.f32.mrb[49].mxu1  ;;  %v2606_v56 = vpop.f32.mrb[113].mxu0  ;;  %v2878_v23 = vsel %vm2831_vm8, %v2875_v32, %v2877_v42 }
 0x318   : > { %v2358_v5 = vpop.f32.mrb[50].mxu1  ;;  %v2607_v3 = vpop.f32.mrb[114].mxu0 }
 0x319   : > { %v9188_v7 = vmax.f32 %v2358_v5, %v2607_v3  ;;  %v2360_v14 = vpop.f32.mrb[51].mxu1  ;;  %v2609_v37 = vpop.f32.mrb[115].mxu0  ;;  %v2812_v17 = vrot.slane %v9184_v54, 4  ;;  %v2746_v16 = vrot.slane %v9184_v54, 2  ;;  %v2879_v18 = vrot.slane %v9184_v54, 6 }
 0x31a   : > { %7354 = vrot.lane.b32.xlu0 %v7353_v57, %s7911_s24 }
 0x31b   : > { %v2813_v44 = vsel %vm778_vm3, %v2810_v6, %v2812_v17  ;;  %v2747_v0 = vsel %vm644_vm2, %v2744_v63, %v2746_v16  ;;  %v2880_v35 = vsel %vm2831_vm8, %v2877_v42, %v2879_v18  ;;  %v2814_v31 = vrot.slane %v9188_v7, 4 }
 0x31c   : > { %v7363_v33 = vpack.i.bf16 %v2813_v44, %v2811_v11  ;;  %v7358_v26 = vpack.i.bf16 %v2747_v0, %v2745_v15  ;;  %v2748_v48 = vrot.slane %v9188_v7, 2  ;;  %v7368_v1 = vpack.i.bf16 %v2880_v35, %v2878_v23 }
 0x31d   : > { %v2815_v14 = vsel %vm778_vm3, %v2812_v17, %v2814_v31  ;;  %v2881_v44 = vrot.slane %v9188_v7, 6 }
 0x31e   : > { %v2612_v36 = vpop.f32.mrb[116].mxu0  ;;  %7364 = vrot.lane.b32.xlu0 %v7363_v33, %s7909_s14  ;;  %7359 = vrot.lane.b32.xlu1 %v7358_v26, %s7910_s3  ;;  %v2363_v38 = vpop.f32.mrb[52].mxu1  ;;  %v2749_v37 = vsel %vm644_vm2, %v2746_v16, %v2748_v48 }
 0x31f   : > { %v9203_v41 = vmax.f32 %v2363_v38, %v2612_v36  ;;  %v2365_v52 = vpop.f32.mrb[53].mxu1  ;;  %v2614_v45 = vpop.f32.mrb[117].mxu0  ;;  %v2882_v38 = vsel %vm2831_vm8, %v2879_v18, %v2881_v44 }
 0x320   : > { %v2366_v58 = vpop.f32.mrb[54].mxu1  ;;  %v2615_v6 = vpop.f32.mrb[118].mxu0 }
 0x321   : > { %v9207_v56 = vmax.f32 %v2366_v58, %v2615_v6  ;;  %v2368_v59 = vpop.f32.mrb[55].mxu1  ;;  %v2617_v63 = vpop.f32.mrb[119].mxu0  ;;  %v2816_v5 = vrot.slane %v9203_v41, 4  ;;  %v2750_v3 = vrot.slane %v9203_v41, 2  ;;  %v2883_v57 = vrot.slane %v9203_v41, 6 }
 0x322   : > { %7369 = vrot.lane.b32.xlu1 %v7368_v1, %s7911_s24 }
 0x323   : > { %v2817_v32 = vsel %vm778_vm3, %v2814_v31, %v2816_v5  ;;  %v2751_v11 = vsel %vm644_vm2, %v2748_v48, %v2750_v3  ;;  %v2884_v42 = vsel %vm2831_vm8, %v2881_v44, %v2883_v57  ;;  %v2818_v17 = vrot.slane %v9207_v56, 4 }
 0x324   : > { %v7378_v15 = vpack.i.bf16 %v2817_v32, %v2815_v14  ;;  %v7373_v0 = vpack.i.bf16 %v2751_v11, %v2749_v37  ;;  %v2752_v31 = vrot.slane %v9207_v56, 2  ;;  %v7383_v23 = vpack.i.bf16 %v2884_v42, %v2882_v38 }
 0x325   : > { %v2819_v14 = vsel %vm778_vm3, %v2816_v5, %v2818_v17  ;;  %v2885_v11 = vrot.slane %v9207_v56, 6 }
 0x326   : > { %v2620_v33 = vpop.f32.mrb[120].mxu0  ;;  %7379 = vrot.lane.b32.xlu1 %v7378_v15, %s7909_s14  ;;  %7374 = vrot.lane.b32.xlu0 %v7373_v0, %s7910_s3  ;;  %v2371_v26 = vpop.f32.mrb[56].mxu1  ;;  %v2753_v32 = vsel %vm644_vm2, %v2750_v3, %v2752_v31 }
 0x327   : > { %v9222_v35 = vmax.f32 %v2371_v26, %v2620_v33  ;;  %v2373_v36 = vpop.f32.mrb[57].mxu1  ;;  %v2622_v16 = vpop.f32.mrb[121].mxu0 }
 0x328   : > { %v2374_v52 = vpop.f32.mrb[58].mxu1  ;;  %v2623_v45 = vpop.f32.mrb[122].mxu0  ;;  %v2886_v36 = vsel %vm2831_vm8, %v2883_v57, %v2885_v11 }
 0x329   : > { %v9226_v48 = vmax.f32 %v2374_v52, %v2623_v45  ;;  %v2376_v58 = vpop.f32.mrb[59].mxu1  ;;  %v2625_v6 = vpop.f32.mrb[123].mxu0  ;;  %v2820_v1 = vrot.slane %v9222_v35, 4  ;;  %v2754_v59 = vrot.slane %v9222_v35, 2  ;;  %v2887_v63 = vrot.slane %v9222_v35, 6 }
 0x32a   : > { %7384 = vrot.lane.b32.xlu0 %v7383_v23, %s7911_s24 }
 0x32b   : > { %v2821_v18 = vsel %vm778_vm3, %v2818_v17, %v2820_v1  ;;  %v2755_v37 = vsel %vm644_vm2, %v2752_v31, %v2754_v59  ;;  %v2888_v0 = vsel %vm2831_vm8, %v2885_v11, %v2887_v63  ;;  %v2822_v5 = vrot.slane %v9226_v48, 4 }
 0x32c   : > { %v7393_v44 = vpack.i.bf16 %v2821_v18, %v2819_v14  ;;  %v7388_v15 = vpack.i.bf16 %v2755_v37, %v2753_v32  ;;  %v2756_v16 = vrot.slane %v9226_v48, 2  ;;  %v7398_v52 = vpack.i.bf16 %v2888_v0, %v2886_v36 }
 0x32d   : > { %v2823_v32 = vsel %vm778_vm3, %v2820_v1, %v2822_v5  ;;  %v2889_v57 = vrot.slane %v9226_v48, 6 }
 0x32e   : > { %v2628_v42 = vpop.f32.mrb[124].mxu0  ;;  %7394 = vrot.lane.b32.xlu0 %v7393_v44, %s7909_s14  ;;  %7389 = vrot.lane.b32.xlu1 %v7388_v15, %s7910_s3  ;;  %v2379_v33 = vpop.f32.mrb[60].mxu1  ;;  %v2757_v11 = vsel %vm644_vm2, %v2754_v59, %v2756_v16 }
 0x32f   : > { %v9241_v26 = vmax.f32 %v2379_v33, %v2628_v42  ;;  %v2381_v17 = vpop.f32.mrb[61].mxu1  ;;  %v2630_v3 = vpop.f32.mrb[125].mxu0  ;;  %v2890_v59 = vsel %vm2831_vm8, %v2887_v63, %v2889_v57 }
 0x330   : > { %v2382_v38 = vpop.f32.mrb[62].mxu1  ;;  %v2631_v31 = vpop.f32.mrb[126].mxu0 }
 0x331   : > { %v9245_v45 = vmax.f32 %v2382_v38, %v2631_v31  ;;  %v2384_v23 = vpop.f32.mrb[63].mxu1  ;;  %v2633_v58 = vpop.f32.mrb[127].mxu0  ;;  %v2824_v6 = vrot.slane %v9241_v26, 4  ;;  %v2758_v14 = vrot.slane %v9241_v26, 2  ;;  %v2891_v18 = vrot.slane %v9241_v26, 6 }
 0x332   : > { %7399 = vrot.lane.b32.xlu1 %v7398_v52, %s7911_s24 }
 0x333   : > { %v2825_v37 = vsel %vm778_vm3, %v2822_v5, %v2824_v6  ;;  %v2759_v44 = vsel %vm644_vm2, %v2756_v16, %v2758_v14  ;;  %v2760_v15 = vrot.slane %v9245_v45, 2  ;;  %v2826_v33 = vrot.slane %v9245_v45, 4 }
 0x334   : > { %v7408_v0 = vpack.i.bf16 %v2825_v37, %v2823_v32  ;;  %v7403_v42 = vpack.i.bf16 %v2759_v44, %v2757_v11  ;;  %v2892_v17 = vsel %vm2831_vm8, %v2889_v57, %v2891_v18  ;;  %v2893_v5 = vrot.slane %v9245_v45, 6 }
 0x335   : > { %v2761_v3 = vsel %vm644_vm2, %v2758_v14, %v2760_v15  ;;  %v2764_v1 = vsel %vm644_vm2, %v2760_v15, %v2699_v47  ;;  %v7413_v38 = vpack.i.bf16 %v2892_v17, %v2890_v59  ;;  %v2827_v52 = vsel %vm778_vm3, %v2824_v6, %v2826_v33  ;;  %v7613_v59 = vld [vmem:[%s11024_s4 + $0x100] ss:$8 sps:$4 sm:$0xff]  }
 0x336   : > { %7409 = vrot.lane.b32.xlu1 %v7408_v0, %s7909_s14  ;;  %7404 = vrot.lane.b32.xlu0 %v7403_v42, %s7910_s3  ;;  %v7418_v31 = vpack.i.bf16 %v2764_v1, %v2761_v3  ;;  %v2830_v58 = vsel %vm778_vm3, %v2826_v33, %v2765_v43  ;;  %v2894_v47 = vsel %vm2831_vm8, %v2891_v18, %v2893_v5 }
 0x337   : > { %v2897_v14 = vsel %vm2831_vm8, %v2893_v5, %v2832_v60  ;;  %v7423_v57 = vpack.i.bf16 %v2830_v58, %v2827_v52  ;;  %v7433_v5 = vpack.i.bf16 %v8964_v27, %v8950_v22 }
 0x338   : > { %v7200_v36 = vpop.permute.xlu1 %7199  ;;  %v7195_v16 = vpop.permute.xlu0 %7194  ;;  %v7428_v11 = vpack.i.bf16 %v2897_v14, %v2894_v47  ;;  %v7443_v47 = vpack.i.bf16 %v9010_v30, %v8995_v12  ;;  %v7616_v14 = vld [vmem:[%s11024_s4 + $0x110] ss:$8 sps:$4 sm:$0xff]  }
 0x339   : > { %v7197_v23 = vunpack.i.h.bf16 %v7195_v16  ;;  %v7202_v32 = vunpack.i.h.bf16 %v7200_v36  ;;  %v7201_v37 = vunpack.i.l.bf16 %v7200_v36  ;;  %v7196_v63 = vunpack.i.l.bf16 %v7195_v16 }
 0x33a   : > { %7414 = vrot.lane.b32.xlu0 %v7413_v38, %s7911_s24  ;;  %7419 = vrot.lane.b32.xlu1 %v7418_v31, %s7910_s3  ;;  %v7438_v16 = vpack.i.bf16 %v8989_v4, %v8970_v50  ;;  %v7618_v38 = vld [vmem:[%s11024_s4 + $0x114] ss:$8 sps:$4 sm:$0xff]  }
 0x33b   : > { %v3287_v43 = vsel %vm3285_vm9, %v8950_v22, %v7197_v23  ;;  %v3319_v44 = vsel %vm2173_vm7, %v7197_v23, %v7202_v32  ;;  %v3286_v15 = vsel %vm3285_vm9, %v8948_v19, %v7196_v63  ;;  %v3318_v0 = vsel %vm2173_vm7, %v7196_v63, %v7201_v37 }
 0x33c   : > { %v9277_v6 = vpop.permute.xlu0 %7204  ;;  %v3469_v36 = vpack.c.bf16 %v3287_v43, %v3286_v15  ;;  %v7448_v63 = vpack.i.bf16 %v9029_v62, %v9014_v39 }
 0x33d   : > { %v7207_v18 = vunpack.i.h.bf16 %v9277_v6  ;;  %v7206_v60 = vunpack.i.l.bf16 %v9277_v6 }
 0x33e   : > { %7424 = vrot.lane.b32.xlu0 %v7423_v57, %s7909_s14  ;;  %7429 = vrot.lane.b32.xlu1 %v7428_v11, %s7911_s24  ;;  %v7621_v57 = vld [vmem:[%s11024_s4 + $0x124] ss:$8 sps:$4 sm:$0xff]   ;;  %s503_s14 = sand.u32 1, %s11193_s20   ;;  %s6553_s24 = sshll.u32 %s8013_s17, 7 }
 0x33f   : > { %v3351_v42 = vsel %vm3350_vm10, %v3318_v0, %v7206_v60  ;;  %v3352_v33 = vsel %vm3350_vm10, %v3319_v44, %v7207_v18  ;;  %s6289_s3 = sshll.u32 %s503_s14, 3  ;;  %s10978_s29 = scalar_lea.hbm %s11195_s16, %s6553_s24 }
 0x340   : > { %v7215_v17 = vpop.permute.xlu0 %7214  ;;  %v7210_v3 = vpop.permute.xlu1 %7209  ;;  %v3470_v1 = vpack.c.bf16 %v3352_v33, %v3351_v42  ;;  %s505_s28 = scalar_lea.vmem [#allocation8], %s6289_s3  ;;  %s7916_s17 = smov [#allocation8]  }
 0x341   : > { %v7217_v31 = vunpack.i.h.bf16 %v7215_v17  ;;  %v7216_v52 = vunpack.i.l.bf16 %v7215_v17  ;;  %v7212_v23 = vunpack.i.h.bf16 %v7210_v3  ;;  %v7211_v58 = vunpack.i.l.bf16 %v7210_v3  ;;  %s6189_s26 = sshll.u32 %s505_s28, 4  ;;  %s7830_s27 = sshll.u32 %s7916_s17, 4  ;;  %s10980_s26 = int_to_ptr.vmem [resolvable:$true] %s6189_s26  ;;  %s7831_s27 = int_to_ptr.vmem [resolvable:$false] %s7830_s27 }
 0x342   : > { %3897 = vmatprep.mubr.bf16.mxu1 %v3470_v1  ;;  %7434 = vrot.lane.b32.xlu0 %v7433_v5, %s7912_s21  ;;  %v7453_v1 = vpack.i.bf16 %v9048_v51, %v9033_v8  ;;  %s7826_s22 = scalar_lea.vmem %s10980_s26, 128  ;;  %p7833_p4 = scmp.lt.s32.totalorder %s10980_s26, %s7831_s27 }
 0x343   : > { %7439 = vrot.lane.b32.xlu1 %v7438_v16, %s7912_s21  ;;  %3898 = vmatmul.mubr.bf16.vlgmr.msra.gmra.mrb[64].mxu1 %v3469_v36  ;;  %v3321_v11 = vsel %vm2173_vm7, %v7212_v23, %v7217_v31  ;;  %v3320_v43 = vsel %vm2173_vm7, %v7211_v58, %v7216_v52  ;;  %v3288_v44 = vsel %vm3285_vm9, %v8964_v27, %v7211_v58  ;;  %v7619_v27 = vld [vmem:[%s11024_s4 + $0x120] ss:$8 sps:$4 sm:$0xff]   ;;  %v7622_v58 = vld [vmem:[%s11024_s4 + $0x130] ss:$8 sps:$4 sm:$0xff]   ;;  %p7827_p12 = scmp.ne.s32.totalorder %s10980_s26, %s7826_s22 }
 0x344   : > { %v9307_v22 = vpop.permute.xlu1 %7219  ;;  %4059 = vmatpush1.bf16.msra.mxu1 %v7613_v59  ;;  %v3289_v15 = vsel %vm3285_vm9, %v8970_v50, %v7212_v23  ;;  %v7458_v50 = vpack.i.bf16 %v9067_v29, %v9052_v28  ;;  %v7624_v59 = vld [vmem:[%s11024_s4 + $0x134] ss:$8 sps:$4 sm:$0xff]   ;;  %v7463_v23 = vpack.i.bf16 %v9086_v34, %v9071_v13 }
 0x345   : > { %v7222_v32 = vunpack.i.h.bf16 %v9307_v22  ;;  %v7221_v37 = vunpack.i.l.bf16 %v9307_v22  ;;  %4060 = vmatprep.subr.bf16.mxu1 %v7618_v38  ;;  %v3473_v5 = vpack.c.bf16 %v3289_v15, %v3288_v44  ;;  %p7828_p2 = pnand %p7827_p12, %p11197_p1 }
 0x346   : > { %7444 = vrot.lane.b32.xlu0 %v7443_v47, %s7912_s21 }
 0x347   : > { %7449 = vrot.lane.b32.xlu1 %v7448_v63, %s7912_s21  ;;  %v3353_v0 = vsel %vm3350_vm10, %v3320_v43, %v7221_v37  ;;  %v3354_v42 = vsel %vm3350_vm10, %v3321_v11, %v7222_v32  ;;  %v7468_v63 = vpack.i.bf16 %v9105_v9, %v9090_v55  ;;  %p7829_p3 = pneg %p7828_p2 }
 0x348   : > { %v7230_v33 = vpop.permute.xlu1 %7229  ;;  %v7225_v17 = vpop.permute.xlu0 %7224  ;;  %v3474_v3 = vpack.c.bf16 %v3354_v42, %v3353_v0  ;;  %4061 = vmatpush1.bf16.msra.mxu1 %v7616_v14 }
 0x349   : > { %4062 = vmatprep.subr.bf16.mxu1 %v7621_v57  ;;  %v7232_v36 = vunpack.i.h.bf16 %v7230_v33  ;;  %v7231_v16 = vunpack.i.l.bf16 %v7230_v33  ;;  %v7227_v38 = vunpack.i.h.bf16 %v7225_v17  ;;  %v7226_v31 = vunpack.i.l.bf16 %v7225_v17  ;;  %v7627_v57 = vld [vmem:[%s11024_s4 + $0x144] ss:$8 sps:$4 sm:$0xff]  }
 0x34a   : > { %3907 = vmatprep.mubr.bf16.mxu1 %v3474_v3  ;;  %7454 = vrot.lane.b32.xlu0 %v7453_v1, %s7912_s21  ;;  %v7473_v1 = vpack.i.bf16 %v9124_v53, %v9109_v46 }
 0x34b   : > { %7459 = vrot.lane.b32.xlu1 %v7458_v50, %s7912_s21  ;;  %3908 = vmatmul.mubr.bf16.gmra.mrb[68].mxu1 %v3473_v5  ;;  %v3323_v11 = vsel %vm2173_vm7, %v7227_v38, %v7232_v36  ;;  %v3322_v43 = vsel %vm2173_vm7, %v7226_v31, %v7231_v16  ;;  %v3290_v44 = vsel %vm3285_vm9, %v8989_v4, %v7226_v31  ;;  %v7625_v4 = vld [vmem:[%s11024_s4 + $0x140] ss:$8 sps:$4 sm:$0xff]   ;;  %v7630_v50 = vld [vmem:[%s11024_s4 + $0x154] ss:$8 sps:$4 sm:$0xff]  }
 0x34c   : > { %v9347_v52 = vpop.permute.xlu0 %7234  ;;  %4063 = vmatpush1.bf16.msra.mxu1 %v7619_v27  ;;  %v3291_v15 = vsel %vm3285_vm9, %v8995_v12, %v7227_v38  ;;  %v7478_v12 = vpack.i.bf16 %v9146_v21, %v9128_v61  ;;  %v7483_v31 = vpack.i.bf16 %v9165_v10, %v9150_v40 }
 0x34d   : > { %v7237_v47 = vunpack.i.h.bf16 %v9347_v52  ;;  %v7236_v14 = vunpack.i.l.bf16 %v9347_v52  ;;  %4064 = vmatprep.subr.bf16.mxu1 %v7624_v59  ;;  %v3477_v27 = vpack.c.bf16 %v3291_v15, %v3290_v44 }
 0x34e   : > { %7464 = vrot.lane.b32.xlu0 %v7463_v23, %s7912_s21  ;;  %v7628_v23 = vld [vmem:[%s11024_s4 + $0x150] ss:$8 sps:$4 sm:$0xff]  }
 0x34f   : > { %7469 = vrot.lane.b32.xlu1 %v7468_v63, %s7912_s21  ;;  %v3355_v0 = vsel %vm3350_vm10, %v3322_v43, %v7236_v14  ;;  %v3356_v42 = vsel %vm3350_vm10, %v3323_v11, %v7237_v47  ;;  %v7633_v11 = vld [vmem:[%s11024_s4 + $0x164] ss:$8 sps:$4 sm:$0xff]  }
 0x350   : > { %v7245_v33 = vpop.permute.xlu0 %7244  ;;  %v7240_v17 = vpop.permute.xlu1 %7239  ;;  %v3478_v3 = vpack.c.bf16 %v3356_v42, %v3355_v0  ;;  %4065 = vmatpush1.bf16.msra.mxu1 %v7622_v58 }
 0x351   : > { %4066 = vmatprep.subr.bf16.mxu1 %v7627_v57  ;;  %v7247_v5 = vunpack.i.h.bf16 %v7245_v33  ;;  %v7246_v59 = vunpack.i.l.bf16 %v7245_v33  ;;  %v7242_v36 = vunpack.i.h.bf16 %v7240_v17  ;;  %v7241_v16 = vunpack.i.l.bf16 %v7240_v17 }
 0x352   : > { %3917 = vmatprep.mubr.bf16.mxu1 %v3478_v3  ;;  %7474 = vrot.lane.b32.xlu0 %v7473_v1, %s7912_s21  ;;  %v7488_v57 = vpack.i.bf16 %v9184_v54, %v9169_v20 }
 0x353   : > { %7479 = vrot.lane.b32.xlu1 %v7478_v12, %s7912_s21  ;;  %3918 = vmatmul.mubr.bf16.gmra.mrb[72].mxu1 %v3477_v27  ;;  %v3325_v43 = vsel %vm2173_vm7, %v7242_v36, %v7247_v5  ;;  %v3324_v44 = vsel %vm2173_vm7, %v7241_v16, %v7246_v59  ;;  %v3292_v15 = vsel %vm3285_vm9, %v9010_v30, %v7241_v16  ;;  %v7631_v30 = vld [vmem:[%s11024_s4 + $0x160] ss:$8 sps:$4 sm:$0xff]   ;;  %v7636_v27 = vld [vmem:[%s11024_s4 + $0x174] ss:$8 sps:$4 sm:$0xff]  }
 0x354   : > { %v9387_v38 = vpop.permute.xlu1 %7249  ;;  %4067 = vmatpush1.bf16.msra.mxu1 %v7625_v4  ;;  %v3293_v0 = vsel %vm3285_vm9, %v9014_v39, %v7242_v36  ;;  %v7493_v4 = vpack.i.bf16 %v9203_v41, %v9188_v7  ;;  %v7498_v39 = vpack.i.bf16 %v9222_v35, %v9207_v56 }
 0x355   : > { %v7252_v58 = vunpack.i.h.bf16 %v9387_v38  ;;  %v7251_v63 = vunpack.i.l.bf16 %v9387_v38  ;;  %4068 = vmatprep.subr.bf16.mxu1 %v7630_v50  ;;  %v3481_v12 = vpack.c.bf16 %v3293_v0, %v3292_v15 }
 0x356   : > { %7484 = vrot.lane.b32.xlu0 %v7483_v31, %s7912_s21  ;;  %v7503_v31 = vpack.i.bf16 %v9241_v26, %v9226_v48 }
 0x357   : > { %7489 = vrot.lane.b32.xlu1 %v7488_v57, %s7912_s21  ;;  %v3357_v42 = vsel %vm3350_vm10, %v3324_v44, %v7251_v63  ;;  %v3358_v33 = vsel %vm3350_vm10, %v3325_v43, %v7252_v58  ;;  %v7508_v43 = vpack.i.bf16 %v8948_v19, %v9245_v45  ;;  %v7639_v44 = vld [vmem:[%s11024_s4 + $0x184] ss:$8 sps:$4 sm:$0xff]  }
 0x358   : > { %v7260_v17 = vpop.permute.xlu1 %7259  ;;  %v7255_v3 = vpop.permute.xlu0 %7254  ;;  %v3482_v1 = vpack.c.bf16 %v3358_v33, %v3357_v42  ;;  %4069 = vmatpush1.bf16.msra.mxu1 %v7628_v23  ;;  %v7634_v23 = vld [vmem:[%s11024_s4 + $0x170] ss:$8 sps:$4 sm:$0xff]  }
 0x359   : > { %4070 = vmatprep.subr.bf16.mxu1 %v7633_v11  ;;  %v7262_v50 = vunpack.i.h.bf16 %v7260_v17  ;;  %v7261_v5 = vunpack.i.l.bf16 %v7260_v17  ;;  %v7257_v59 = vunpack.i.h.bf16 %v7255_v3  ;;  %v7256_v36 = vunpack.i.l.bf16 %v7255_v3 }
 0x35a   : > { %3927 = vmatprep.mubr.bf16.mxu1 %v3482_v1  ;;  %7494 = vrot.lane.b32.xlu0 %v7493_v4, %s7912_s21 }
 0x35b   : > { %7499 = vrot.lane.b32.xlu1 %v7498_v39, %s7912_s21  ;;  %3928 = vmatmul.mubr.bf16.gmra.mrb[76].mxu1 %v3481_v12  ;;  %v3327_v15 = vsel %vm2173_vm7, %v7257_v59, %v7262_v50  ;;  %v3326_v0 = vsel %vm2173_vm7, %v7256_v36, %v7261_v5  ;;  %v3294_v42 = vsel %vm3285_vm9, %v9029_v62, %v7256_v36  ;;  %v7637_v62 = vld [vmem:[%s11024_s4 + $0x180] ss:$8 sps:$4 sm:$0xff]   ;;  %v7640_v36 = vld [vmem:[%s11024_s4 + $0x190] ss:$8 sps:$4 sm:$0xff]  }
 0x35c   : > { %v9427_v16 = vpop.permute.xlu0 %7264  ;;  %4071 = vmatpush1.bf16.msra.mxu1 %v7631_v30  ;;  %v3295_v33 = vsel %vm3285_vm9, %v9033_v8, %v7257_v59  ;;  %v7642_v8 = vld [vmem:[%s11024_s4 + $0x194] ss:$8 sps:$4 sm:$0xff]   ;;  %v3468_v5 = vld [vmem:[%s11024_s4 + $0x1a0] sm:$0x33] }
 0x35d   : > { %v7267_v57 = vunpack.i.h.bf16 %v9427_v16  ;;  %v7266_v11 = vunpack.i.l.bf16 %v9427_v16  ;;  %4072 = vmatprep.subr.bf16.mxu1 %v7636_v27  ;;  %v3485_v30 = vpack.c.bf16 %v3295_v33, %v3294_v42 }
 0x35e   : > { %7504 = vrot.lane.b32.xlu0 %v7503_v31, %s7912_s21 }
 0x35f   : > { %7509 = vrot.lane.b32.xlu1 %v7508_v43, %s7912_s21  ;;  %v3359_v19 = vsel %vm3350_vm10, %v3326_v0, %v7266_v11  ;;  %v3360_v17 = vsel %vm3350_vm10, %v3327_v15, %v7267_v57  ;;  %v6435_v43 = vcombine.high %v3468_v5, %v3468_v5 }
 0x360   : > { %v7275_v3 = vpop.permute.xlu0 %7274  ;;  %v7270_v1 = vpop.permute.xlu1 %7269  ;;  %v3486_v4 = vpack.c.bf16 %v3360_v17, %v3359_v19  ;;  %4073 = vmatpush1.bf16.msra.mxu1 %v7634_v23 }
 0x361   : > { %4074 = vmatprep.subr.bf16.mxu1 %v7639_v44  ;;  %v7277_v39 = vunpack.i.h.bf16 %v7275_v3  ;;  %v7276_v12 = vunpack.i.l.bf16 %v7275_v3  ;;  %v7272_v27 = vunpack.i.h.bf16 %v7270_v1  ;;  %v7271_v50 = vunpack.i.l.bf16 %v7270_v1 }
 0x362   : > { %3937 = vmatprep.mubr.bf16.mxu1 %v3486_v4  ;;  %v6434_v44 = vcombine.low %v3468_v5, %v3468_v5 }
 0x363   : > { %3938 = vmatmul.mubr.bf16.gmra.mrb[80].mxu1 %v3485_v30  ;;  %v3329_v15 = vsel %vm2173_vm7, %v7272_v27, %v7277_v39  ;;  %v3328_v0 = vsel %vm2173_vm7, %v7271_v50, %v7276_v12  ;;  %v3296_v42 = vsel %vm3285_vm9, %v9048_v51, %v7271_v50  ;;  %v3297_v33 = vsel %vm3285_vm9, %v9052_v28, %v7272_v27 }
 0x364   : > { %v9464_v59 = vpop.permute.xlu1 %7279  ;;  %4075 = vmatpush1.bf16.msra.mxu1 %v7637_v62  ;;  %v3489_v62 = vpack.c.bf16 %v3297_v33, %v3296_v42  ;;  %v3860_v51 = vsel %vm2831_vm8, %v6434_v44, 0 }
 0x365   : > { %v7282_v31 = vunpack.i.h.bf16 %v9464_v59  ;;  %v7281_v23 = vunpack.i.l.bf16 %v9464_v59  ;;  %4076 = vmatprep.subr.bf16.mxu1 %v7642_v8 }
 0x367   : > { %v3361_v19 = vsel %vm3350_vm10, %v3328_v0, %v7281_v23  ;;  %v3362_v17 = vsel %vm3350_vm10, %v3329_v15, %v7282_v31 }
 0x368   : > { %v7290_v3 = vpop.permute.xlu1 %7289  ;;  %v7285_v1 = vpop.permute.xlu0 %7284  ;;  %v3490_v4 = vpack.c.bf16 %v3362_v17, %v3361_v19  ;;  %4077 = vmatpush1.bf16.msra.mxu1 %v7640_v36 }
 0x369   : > { %6436 = vmatprep.subr.msk.bf16.mxu1 %vm2831_vm8, %v6435_v43  ;;  %v7292_v30 = vunpack.i.h.bf16 %v7290_v3  ;;  %v7291_v8 = vunpack.i.l.bf16 %v7290_v3  ;;  %v7287_v28 = vunpack.i.h.bf16 %v7285_v1  ;;  %v7286_v39 = vunpack.i.l.bf16 %v7285_v1 }
 0x36a   : > { %3947 = vmatprep.mubr.bf16.mxu1 %v3490_v4 }
 0x36b   : > { %3948 = vmatmul.mubr.bf16.gmra.mrb[84].mxu1 %v3489_v62  ;;  %v3331_v5 = vsel %vm2173_vm7, %v7287_v28, %v7292_v30  ;;  %v3330_v36 = vsel %vm2173_vm7, %v7286_v39, %v7291_v8  ;;  %v3298_v43 = vsel %vm3285_vm9, %v9067_v29, %v7286_v39  ;;  %v3299_v44 = vsel %vm3285_vm9, %v9071_v13, %v7287_v28 }
 0x36c   : > { %v9485_v12 = vpop.permute.xlu0 %7294  ;;  %4079 = vmatpush1.bf16.msra.mxu1 %v3860_v51  ;;  %v3493_v17 = vpack.c.bf16 %v3299_v44, %v3298_v43 }
 0x36d   : > { %v7297_v27 = vunpack.i.h.bf16 %v9485_v12  ;;  %v7296_v50 = vunpack.i.l.bf16 %v9485_v12 }
 0x36f   : > { %v3363_v15 = vsel %vm3350_vm10, %v3330_v36, %v7296_v50  ;;  %v3364_v0 = vsel %vm3350_vm10, %v3331_v5, %v7297_v27 }
 0x370   : > { %v7305_v42 = vpop.permute.xlu0 %7304  ;;  %v7300_v33 = vpop.permute.xlu1 %7299  ;;  %v3494_v19 = vpack.c.bf16 %v3364_v0, %v3363_v15 }
 0x371   : > { %v7307_v3 = vunpack.i.h.bf16 %v7305_v42  ;;  %v7306_v1 = vunpack.i.l.bf16 %v7305_v42  ;;  %v7302_v4 = vunpack.i.h.bf16 %v7300_v33  ;;  %v7301_v62 = vunpack.i.l.bf16 %v7300_v33 }
 0x372   : > { %3957 = vmatprep.mubr.bf16.mxu1 %v3494_v19 }
 0x373   : > { %3958 = vmatmul.mubr.bf16.gmra.mrb[88].mxu1 %v3493_v17  ;;  %v3333_v30 = vsel %vm2173_vm7, %v7302_v4, %v7307_v3  ;;  %v3332_v8 = vsel %vm2173_vm7, %v7301_v62, %v7306_v1  ;;  %v3300_v28 = vsel %vm3285_vm9, %v9086_v34, %v7301_v62  ;;  %v3301_v39 = vsel %vm3285_vm9, %v9090_v55, %v7302_v4 }
 0x374   : > { %v9501_v29 = vpop.permute.xlu1 %7309  ;;  %v3497_v0 = vpack.c.bf16 %v3301_v39, %v3300_v28 }
 0x375   : > { %v7312_v13 = vunpack.i.h.bf16 %v9501_v29  ;;  %v7311_v51 = vunpack.i.l.bf16 %v9501_v29 }
 0x377   : > { %v3365_v5 = vsel %vm3350_vm10, %v3332_v8, %v7311_v51  ;;  %v3366_v36 = vsel %vm3350_vm10, %v3333_v30, %v7312_v13 }
 0x378   : > { %v7320_v43 = vpop.permute.xlu1 %7319  ;;  %v7315_v44 = vpop.permute.xlu0 %7314  ;;  %v3498_v15 = vpack.c.bf16 %v3366_v36, %v3365_v5 }
 0x379   : > { %v7322_v42 = vunpack.i.h.bf16 %v7320_v43  ;;  %v7321_v33 = vunpack.i.l.bf16 %v7320_v43  ;;  %v7317_v19 = vunpack.i.h.bf16 %v7315_v44  ;;  %v7316_v17 = vunpack.i.l.bf16 %v7315_v44 }
 0x37a   : > { %3967 = vmatprep.mubr.bf16.mxu1 %v3498_v15 }
 0x37b   : > { %3968 = vmatmul.mubr.bf16.gmra.mrb[92].mxu1 %v3497_v0  ;;  %v3335_v1 = vsel %vm2173_vm7, %v7317_v19, %v7322_v42  ;;  %v3334_v4 = vsel %vm2173_vm7, %v7316_v17, %v7321_v33  ;;  %v3302_v62 = vsel %vm3285_vm9, %v9105_v9, %v7316_v17  ;;  %v3303_v30 = vsel %vm3285_vm9, %v9109_v46, %v7317_v19 }
 0x37c   : > { %v9517_v34 = vpop.permute.xlu0 %7324  ;;  %v3501_v43 = vpack.c.bf16 %v3303_v30, %v3302_v62 }
 0x37d   : > { %v11054_v55 = vunpack.i.h.bf16 %v9517_v34  ;;  %v11055_v3 = vunpack.i.l.bf16 %v9517_v34 }
 0x37f   : > { %v3367_v8 = vsel %vm3350_vm10, %v3334_v4, %v11055_v3  ;;  %v3368_v28 = vsel %vm3350_vm10, %v3335_v1, %v11054_v55 }
 0x380   : > { %v7335_v39 = vpop.permute.xlu0 %7334  ;;  %v7330_v5 = vpop.permute.xlu1 %7329  ;;  %v3502_v36 = vpack.c.bf16 %v3368_v28, %v3367_v8 }
 0x381   : > { %v7337_v44 = vunpack.i.h.bf16 %v7335_v39  ;;  %v7336_v15 = vunpack.i.l.bf16 %v7335_v39  ;;  %v7332_v0 = vunpack.i.h.bf16 %v7330_v5  ;;  %v7331_v42 = vunpack.i.l.bf16 %v7330_v5 }
 0x382   : > { %3977 = vmatprep.mubr.bf16.mxu1 %v3502_v36 }
 0x383   : > { %3978 = vmatmul.mubr.bf16.gmra.mrb[96].mxu1 %v3501_v43  ;;  %v3337_v19 = vsel %vm2173_vm7, %v7332_v0, %v7337_v44  ;;  %v3336_v17 = vsel %vm2173_vm7, %v7331_v42, %v7336_v15  ;;  %v3304_v1 = vsel %vm3285_vm9, %v9124_v53, %v7331_v42  ;;  %v3305_v4 = vsel %vm3285_vm9, %v9128_v61, %v7332_v0 }
 0x384   : > { %v9533_v9 = vpop.permute.xlu1 %7339  ;;  %v3505_v5 = vpack.c.bf16 %v3305_v4, %v3304_v1 }
 0x385   : > { %v11052_v46 = vunpack.i.h.bf16 %v9533_v9  ;;  %v11053_v33 = vunpack.i.l.bf16 %v9533_v9 }
 0x387   : > { %v3369_v62 = vsel %vm3350_vm10, %v3336_v17, %v11053_v33  ;;  %v3370_v30 = vsel %vm3350_vm10, %v3337_v19, %v11052_v46 }
 0x388   : > { %v7350_v8 = vpop.permute.xlu1 %7349  ;;  %v7345_v28 = vpop.permute.xlu0 %7344  ;;  %v3506_v39 = vpack.c.bf16 %v3370_v30, %v3369_v62 }
 0x389   : > { %v7352_v36 = vunpack.i.h.bf16 %v7350_v8  ;;  %v7351_v43 = vunpack.i.l.bf16 %v7350_v8  ;;  %v7347_v44 = vunpack.i.h.bf16 %v7345_v28  ;;  %v7346_v15 = vunpack.i.l.bf16 %v7345_v28 }
 0x38a   : > { %3987 = vmatprep.mubr.bf16.mxu1 %v3506_v39 }
 0x38b   : > { %3988 = vmatmul.mubr.bf16.gmra.mrb[100].mxu1 %v3505_v5  ;;  %v3339_v42 = vsel %vm2173_vm7, %v7347_v44, %v7352_v36  ;;  %v3338_v19 = vsel %vm2173_vm7, %v7346_v15, %v7351_v43  ;;  %v3306_v17 = vsel %vm3285_vm9, %v9146_v21, %v7346_v15  ;;  %v3307_v1 = vsel %vm3285_vm9, %v9150_v40, %v7347_v44 }
 0x38c   : > { %v9549_v53 = vpop.permute.xlu0 %7354  ;;  %v3509_v39 = vpack.c.bf16 %v3307_v1, %v3306_v17 }
 0x38d   : > { %v7357_v61 = vunpack.i.h.bf16 %v9549_v53  ;;  %v7356_v0 = vunpack.i.l.bf16 %v9549_v53 }
 0x38f   : > { %v3371_v4 = vsel %vm3350_vm10, %v3338_v19, %v7356_v0  ;;  %v3372_v62 = vsel %vm3350_vm10, %v3339_v42, %v7357_v61 }
 0x390   : > { %v7365_v30 = vpop.permute.xlu0 %7364  ;;  %v7360_v8 = vpop.permute.xlu1 %7359  ;;  %v3510_v28 = vpack.c.bf16 %v3372_v62, %v3371_v4 }
 0x391   : > { %v7367_v5 = vunpack.i.h.bf16 %v7365_v30  ;;  %v7366_v36 = vunpack.i.l.bf16 %v7365_v30  ;;  %v7362_v43 = vunpack.i.h.bf16 %v7360_v8  ;;  %v7361_v25 = vunpack.i.l.bf16 %v7360_v8 }
 0x392   : > { %3997 = vmatprep.mubr.bf16.mxu1 %v3510_v28 }
 0x393   : > { %3998 = vmatmul.mubr.bf16.gmra.mrb[104].mxu1 %v3509_v39  ;;  %v3341_v15 = vsel %vm2173_vm7, %v7362_v43, %v7367_v5  ;;  %v3340_v42 = vsel %vm2173_vm7, %v7361_v25, %v7366_v36  ;;  %v3308_v19 = vsel %vm3285_vm9, %v9165_v10, %v7361_v25  ;;  %v3309_v17 = vsel %vm3285_vm9, %v9169_v20, %v7362_v43 }
 0x394   : > { %v9565_v21 = vpop.permute.xlu1 %7369  ;;  %v3513_v28 = vpack.c.bf16 %v3309_v17, %v3308_v19 }
 0x395   : > { %v7372_v40 = vunpack.i.h.bf16 %v9565_v21  ;;  %v7371_v44 = vunpack.i.l.bf16 %v9565_v21 }
 0x397   : > { %v3373_v1 = vsel %vm3350_vm10, %v3340_v42, %v7371_v44  ;;  %v3374_v4 = vsel %vm3350_vm10, %v3341_v15, %v7372_v40 }
 0x398   : > { %v7380_v62 = vpop.permute.xlu1 %7379  ;;  %v7375_v30 = vpop.permute.xlu0 %7374  ;;  %v3514_v8 = vpack.c.bf16 %v3374_v4, %v3373_v1 }
 0x399   : > { %v7382_v39 = vunpack.i.h.bf16 %v7380_v62  ;;  %v7381_v5 = vunpack.i.l.bf16 %v7380_v62  ;;  %v7377_v36 = vunpack.i.h.bf16 %v7375_v30  ;;  %v7376_v24 = vunpack.i.l.bf16 %v7375_v30 }
 0x39a   : > { %4007 = vmatprep.mubr.bf16.mxu1 %v3514_v8 }
 0x39b   : > { %4008 = vmatmul.mubr.bf16.gmra.mrb[108].mxu1 %v3513_v28  ;;  %v3343_v43 = vsel %vm2173_vm7, %v7377_v36, %v7382_v39  ;;  %v3342_v15 = vsel %vm2173_vm7, %v7376_v24, %v7381_v5  ;;  %v3310_v42 = vsel %vm3285_vm9, %v9184_v54, %v7376_v24  ;;  %v3311_v19 = vsel %vm3285_vm9, %v9188_v7, %v7377_v36 }
 0x39c   : > { %v9581_v25 = vpop.permute.xlu0 %7384  ;;  %v3517_v8 = vpack.c.bf16 %v3311_v19, %v3310_v42 }
 0x39d   : > { %v7387_v10 = vunpack.i.h.bf16 %v9581_v25  ;;  %v7386_v20 = vunpack.i.l.bf16 %v9581_v25 }
 0x39f   : > { %v3375_v17 = vsel %vm3350_vm10, %v3342_v15, %v7386_v20  ;;  %v3376_v1 = vsel %vm3350_vm10, %v3343_v43, %v7387_v10 }
 0x3a0   : > { %v7395_v4 = vpop.permute.xlu0 %7394  ;;  %v7390_v62 = vpop.permute.xlu1 %7389  ;;  %v3518_v30 = vpack.c.bf16 %v3376_v1, %v3375_v17 }
 0x3a1   : > { %v7397_v28 = vunpack.i.h.bf16 %v7395_v4  ;;  %v7396_v39 = vunpack.i.l.bf16 %v7395_v4  ;;  %v7392_v5 = vunpack.i.h.bf16 %v7390_v62  ;;  %v7391_v46 = vunpack.i.l.bf16 %v7390_v62 }
 0x3a2   : > { %4017 = vmatprep.mubr.bf16.mxu1 %v3518_v30 }
 0x3a3   : > { %4018 = vmatmul.mubr.bf16.gmra.mrb[112].mxu1 %v3517_v8  ;;  %v3345_v36 = vsel %vm2173_vm7, %v7392_v5, %v7397_v28  ;;  %v3344_v43 = vsel %vm2173_vm7, %v7391_v46, %v7396_v39  ;;  %v3312_v15 = vsel %vm3285_vm9, %v9203_v41, %v7391_v46  ;;  %v3313_v42 = vsel %vm3285_vm9, %v9207_v56, %v7392_v5 }
 0x3a4   : > { %v9597_v24 = vpop.permute.xlu1 %7399  ;;  %v3521_v28 = vpack.c.bf16 %v3313_v42, %v3312_v15 }
 0x3a5   : > { %v7402_v54 = vunpack.i.h.bf16 %v9597_v24  ;;  %v7401_v7 = vunpack.i.l.bf16 %v9597_v24 }
 0x3a7   : > { %v3377_v19 = vsel %vm3350_vm10, %v3344_v43, %v7401_v7  ;;  %v3378_v17 = vsel %vm3350_vm10, %v3345_v36, %v7402_v54 }
 0x3a8   : > { %v7410_v1 = vpop.permute.xlu1 %7409  ;;  %v7405_v4 = vpop.permute.xlu0 %7404  ;;  %v3522_v62 = vpack.c.bf16 %v3378_v17, %v3377_v19 }
 0x3a9   : > { %v7407_v30 = vunpack.i.h.bf16 %v7405_v4  ;;  %v7406_v8 = vunpack.i.l.bf16 %v7405_v4  ;;  %v7412_v39 = vunpack.i.h.bf16 %v7410_v1  ;;  %v7411_v33 = vunpack.i.l.bf16 %v7410_v1 }
 0x3aa   : > { %4027 = vmatprep.mubr.bf16.mxu1 %v3522_v62 }
 0x3ab   : > { %4028 = vmatmul.mubr.bf16.gmra.mrb[116].mxu1 %v3521_v28  ;;  %v3314_v36 = vsel %vm3285_vm9, %v9222_v35, %v7406_v8  ;;  %v3315_v43 = vsel %vm3285_vm9, %v9226_v48, %v7407_v30  ;;  %v3347_v19 = vsel %vm2173_vm7, %v7407_v30, %v7412_v39  ;;  %v3346_v15 = vsel %vm2173_vm7, %v7406_v8, %v7411_v33 }
 0x3ac   : > { %v9613_v41 = vpop.permute.xlu0 %7414  ;;  %v7420_v56 = vpop.permute.xlu1 %7419  ;;  %v3525_v55 = vpack.c.bf16 %v3315_v43, %v3314_v36 }
 0x3ad   : > { %v7417_v46 = vunpack.i.h.bf16 %v9613_v41  ;;  %v7416_v5 = vunpack.i.l.bf16 %v9613_v41  ;;  %v7422_v1 = vunpack.i.h.bf16 %v7420_v56  ;;  %v7421_v4 = vunpack.i.l.bf16 %v7420_v56 }
 0x3af   : > { %v3379_v42 = vsel %vm3350_vm10, %v3346_v15, %v7416_v5  ;;  %v3380_v17 = vsel %vm3350_vm10, %v3347_v19, %v7417_v46 }
 0x3b0   : > { %v7425_v62 = vpop.permute.xlu0 %7424  ;;  %v9629_v28 = vpop.permute.xlu1 %7429  ;;  %v3526_v35 = vpack.c.bf16 %v3380_v17, %v3379_v42 }
 0x3b1   : > { %v7427_v48 = vunpack.i.h.bf16 %v7425_v62  ;;  %v7426_v3 = vunpack.i.l.bf16 %v7425_v62  ;;  %v7432_v30 = vunpack.i.h.bf16 %v9629_v28  ;;  %v7431_v33 = vunpack.i.l.bf16 %v9629_v28 }
 0x3b2   : > { %4037 = vmatprep.mubr.bf16.mxu1 %v3526_v35  ;;  %v3316_v62 = vsel %vm3285_vm9, %v9241_v26, %v7421_v4  ;;  %v7646_v26 = vld [vmem:[#allocation7 + $0x8] sm:$0xff]  }
 0x3b3   : > { %v3348_v8 = vsel %vm2173_vm7, %v7421_v4, %v7426_v3  ;;  %v3349_v39 = vsel %vm2173_vm7, %v7422_v1, %v7427_v48  ;;  %4038 = vmatmul.mubr.bf16.gmra.mrb[120].mxu1 %v3525_v55  ;;  %v3317_v3 = vsel %vm3285_vm9, %v9245_v45, %v7422_v1 }
 0x3b4   : > { %v7435_v19 = vpop.permute.xlu0 %7434  ;;  %v3381_v56 = vsel %vm3350_vm10, %v3348_v8, %v7431_v33  ;;  %v3382_v36 = vsel %vm3350_vm10, %v3349_v39, %v7432_v30  ;;  %v3529_v48 = vpack.c.bf16 %v3317_v3, %v3316_v62  ;;  %v7645_v39 = vld [vmem:[#allocation7] sm:$0xff]  }
 0x3b5   : > { %v7440_v43 = vpop.permute.xlu1 %7439  ;;  %v3530_v15 = vpack.c.bf16 %v3382_v36, %v3381_v56  ;;  %v7437_v42 = vunpack.i.h.bf16 %v7435_v19  ;;  %v7436_v17 = vunpack.i.l.bf16 %v7435_v19  ;;  %4798 = vmatpush1.bf16.msra.mxu0 %v7645_v39 }
 0x3b6   : > { %v7442_v4 = vunpack.i.h.bf16 %v7440_v43  ;;  %v7441_v36 = vunpack.i.l.bf16 %v7440_v43  ;;  %4799 = vmatprep.subr.bf16.mxu0 %v11057_v49 }
 0x3b7   : > { %4047 = vmatprep.mubr.bf16.mxu1 %v3530_v15  ;;  %v3472_v8 = vpack.c.bf16 %v7437_v42, %v7436_v17  ;;  %v3385_v45 = vsel %vm3383_vm12, %v7207_v18, %v7437_v42  ;;  %v3384_v1 = vsel %vm3383_vm12, %v7206_v60, %v7436_v17  ;;  %v7648_v60 = vld [vmem:[#allocation7 + $0x18] sm:$0xff]  }
 0x3b8   : > { %v9645_v55 = vpop.permute.xlu0 %7444  ;;  %v3471_v62 = vpack.c.bf16 %v3385_v45, %v3384_v1  ;;  %v3386_v17 = vsel %vm3383_vm12, %v7221_v37, %v7441_v36  ;;  %v3387_v39 = vsel %vm3383_vm12, %v7222_v32, %v7442_v4 }
 0x3b9   : > { %v9647_v35 = vpop.permute.xlu1 %7449  ;;  %4800 = vmatpush1.bf16.msra.mxu0 %v7646_v26  ;;  %v7447_v43 = vunpack.i.h.bf16 %v9645_v55  ;;  %v7446_v42 = vunpack.i.l.bf16 %v9645_v55  ;;  %v7649_v55 = vld [vmem:[#allocation7 + $0x20] sm:$0xff]  }
 0x3ba   : > { %4801 = vmatprep.subr.bf16.mxu0 %v11057_v49 }
 0x3bb   : > { %4048 = vmatmul.mubr.bf16.gmra.mrb[124].mxu1 %v3529_v48  ;;  %v7647_v48 = vld [vmem:[#allocation7 + $0x10] sm:$0xff]   ;;  %v3388_v21 = vsel %vm3383_vm12, %v7236_v14, %v7446_v42 }
 0x3bc   : > { %v9649_v56 = vpop.permute.xlu0 %7454  ;;  %6437 = vmatprep.mubr.msk.bf16.mxu1 %vm3810_vm11, %v3472_v8  ;;  %v3476_v8 = vpack.c.bf16 %v7442_v4, %v7441_v36  ;;  %v7452_v36 = vunpack.i.h.bf16 %v9647_v35 }
 0x3bd   : > { %v9652_v19 = vpop.permute.xlu1 %7459  ;;  %4802 = vmatpush1.bf16.msra.mxu0 %v7647_v48  ;;  %v3475_v48 = vpack.c.bf16 %v3387_v39, %v3386_v17 }
 0x3be   : > { %4803 = vmatprep.subr.bf16.mxu0 %v11057_v49 }
 0x3c0   : > { %v9661_v15 = vpop.permute.xlu0 %7464 }
 0x3c1   : > { %v9663_v3 = vpop.permute.xlu1 %7469  ;;  %4804 = vmatpush1.bf16.msra.mxu0 %v7648_v60 }
 0x3c2   : > { %4805 = vmatprep.subr.bf16.mxu0 %v11057_v49 }
 0x3c3   : > { %4091 = vmatmul.mubr.bf16.vlgmr.msra.gmra.mrb[64].mxu1 %v3471_v62 }
 0x3c4   : > { %v9666_v18 = vpop.permute.xlu0 %7474  ;;  %6438 = vmatprep.mubr.msk.bf16.mxu1 %vm3810_vm11, %v3476_v8  ;;  %v3480_v8 = vpack.c.bf16 %v7447_v43, %v7446_v42 }
 0x3c5   : > { %v9669_v6 = vpop.permute.xlu1 %7479  ;;  %4806 = vmatpush1.bf16.msra.mxu0 %v7649_v55 }
 0x3c6   : > { %4807 = vmatprep.subr.bf16.mxu0 %v11057_v49 }
 0x3c8   : > { %v9680_v26 = vpop.permute.xlu0 %7484 }
 0x3c9   : > { %v7487_v45 = vunpack.i.h.bf16 %v9680_v26  ;;  %v7486_v1 = vunpack.i.l.bf16 %v9680_v26  ;;  %v9684_v62 = vpop.permute.xlu1 %7489 }
 0x3ca   : > { %v7492_v37 = vunpack.i.h.bf16 %v9684_v62  ;;  %v11056_v22 = vunpack.i.l.bf16 %v9684_v62 }
 0x3cb   : > { %4101 = vmatmul.mubr.bf16.gmra.mrb[68].mxu1 %v3475_v48  ;;  %v9694_v32 = vsel %vm3383_vm12, %v7356_v0, %v7486_v1  ;;  %v9701_v4 = vsel %vm3383_vm12, %v7357_v61, %v7487_v45  ;;  %v7451_v61 = vunpack.i.l.bf16 %v9647_v35 }
 0x3cc   : > { %v9704_v60 = vpop.permute.xlu0 %7494  ;;  %6439 = vmatprep.mubr.msk.bf16.mxu1 %vm3810_vm11, %v3480_v8  ;;  %v9714_v0 = vsel %vm3383_vm12, %v7371_v44, %v11056_v22  ;;  %v9721_v53 = vsel %vm3383_vm12, %v7372_v40, %v7492_v37  ;;  %v3389_v40 = vsel %vm3383_vm12, %v7237_v47, %v7447_v43 }
 0x3cd   : > { %v7497_v39 = vunpack.i.h.bf16 %v9704_v60  ;;  %v7496_v48 = vunpack.i.l.bf16 %v9704_v60  ;;  %v9726_v8 = vpop.permute.xlu1 %7499  ;;  %v3515_v17 = vpack.c.bf16 %v9721_v53, %v9714_v0  ;;  %v3479_v42 = vpack.c.bf16 %v3389_v40, %v3388_v21  ;;  %v7653_v60 = vld [vmem:[#allocation7 + $0x40] sm:$0xff]  }
 0x3ce   : > { %v7502_v44 = vunpack.i.h.bf16 %v9726_v8  ;;  %v11059_v22 = vunpack.i.l.bf16 %v9726_v8  ;;  %v3484_v49 = vpack.c.bf16 %v7452_v36, %v7451_v61 }
 0x3cf   : > { %v9744_v35 = vsel %vm3383_vm12, %v7386_v20, %v7496_v48  ;;  %v9751_v55 = vsel %vm3383_vm12, %v7387_v10, %v7497_v39  ;;  %v3520_v26 = vpack.c.bf16 %v7497_v39, %v7496_v48 }
 0x3d0   : > { %v9753_v14 = vpop.permute.xlu0 %7504  ;;  %v9762_v47 = vsel %vm3383_vm12, %v7401_v7, %v11059_v22  ;;  %v9769_v25 = vsel %vm3383_vm12, %v7402_v54, %v7502_v44 }
 0x3d1   : > { %v7507_v10 = vunpack.i.h.bf16 %v9753_v14  ;;  %v7506_v20 = vunpack.i.l.bf16 %v9753_v14  ;;  %v9773_v43 = vpop.permute.xlu1 %7509  ;;  %v3523_v52 = vpack.c.bf16 %v9769_v25, %v9762_v47 }
 0x3d2   : > { %v7512_v7 = vunpack.i.h.bf16 %v9773_v43  ;;  %v7511_v22 = vunpack.i.l.bf16 %v9773_v43 }
 0x3d3   : > { %4111 = vmatmul.mubr.bf16.gmra.mrb[72].mxu1 %v3479_v42  ;;  %v9784_v24 = vsel %vm3383_vm12, %v7416_v5, %v7506_v20  ;;  %v9791_v54 = vsel %vm3383_vm12, %v7417_v46, %v7507_v10  ;;  %v7457_v46 = vunpack.i.h.bf16 %v9649_v56  ;;  %v7456_v5 = vunpack.i.l.bf16 %v9649_v56 }
 0x3d4   : > { %6440 = vmatprep.mubr.msk.bf16.mxu1 %vm3810_vm11, %v3484_v49  ;;  %v9801_v40 = vsel %vm3383_vm12, %v7431_v33, %v7511_v22  ;;  %v9808_v41 = vsel %vm3383_vm12, %v7432_v30, %v7512_v7  ;;  %v3390_v42 = vsel %vm3383_vm12, %v7251_v63, %v7451_v61  ;;  %v3391_v33 = vsel %vm3383_vm12, %v7252_v58, %v7452_v36 }
 0x3d5   : > { %v3483_v21 = vpack.c.bf16 %v3391_v33, %v3390_v42  ;;  %v3488_v28 = vpack.c.bf16 %v7457_v46, %v7456_v5  ;;  %v7462_v30 = vunpack.i.h.bf16 %v9652_v19  ;;  %v7461_v49 = vunpack.i.l.bf16 %v9652_v19 }
 0x3d6   : > { %v3392_v56 = vsel %vm3383_vm12, %v7266_v11, %v7456_v5  ;;  %v3393_v63 = vsel %vm3383_vm12, %v7267_v57, %v7457_v46  ;;  %v7467_v58 = vunpack.i.h.bf16 %v9661_v15  ;;  %v7466_v36 = vunpack.i.l.bf16 %v9661_v15 }
 0x3d7   : > { %v3487_v38 = vpack.c.bf16 %v3393_v63, %v3392_v56  ;;  %v3492_v61 = vpack.c.bf16 %v7462_v30, %v7461_v49  ;;  %v3394_v19 = vsel %vm3383_vm12, %v7281_v23, %v7461_v49  ;;  %v3395_v11 = vsel %vm3383_vm12, %v7282_v31, %v7462_v30 }
 0x3d8   : > { %v3491_v16 = vpack.c.bf16 %v3395_v11, %v3394_v19  ;;  %v7472_v57 = vunpack.i.h.bf16 %v9663_v3  ;;  %v7471_v46 = vunpack.i.l.bf16 %v9663_v3  ;;  %v3396_v15 = vsel %vm3383_vm12, %v7296_v50, %v7466_v36 }
 0x3d9   : > { %v3397_v23 = vsel %vm3383_vm12, %v7297_v27, %v7467_v58  ;;  %v7477_v31 = vunpack.i.h.bf16 %v9666_v18  ;;  %v7476_v5 = vunpack.i.l.bf16 %v9666_v18  ;;  %v7482_v27 = vunpack.i.h.bf16 %v9669_v6 }
 0x3da   : > { %v3495_v59 = vpack.c.bf16 %v3397_v23, %v3396_v15  ;;  %v3500_v49 = vpack.c.bf16 %v7472_v57, %v7471_v46  ;;  %v3398_v3 = vsel %vm3383_vm12, %v7311_v51, %v7471_v46  ;;  %v3399_v50 = vsel %vm3383_vm12, %v7312_v13, %v7472_v57 }
 0x3db   : > { %4121 = vmatmul.mubr.bf16.gmra.mrb[76].mxu1 %v3483_v21  ;;  %v3496_v21 = vpack.c.bf16 %v7467_v58, %v7466_v36  ;;  %v3499_v12 = vpack.c.bf16 %v3399_v50, %v3398_v3  ;;  %v3504_v42 = vpack.c.bf16 %v7477_v31, %v7476_v5  ;;  %v7481_v33 = vunpack.i.l.bf16 %v9669_v6 }
 0x3dc   : > { %6441 = vmatprep.mubr.msk.bf16.mxu1 %vm3810_vm11, %v3488_v28  ;;  %v11103_v28 = vunpack.i.l.bf16 %v9517_v34  ;;  %v11104_v30 = vunpack.i.h.bf16 %v9517_v34  ;;  %v11105_v13 = vunpack.i.l.bf16 %v9533_v9  ;;  %v3512_v34 = vpack.c.bf16 %v7487_v45, %v7486_v1  ;;  %v7651_v1 = vld [vmem:[#allocation7 + $0x30] sm:$0xff]  }
 0x3dd   : > { %v3508_v56 = vpack.c.bf16 %v7482_v27, %v7481_v33  ;;  %v11107_v58 = vunpack.i.l.bf16 %v9684_v62  ;;  %v11108_v19 = vpack.c.bf16 %v9701_v4, %v9694_v32  ;;  %v11109_v45 = vmov 0   ;;  %v7652_v62 = vld [vmem:[#allocation7 + $0x38] sm:$0xff]  }
 0x3de   : > { %v3400_v18 = vsel %vm3383_vm12, %v11103_v28, %v7476_v5  ;;  %v3401_v51 = vsel %vm3383_vm12, %v11104_v30, %v7477_v31  ;;  %v3402_v63 = vsel %vm3383_vm12, %v11105_v13, %v7481_v33  ;;  %v11111_v4 = vpack.c.bf16 %v9751_v55, %v9744_v35 }
 0x3df   : > { %v3503_v29 = vpack.c.bf16 %v3401_v51, %v3400_v18  ;;  %v3516_v36 = vpack.c.bf16 %v7492_v37, %v11107_v58  ;;  %v11110_v37 = vunpack.i.l.bf16 %v9726_v8  ;;  %v3528_v0 = vpack.c.bf16 %v7507_v10, %v7506_v20  ;;  %v3533_v8 = vld [vmem:[%s11025_s5] sm:$0x3] }
 0x3e0   : > { %v3532_v53 = vpack.c.bf16 %v7512_v7, %v7511_v22  ;;  %v11112_v39 = vpack.c.bf16 %v9791_v54, %v9784_v24  ;;  %v11113_v48 = vpack.c.bf16 %v9808_v41, %v9801_v40  ;;  %v11115_v22 = vsub.s32 1, %v8681_v2 }
 0x3e1   : > { %v3524_v32 = vpack.c.bf16 %v7502_v44, %v11110_v37  ;;  %v11114_v44 = vsub.s32 0, %v8681_v2 }
 0x3e2   : > { %v9934_v55 = vrot.slane %v3533_v8, %v11115_v22 }
 0x3e3   : > { %4131 = vmatmul.mubr.bf16.gmra.mrb[80].mxu1 %v3487_v38  ;;  %v11106_v38 = vunpack.i.h.bf16 %v9533_v9  ;;  %v7650_v9 = vld [vmem:[#allocation7 + $0x28] sm:$0xff]   ;;  %v9930_v35 = vrot.slane %v3533_v8, %v11114_v44 }
 0x3e4   : > { %6442 = vmatprep.mubr.msk.bf16.mxu1 %vm3810_vm11, %v3492_v61  ;;  %4808 = vmatpush1.bf16.msra.mxu0 %v7650_v9 }
 0x3e5   : > { %v3403_v6 = vsel %vm3383_vm12, %v11106_v38, %v7482_v27  ;;  %4809 = vmatprep.subr.bf16.mxu0 %v11109_v45 }
 0x3e6   : > { %v3507_v61 = vpack.c.bf16 %v3403_v6, %v3402_v63 }
 0x3e8   : > { %4810 = vmatpush1.bf16.msra.mxu0 %v7651_v1 }
 0x3e9   : > { %4811 = vmatprep.subr.bf16.mxu0 %v11109_v45 }
 0x3eb   : > { %4141 = vmatmul.mubr.bf16.gmra.mrb[84].mxu1 %v3491_v16 }
 0x3ec   : > { %6443 = vmatprep.mubr.msk.bf16.mxu1 %vm3810_vm11, %v3496_v21  ;;  %4812 = vmatpush1.bf16.msra.mxu0 %v7652_v62 }
 0x3ed   : > { %4813 = vmatprep.subr.bf16.mxu0 %v11109_v45 }
 0x3f0   : > { %4814 = vmatpush1.bf16.msra.mxu0 %v7653_v60 }
 0x3f1   : > { %4815 = vmatprep.subr.bf16.mxu0 %v11109_v45 }
 0x3f3   : > { %4151 = vmatmul.mubr.bf16.gmra.mrb[88].mxu1 %v3495_v59 }
 0x3f4   : > { %6444 = vmatprep.mubr.msk.bf16.mxu1 %vm3810_vm11, %v3500_v49 }
 0x3fb   : > { %4161 = vmatmul.mubr.bf16.gmra.mrb[92].mxu1 %v3499_v12 }
 0x3fc   : > { %6445 = vmatprep.mubr.msk.bf16.mxu1 %vm3810_vm11, %v3504_v42 }
 0x403   : > { %4171 = vmatmul.mubr.bf16.gmra.mrb[96].mxu1 %v3503_v29 }
 0x404   : > { %6446 = vmatprep.mubr.msk.bf16.mxu1 %vm3810_vm11, %v3508_v56 }
 0x40b   : > { %4181 = vmatmul.mubr.bf16.gmra.mrb[100].mxu1 %v3507_v61 }
 0x40c   : > { %6447 = vmatprep.mubr.msk.bf16.mxu1 %vm3810_vm11, %v3512_v34 }
 0x413   : > { %4191 = vmatmul.mubr.bf16.gmra.mrb[104].mxu1 %v11108_v19 }
 0x414   : > { %6448 = vmatprep.mubr.msk.bf16.mxu1 %vm3810_vm11, %v3516_v36 }
 0x41b   : > { %4201 = vmatmul.mubr.bf16.gmra.mrb[108].mxu1 %v3515_v17  ;;  %v7654_v17 = vld [vmem:[#allocation7 + $0x48] sm:$0xff]  }
 0x41c   : > { %6449 = vmatprep.mubr.msk.bf16.mxu1 %vm3810_vm11, %v3520_v26  ;;  %4816 = vmatpush1.bf16.msra.mxu0 %v7654_v17 }
 0x41d   : > { %5039 = vmatprep.subr.bf16.mxu0 %v11109_v45 }
 0x423   : > { %4211 = vmatmul.mubr.bf16.gmra.mrb[112].mxu1 %v11111_v4 }
 0x424   : > { %6450 = vmatprep.mubr.msk.bf16.mxu1 %vm3810_vm11, %v3524_v32 }
 0x42b   : > { %4221 = vmatmul.mubr.bf16.gmra.mrb[116].mxu1 %v3523_v52 }
 0x42c   : > { %6451 = vmatprep.mubr.msk.bf16.mxu1 %vm3810_vm11, %v3528_v0  ;;  %v7655_v0 = vld [vmem:[#allocation7 + $0x50] sm:$0xff]  }
 0x433   : > { %4231 = vmatmul.mubr.bf16.gmra.mrb[120].mxu1 %v11112_v39 }
 0x434   : > { %6452 = vmatprep.mubr.msk.bf16.mxu1 %vm3810_vm11, %v3532_v53 }
 0x43b   : > { %4241 = vmatmul.mubr.bf16.gmra.mrb[124].mxu1 %v11113_v48 }
 0x496   : > { %v4092_v14 = vpop.f32.mrb[64].mxu1 }
 0x497   : > { %v6740_v52 = vadd.f32 %v4092_v14, %v9930_v35  ;;  %v4094_v47 = vpop.f32.mrb[65].mxu1 }
 0x498   : > { %v6741_v25 = vadd.f32 %v4094_v47, %v9934_v55  ;;  %v4096_v10 = vpop.f32.mrb[66].mxu1  ;;  %v7656_v47 = vld [vmem:[#allocation7 + $0x58] sm:$0xff]  }
 0x499   : > { %v4251_v20 = vmax.f32 %v6740_v52, 0.0  ;;  %v6742_v43 = vadd.f32 %v4096_v10, %v9930_v35  ;;  %v4098_v7 = vpop.f32.mrb[67].mxu1 }
 0x49a   : > { %v4252_v24 = vmax.f32 %v6741_v25, 0.0  ;;  %v6743_v54 = vadd.f32 %v4098_v7, %v9934_v55 }
 0x49b   : > { %v4253_v40 = vmax.f32 %v6742_v43, 0.0  ;;  %v9940_v11 = vrot.slane %v4251_v20, 2 }
 0x49c   : > { %v4254_v41 = vmax.f32 %v6743_v54, 0.0  ;;  %v9942_v16 = vrot.slane %v4252_v24, 2 }
 0x49d   : > { %v4380_v2 = vrot.slane %v4253_v40, 2 }
 0x49e   : > { %v4383_v21 = vrot.slane %v4254_v41, 2  ;;  %v4102_v57 = vpop.f32.mrb[68].mxu1 }
 0x49f   : > { %v4381_v46 = vsel %vm644_vm2, %v9940_v11, %v4380_v2  ;;  %v6744_v15 = vadd.f32 %v4102_v57, %v9930_v35  ;;  %v4104_v23 = vpop.f32.mrb[69].mxu1 }
 0x4a0   : > { %v4573_v59 = vmax.f32 %v4251_v20, %v4381_v46  ;;  %v4384_v49 = vsel %vm644_vm2, %v9942_v16, %v4383_v21  ;;  %v6745_v31 = vadd.f32 %v4104_v23, %v9934_v55  ;;  %v4106_v5 = vpop.f32.mrb[70].mxu1 }
 0x4a1   : > { %v4574_v3 = vmax.f32 %v4252_v24, %v4384_v49  ;;  %v4255_v50 = vmax.f32 %v6744_v15, 0.0  ;;  %v6746_v12 = vadd.f32 %v4106_v5, %v9930_v35  ;;  %v4108_v42 = vpop.f32.mrb[71].mxu1  ;;  %v7657_v5 = vld [vmem:[#allocation7 + $0x60] sm:$0xff]  }
 0x4a2   : > { %v4256_v27 = vmax.f32 %v6745_v31, 0.0  ;;  %v6747_v33 = vadd.f32 %v4108_v42, %v9934_v55 }
 0x4a3   : > { %v4385_v28 = vrot.slane %v4255_v50, 2  ;;  %v4257_v18 = vmax.f32 %v6746_v12, 0.0 }
 0x4a4   : > { %v4387_v30 = vrot.slane %v4256_v27, 2  ;;  %v4258_v51 = vmax.f32 %v6747_v33, 0.0 }
 0x4a5   : > { %v4386_v29 = vsel %vm644_vm2, %v4380_v2, %v4385_v28  ;;  %v4389_v56 = vrot.slane %v4257_v18, 2 }
 0x4a6   : > { %v4575_v13 = vmax.f32 %v4253_v40, %v4386_v29  ;;  %v4388_v63 = vsel %vm644_vm2, %v4383_v21, %v4387_v30  ;;  %v4391_v38 = vrot.slane %v4258_v51, 2  ;;  %v4112_v6 = vpop.f32.mrb[72].mxu1 }
 0x4a7   : > { %v4576_v61 = vmax.f32 %v4254_v41, %v4388_v63  ;;  %v6748_v34 = vadd.f32 %v4112_v6, %v9930_v35  ;;  %v4114_v58 = vpop.f32.mrb[73].mxu1  ;;  %v4390_v36 = vsel %vm644_vm2, %v4385_v28, %v4389_v56 }
 0x4a8   : > { %v9956_v19 = vpack.c.bf16 %v4575_v13, %v4573_v59  ;;  %v4392_v9 = vsel %vm644_vm2, %v4387_v30, %v4391_v38  ;;  %v6749_v26 = vadd.f32 %v4114_v58, %v9934_v55  ;;  %v4116_v1 = vpop.f32.mrb[74].mxu1  ;;  %v4577_v62 = vmax.f32 %v4255_v50, %v4390_v36  ;;  %v7658_v30 = vld [vmem:[#allocation7 + $0x68] sm:$0xff]  }
 0x4a9   : > { %v4578_v37 = vmax.f32 %v4256_v27, %v4392_v9  ;;  %v4259_v32 = vmax.f32 %v6748_v34, 0.0  ;;  %v6750_v4 = vadd.f32 %v4116_v1, %v9930_v35  ;;  %v4118_v60 = vpop.f32.mrb[75].mxu1  ;;  %v9961_v17 = vpack.c.bf16 %v4576_v61, %v4574_v3 }
 0x4aa   : > { %v4260_v53 = vmax.f32 %v6749_v26, 0.0  ;;  %v6751_v39 = vadd.f32 %v4118_v60, %v9934_v55  ;;  %v7659_v60 = vld [vmem:[#allocation7 + $0x70] sm:$0xff]  }
 0x4ab   : > { %v4393_v48 = vrot.slane %v4259_v32, 2  ;;  %v4261_v8 = vmax.f32 %v6750_v4, 0.0  ;;  %6463 = vmatprep.mubr.msk.bf16.mxu0 %vm1167_vm4, %v9961_v17 }
 0x4ac   : > { %v4395_v44 = vrot.slane %v4260_v53, 2  ;;  %v4262_v22 = vmax.f32 %v6751_v39, 0.0  ;;  %4830 = vmatmul.mubr.bf16.vlgmr.msra.gmra.mrb[128].mxu0 %v9956_v19 }
 0x4ad   : > { %v4397_v14 = vrot.slane %v4261_v8, 2  ;;  %v4394_v52 = vsel %vm644_vm2, %v4389_v56, %v4393_v48  ;;  %5040 = vmatpush1.bf16.msra.mxu0 %v7655_v0 }
 0x4ae   : > { %v4396_v25 = vsel %vm644_vm2, %v4391_v38, %v4395_v44  ;;  %v4399_v10 = vrot.slane %v4262_v22, 2  ;;  %v4122_v20 = vpop.f32.mrb[76].mxu1  ;;  %v4579_v43 = vmax.f32 %v4257_v18, %v4394_v52  ;;  %5041 = vmatprep.subr.bf16.mxu0 %v11109_v45  ;;  %v7660_v52 = vld [vmem:[#allocation7 + $0x78] sm:$0xff]  }
 0x4af   : > { %v4580_v7 = vmax.f32 %v4258_v51, %v4396_v25  ;;  %v6752_v24 = vadd.f32 %v4122_v20, %v9930_v35  ;;  %v4124_v54 = vpop.f32.mrb[77].mxu1  ;;  %v4398_v40 = vsel %vm644_vm2, %v4393_v48, %v4397_v14 }
 0x4b0   : > { %v4400_v41 = vsel %vm644_vm2, %v4395_v44, %v4399_v10  ;;  %v6753_v2 = vadd.f32 %v4124_v54, %v9934_v55  ;;  %v4126_v21 = vpop.f32.mrb[78].mxu1  ;;  %v9974_v57 = vpack.c.bf16 %v4579_v43, %v4577_v62  ;;  %v4581_v46 = vmax.f32 %v4259_v32, %v4398_v40 }
 0x4b1   : > { %v4582_v15 = vmax.f32 %v4260_v53, %v4400_v41  ;;  %v4263_v23 = vmax.f32 %v6752_v24, 0.0  ;;  %v6754_v59 = vadd.f32 %v4126_v21, %v9930_v35  ;;  %v4128_v49 = vpop.f32.mrb[79].mxu1  ;;  %v9977_v31 = vpack.c.bf16 %v4580_v7, %v4578_v37  ;;  %5042 = vmatpush1.bf16.msra.mxu0 %v7656_v47 }
 0x4b2   : > { %v4264_v3 = vmax.f32 %v6753_v2, 0.0  ;;  %v6755_v50 = vadd.f32 %v4128_v49, %v9934_v55  ;;  %5043 = vmatprep.subr.bf16.mxu0 %v11109_v45 }
 0x4b3   : > { %v4401_v12 = vrot.slane %v4263_v23, 2  ;;  %v4265_v42 = vmax.f32 %v6754_v59, 0.0  ;;  %6464 = vmatprep.mubr.msk.bf16.mxu0 %vm1167_vm4, %v9977_v31 }
 0x4b4   : > { %v4403_v27 = vrot.slane %v4264_v3, 2  ;;  %v4266_v33 = vmax.f32 %v6755_v50, 0.0  ;;  %4838 = vmatmul.mubr.bf16.gmra.mrb[132].mxu0 %v9974_v57 }
 0x4b5   : > { %v4405_v28 = vrot.slane %v4265_v42, 2  ;;  %v4402_v18 = vsel %vm644_vm2, %v4397_v14, %v4401_v12  ;;  %5044 = vmatpush1.bf16.msra.mxu0 %v7657_v5 }
 0x4b6   : > { %v4404_v51 = vsel %vm644_vm2, %v4399_v10, %v4403_v27  ;;  %v4407_v29 = vrot.slane %v4266_v33, 2  ;;  %v4132_v56 = vpop.f32.mrb[80].mxu1  ;;  %v4583_v13 = vmax.f32 %v4261_v8, %v4402_v18  ;;  %5045 = vmatprep.subr.bf16.mxu0 %v11109_v45 }
 0x4b7   : > { %v4584_v63 = vmax.f32 %v4262_v22, %v4404_v51  ;;  %v6756_v38 = vadd.f32 %v4132_v56, %v9930_v35  ;;  %v4134_v6 = vpop.f32.mrb[81].mxu1  ;;  %v4406_v61 = vsel %vm644_vm2, %v4401_v12, %v4405_v28  ;;  %v7662_v51 = vld [vmem:[#allocation7 + $0x88] sm:$0xff]  }
 0x4b8   : > { %v4408_v34 = vsel %vm644_vm2, %v4403_v27, %v4407_v29  ;;  %v6757_v58 = vadd.f32 %v4134_v6, %v9934_v55  ;;  %v4136_v36 = vpop.f32.mrb[82].mxu1  ;;  %v9991_v9 = vpack.c.bf16 %v4583_v13, %v4581_v46  ;;  %v4585_v26 = vmax.f32 %v4263_v23, %v4406_v61 }
 0x4b9   : > { %v4586_v1 = vmax.f32 %v4264_v3, %v4408_v34  ;;  %v4267_v62 = vmax.f32 %v6756_v38, 0.0  ;;  %v6758_v37 = vadd.f32 %v4136_v36, %v9930_v35  ;;  %v4138_v32 = vpop.f32.mrb[83].mxu1  ;;  %v9994_v4 = vpack.c.bf16 %v4584_v63, %v4582_v15  ;;  %5046 = vmatpush1.bf16.msra.mxu0 %v7658_v30  ;;  %v7661_v3 = vld [vmem:[#allocation7 + $0x80] sm:$0xff]  }
 0x4ba   : > { %v4268_v0 = vmax.f32 %v6757_v58, 0.0  ;;  %v6759_v53 = vadd.f32 %v4138_v32, %v9934_v55  ;;  %5047 = vmatprep.subr.bf16.mxu0 %v11109_v45 }
 0x4bb   : > { %v4409_v39 = vrot.slane %v4267_v62, 2  ;;  %v4269_v48 = vmax.f32 %v6758_v37, 0.0  ;;  %6465 = vmatprep.mubr.msk.bf16.mxu0 %vm1167_vm4, %v9994_v4 }
 0x4bc   : > { %v4411_v8 = vrot.slane %v4268_v0, 2  ;;  %v4270_v44 = vmax.f32 %v6759_v53, 0.0  ;;  %4846 = vmatmul.mubr.bf16.gmra.mrb[136].mxu0 %v9991_v9 }
 0x4bd   : > { %v4413_v22 = vrot.slane %v4269_v48, 2  ;;  %v4410_v14 = vsel %vm644_vm2, %v4405_v28, %v4409_v39  ;;  %5048 = vmatpush1.bf16.msra.mxu0 %v7659_v60 }
 0x4be   : > { %v4412_v47 = vsel %vm644_vm2, %v4407_v29, %v4411_v8  ;;  %v4415_v25 = vrot.slane %v4270_v44, 2  ;;  %v4142_v10 = vpop.f32.mrb[84].mxu1  ;;  %v4587_v20 = vmax.f32 %v4265_v42, %v4410_v14  ;;  %5049 = vmatprep.subr.bf16.mxu0 %v11109_v45 }
 0x4bf   : > { %v4588_v43 = vmax.f32 %v4266_v33, %v4412_v47  ;;  %v6760_v7 = vadd.f32 %v4142_v10, %v9930_v35  ;;  %v4144_v24 = vpop.f32.mrb[85].mxu1  ;;  %v4414_v54 = vsel %vm644_vm2, %v4409_v39, %v4413_v22  ;;  %v7663_v39 = vld [vmem:[#allocation7 + $0x90] sm:$0xff]   ;;  %v7664_v10 = vld [vmem:[#allocation7 + $0x98] sm:$0xff]  }
 0x4c0   : > { %v4416_v40 = vsel %vm644_vm2, %v4411_v8, %v4415_v25  ;;  %v6761_v41 = vadd.f32 %v4144_v24, %v9934_v55  ;;  %v4146_v2 = vpop.f32.mrb[86].mxu1  ;;  %v10008_v21 = vpack.c.bf16 %v4587_v20, %v4585_v26  ;;  %v4589_v46 = vmax.f32 %v4267_v62, %v4414_v54 }
 0x4c1   : > { %v4590_v15 = vmax.f32 %v4268_v0, %v4416_v40  ;;  %v4271_v23 = vmax.f32 %v6760_v7, 0.0  ;;  %v6762_v59 = vadd.f32 %v4146_v2, %v9930_v35  ;;  %v4148_v49 = vpop.f32.mrb[87].mxu1  ;;  %v10011_v5 = vpack.c.bf16 %v4588_v43, %v4586_v1  ;;  %5050 = vmatpush1.bf16.msra.mxu0 %v7660_v52 }
 0x4c2   : > { %v4272_v50 = vmax.f32 %v6761_v41, 0.0  ;;  %v6763_v12 = vadd.f32 %v4148_v49, %v9934_v55  ;;  %5051 = vmatprep.subr.bf16.mxu0 %v11109_v45 }
 0x4c3   : > { %v4417_v42 = vrot.slane %v4271_v23, 2  ;;  %v4273_v27 = vmax.f32 %v6762_v59, 0.0  ;;  %6466 = vmatprep.mubr.msk.bf16.mxu0 %vm1167_vm4, %v10011_v5 }
 0x4c4   : > { %v4419_v33 = vrot.slane %v4272_v50, 2  ;;  %v4274_v28 = vmax.f32 %v6763_v12, 0.0  ;;  %4854 = vmatmul.mubr.bf16.gmra.mrb[140].mxu0 %v10008_v21 }
 0x4c5   : > { %v4421_v18 = vrot.slane %v4273_v27, 2  ;;  %v4418_v30 = vsel %vm644_vm2, %v4413_v22, %v4417_v42  ;;  %5052 = vmatpush1.bf16.msra.mxu0 %v7661_v3 }
 0x4c6   : > { %v4420_v29 = vsel %vm644_vm2, %v4415_v25, %v4419_v33  ;;  %v4423_v56 = vrot.slane %v4274_v28, 2  ;;  %v4152_v13 = vpop.f32.mrb[88].mxu1  ;;  %v4591_v63 = vmax.f32 %v4269_v48, %v4418_v30  ;;  %5053 = vmatprep.subr.bf16.mxu0 %v11109_v45 }
 0x4c7   : > { %v4592_v38 = vmax.f32 %v4270_v44, %v4420_v29  ;;  %v6764_v6 = vadd.f32 %v4152_v13, %v9930_v35  ;;  %v4154_v61 = vpop.f32.mrb[89].mxu1  ;;  %v4422_v34 = vsel %vm644_vm2, %v4417_v42, %v4421_v18 }
 0x4c8   : > { %v4424_v58 = vsel %vm644_vm2, %v4419_v33, %v4423_v56  ;;  %v6765_v36 = vadd.f32 %v4154_v61, %v9934_v55  ;;  %v4156_v26 = vpop.f32.mrb[90].mxu1  ;;  %v10025_v1 = vpack.c.bf16 %v4591_v63, %v4589_v46  ;;  %v4593_v62 = vmax.f32 %v4271_v23, %v4422_v34 }
 0x4c9   : > { %v4594_v37 = vmax.f32 %v4272_v50, %v4424_v58  ;;  %v4275_v32 = vmax.f32 %v6764_v6, 0.0  ;;  %v6766_v60 = vadd.f32 %v4156_v26, %v9930_v35  ;;  %v4158_v0 = vpop.f32.mrb[91].mxu1  ;;  %v10028_v53 = vpack.c.bf16 %v4592_v38, %v4590_v15  ;;  %5054 = vmatpush1.bf16.msra.mxu0 %v7662_v51 }
 0x4ca   : > { %v4276_v48 = vmax.f32 %v6765_v36, 0.0  ;;  %v6767_v8 = vadd.f32 %v4158_v0, %v9934_v55  ;;  %5055 = vmatprep.subr.bf16.mxu0 %v11109_v45 }
 0x4cb   : > { %v4425_v44 = vrot.slane %v4275_v32, 2  ;;  %v4277_v22 = vmax.f32 %v6766_v60, 0.0  ;;  %6467 = vmatprep.mubr.msk.bf16.mxu0 %vm1167_vm4, %v10028_v53 }
 0x4cc   : > { %v4427_v14 = vrot.slane %v4276_v48, 2  ;;  %v4278_v52 = vmax.f32 %v6767_v8, 0.0  ;;  %4862 = vmatmul.mubr.bf16.gmra.mrb[144].mxu0 %v10025_v1 }
 0x4cd   : > { %v4429_v47 = vrot.slane %v4277_v22, 2  ;;  %v4426_v25 = vsel %vm644_vm2, %v4421_v18, %v4425_v44  ;;  %5056 = vmatpush1.bf16.msra.mxu0 %v7663_v39 }
 0x4ce   : > { %v4428_v20 = vsel %vm644_vm2, %v4423_v56, %v4427_v14  ;;  %v4431_v43 = vrot.slane %v4278_v52, 2  ;;  %v4162_v7 = vpop.f32.mrb[92].mxu1  ;;  %v4595_v24 = vmax.f32 %v4273_v27, %v4426_v25  ;;  %5057 = vmatprep.subr.bf16.mxu0 %v11109_v45 }
 0x4cf   : > { %v4596_v54 = vmax.f32 %v4274_v28, %v4428_v20  ;;  %v6768_v40 = vadd.f32 %v4162_v7, %v9930_v35  ;;  %v4164_v41 = vpop.f32.mrb[93].mxu1  ;;  %v4430_v2 = vsel %vm644_vm2, %v4425_v44, %v4429_v47 }
 0x4d0   : > { %v4432_v46 = vsel %vm644_vm2, %v4427_v14, %v4431_v43  ;;  %v6769_v15 = vadd.f32 %v4164_v41, %v9934_v55  ;;  %v4166_v23 = vpop.f32.mrb[94].mxu1  ;;  %v10042_v59 = vpack.c.bf16 %v4595_v24, %v4593_v62  ;;  %v4597_v49 = vmax.f32 %v4275_v32, %v4430_v2 }
 0x4d1   : > { %v4598_v3 = vmax.f32 %v4276_v48, %v4432_v46  ;;  %v4279_v50 = vmax.f32 %v6768_v40, 0.0  ;;  %v6770_v12 = vadd.f32 %v4166_v23, %v9930_v35  ;;  %v4168_v42 = vpop.f32.mrb[95].mxu1  ;;  %v10045_v27 = vpack.c.bf16 %v4596_v54, %v4594_v37  ;;  %5058 = vmatpush1.bf16.msra.mxu0 %v7664_v10 }
 0x4d2   : > { %v4280_v33 = vmax.f32 %v6769_v15, 0.0  ;;  %v6771_v28 = vadd.f32 %v4168_v42, %v9934_v55 }
 0x4d3   : > { %v4433_v18 = vrot.slane %v4279_v50, 2  ;;  %v4281_v30 = vmax.f32 %v6770_v12, 0.0  ;;  %6468 = vmatprep.mubr.msk.bf16.mxu0 %vm1167_vm4, %v10045_v27 }
 0x4d4   : > { %v4435_v51 = vrot.slane %v4280_v33, 2  ;;  %v4282_v29 = vmax.f32 %v6771_v28, 0.0  ;;  %4870 = vmatmul.mubr.bf16.gmra.mrb[148].mxu0 %v10042_v59 }
 0x4d5   : > { %v4437_v56 = vrot.slane %v4281_v30, 2  ;;  %v4434_v13 = vsel %vm644_vm2, %v4429_v47, %v4433_v18 }
 0x4d6   : > { %v4436_v63 = vsel %vm644_vm2, %v4431_v43, %v4435_v51  ;;  %v4439_v38 = vrot.slane %v4282_v29, 2  ;;  %v4172_v6 = vpop.f32.mrb[96].mxu1  ;;  %v4599_v61 = vmax.f32 %v4277_v22, %v4434_v13 }
 0x4d7   : > { %v4600_v34 = vmax.f32 %v4278_v52, %v4436_v63  ;;  %v6772_v58 = vadd.f32 %v4172_v6, %v9930_v35  ;;  %v4174_v36 = vpop.f32.mrb[97].mxu1  ;;  %v4438_v26 = vsel %vm644_vm2, %v4433_v18, %v4437_v56 }
 0x4d8   : > { %v4440_v62 = vsel %vm644_vm2, %v4435_v51, %v4439_v38  ;;  %v6773_v37 = vadd.f32 %v4174_v36, %v9934_v55  ;;  %v4176_v32 = vpop.f32.mrb[98].mxu1  ;;  %v10057_v60 = vpack.c.bf16 %v4599_v61, %v4597_v49  ;;  %v4601_v0 = vmax.f32 %v4279_v50, %v4438_v26 }
 0x4d9   : > { %v4602_v39 = vmax.f32 %v4280_v33, %v4440_v62  ;;  %v4283_v48 = vmax.f32 %v6772_v58, 0.0  ;;  %v6774_v8 = vadd.f32 %v4176_v32, %v9930_v35  ;;  %v4178_v44 = vpop.f32.mrb[99].mxu1  ;;  %v10060_v22 = vpack.c.bf16 %v4600_v34, %v4598_v3 }
 0x4da   : > { %v4284_v14 = vmax.f32 %v6773_v37, 0.0  ;;  %v6775_v52 = vadd.f32 %v4178_v44, %v9934_v55 }
 0x4db   : > { %v4441_v47 = vrot.slane %v4283_v48, 2  ;;  %v4285_v25 = vmax.f32 %v6774_v8, 0.0  ;;  %6469 = vmatprep.mubr.msk.bf16.mxu0 %vm1167_vm4, %v10060_v22 }
 0x4dc   : > { %v4443_v10 = vrot.slane %v4284_v14, 2  ;;  %v4286_v20 = vmax.f32 %v6775_v52, 0.0  ;;  %4878 = vmatmul.mubr.bf16.gmra.mrb[152].mxu0 %v10057_v60 }
 0x4dd   : > { %v4445_v43 = vrot.slane %v4285_v25, 2  ;;  %v4442_v7 = vsel %vm644_vm2, %v4437_v56, %v4441_v47 }
 0x4de   : > { %v4444_v24 = vsel %vm644_vm2, %v4439_v38, %v4443_v10  ;;  %v4447_v54 = vrot.slane %v4286_v20, 2  ;;  %v4182_v40 = vpop.f32.mrb[100].mxu1  ;;  %v4603_v41 = vmax.f32 %v4281_v30, %v4442_v7 }
 0x4df   : > { %v4604_v2 = vmax.f32 %v4282_v29, %v4444_v24  ;;  %v6776_v46 = vadd.f32 %v4182_v40, %v9930_v35  ;;  %v4184_v15 = vpop.f32.mrb[101].mxu1  ;;  %v4446_v23 = vsel %vm644_vm2, %v4441_v47, %v4445_v43 }
 0x4e0   : > { %v4448_v49 = vsel %vm644_vm2, %v4443_v10, %v4447_v54  ;;  %v6777_v3 = vadd.f32 %v4184_v15, %v9934_v55  ;;  %v4186_v50 = vpop.f32.mrb[102].mxu1  ;;  %v10072_v12 = vpack.c.bf16 %v4603_v41, %v4601_v0  ;;  %v4605_v42 = vmax.f32 %v4283_v48, %v4446_v23 }
 0x4e1   : > { %v4606_v33 = vmax.f32 %v4284_v14, %v4448_v49  ;;  %v4287_v28 = vmax.f32 %v6776_v46, 0.0  ;;  %v6778_v18 = vadd.f32 %v4186_v50, %v9930_v35  ;;  %v4188_v51 = vpop.f32.mrb[103].mxu1  ;;  %v10075_v30 = vpack.c.bf16 %v4604_v2, %v4602_v39 }
 0x4e2   : > { %v4288_v29 = vmax.f32 %v6777_v3, 0.0  ;;  %v6779_v56 = vadd.f32 %v4188_v51, %v9934_v55 }
 0x4e3   : > { %v4449_v13 = vrot.slane %v4287_v28, 2  ;;  %v4289_v63 = vmax.f32 %v6778_v18, 0.0  ;;  %6470 = vmatprep.mubr.msk.bf16.mxu0 %vm1167_vm4, %v10075_v30 }
 0x4e4   : > { %v4451_v38 = vrot.slane %v4288_v29, 2  ;;  %v4290_v6 = vmax.f32 %v6779_v56, 0.0  ;;  %4886 = vmatmul.mubr.bf16.gmra.mrb[156].mxu0 %v10072_v12 }
 0x4e5   : > { %v4453_v61 = vrot.slane %v4289_v63, 2  ;;  %v4450_v34 = vsel %vm644_vm2, %v4445_v43, %v4449_v13 }
 0x4e6   : > { %v4452_v58 = vsel %vm644_vm2, %v4447_v54, %v4451_v38  ;;  %v4455_v36 = vrot.slane %v4290_v6, 2  ;;  %v4192_v26 = vpop.f32.mrb[104].mxu1  ;;  %v4607_v62 = vmax.f32 %v4285_v25, %v4450_v34 }
 0x4e7   : > { %v4608_v37 = vmax.f32 %v4286_v20, %v4452_v58  ;;  %v6780_v32 = vadd.f32 %v4192_v26, %v9930_v35  ;;  %v4194_v0 = vpop.f32.mrb[105].mxu1  ;;  %v4454_v39 = vsel %vm644_vm2, %v4449_v13, %v4453_v61 }
 0x4e8   : > { %v4456_v48 = vsel %vm644_vm2, %v4451_v38, %v4455_v36  ;;  %v6781_v8 = vadd.f32 %v4194_v0, %v9934_v55  ;;  %v4196_v44 = vpop.f32.mrb[106].mxu1  ;;  %v10087_v14 = vpack.c.bf16 %v4607_v62, %v4605_v42  ;;  %v4609_v52 = vmax.f32 %v4287_v28, %v4454_v39 }
 0x4e9   : > { %v4610_v47 = vmax.f32 %v4288_v29, %v4456_v48  ;;  %v4291_v10 = vmax.f32 %v6780_v32, 0.0  ;;  %v6782_v43 = vadd.f32 %v4196_v44, %v9930_v35  ;;  %v4198_v7 = vpop.f32.mrb[107].mxu1  ;;  %v10090_v25 = vpack.c.bf16 %v4608_v37, %v4606_v33 }
 0x4ea   : > { %v4292_v20 = vmax.f32 %v6781_v8, 0.0  ;;  %v6783_v24 = vadd.f32 %v4198_v7, %v9934_v55 }
 0x4eb   : > { %v4457_v54 = vrot.slane %v4291_v10, 2  ;;  %v4293_v40 = vmax.f32 %v6782_v43, 0.0  ;;  %6471 = vmatprep.mubr.msk.bf16.mxu0 %vm1167_vm4, %v10090_v25 }
 0x4ec   : > { %v4459_v41 = vrot.slane %v4292_v20, 2  ;;  %v4294_v2 = vmax.f32 %v6783_v24, 0.0  ;;  %4894 = vmatmul.mubr.bf16.gmra.mrb[160].mxu0 %v10087_v14 }
 0x4ed   : > { %v4461_v46 = vrot.slane %v4293_v40, 2  ;;  %v4458_v15 = vsel %vm644_vm2, %v4453_v61, %v4457_v54 }
 0x4ee   : > { %v4460_v23 = vsel %vm644_vm2, %v4455_v36, %v4459_v41  ;;  %v4463_v49 = vrot.slane %v4294_v2, 2  ;;  %v4202_v3 = vpop.f32.mrb[108].mxu1  ;;  %v4611_v50 = vmax.f32 %v4289_v63, %v4458_v15 }
 0x4ef   : > { %v4612_v42 = vmax.f32 %v4290_v6, %v4460_v23  ;;  %v6784_v33 = vadd.f32 %v4202_v3, %v9930_v35  ;;  %v4204_v28 = vpop.f32.mrb[109].mxu1  ;;  %v4462_v18 = vsel %vm644_vm2, %v4457_v54, %v4461_v46 }
 0x4f0   : > { %v4464_v51 = vsel %vm644_vm2, %v4459_v41, %v4463_v49  ;;  %v6785_v29 = vadd.f32 %v4204_v28, %v9934_v55  ;;  %v4206_v56 = vpop.f32.mrb[110].mxu1  ;;  %v10102_v13 = vpack.c.bf16 %v4611_v50, %v4609_v52  ;;  %v4613_v38 = vmax.f32 %v4291_v10, %v4462_v18 }
 0x4f1   : > { %v4614_v61 = vmax.f32 %v4292_v20, %v4464_v51  ;;  %v4295_v34 = vmax.f32 %v6784_v33, 0.0  ;;  %v6786_v58 = vadd.f32 %v4206_v56, %v9930_v35  ;;  %v4208_v36 = vpop.f32.mrb[111].mxu1  ;;  %v10105_v63 = vpack.c.bf16 %v4612_v42, %v4610_v47 }
 0x4f2   : > { %v4296_v6 = vmax.f32 %v6785_v29, 0.0  ;;  %v6787_v26 = vadd.f32 %v4208_v36, %v9934_v55 }
 0x4f3   : > { %v4465_v62 = vrot.slane %v4295_v34, 2  ;;  %v4297_v37 = vmax.f32 %v6786_v58, 0.0  ;;  %6472 = vmatprep.mubr.msk.bf16.mxu0 %vm1167_vm4, %v10105_v63 }
 0x4f4   : > { %v4467_v32 = vrot.slane %v4296_v6, 2  ;;  %v4298_v0 = vmax.f32 %v6787_v26, 0.0  ;;  %4902 = vmatmul.mubr.bf16.gmra.mrb[164].mxu0 %v10102_v13 }
 0x4f5   : > { %v4469_v39 = vrot.slane %v4297_v37, 2  ;;  %v4466_v48 = vsel %vm644_vm2, %v4461_v46, %v4465_v62 }
 0x4f6   : > { %v4468_v8 = vsel %vm644_vm2, %v4463_v49, %v4467_v32  ;;  %v4471_v44 = vrot.slane %v4298_v0, 2  ;;  %v4212_v52 = vpop.f32.mrb[112].mxu1  ;;  %v4615_v47 = vmax.f32 %v4293_v40, %v4466_v48 }
 0x4f7   : > { %v4616_v10 = vmax.f32 %v4294_v2, %v4468_v8  ;;  %v6788_v43 = vadd.f32 %v4212_v52, %v9930_v35  ;;  %v4214_v7 = vpop.f32.mrb[113].mxu1  ;;  %v4470_v20 = vsel %vm644_vm2, %v4465_v62, %v4469_v39 }
 0x4f8   : > { %v4472_v24 = vsel %vm644_vm2, %v4467_v32, %v4471_v44  ;;  %v6789_v54 = vadd.f32 %v4214_v7, %v9934_v55  ;;  %v4216_v41 = vpop.f32.mrb[114].mxu1  ;;  %v10117_v15 = vpack.c.bf16 %v4615_v47, %v4613_v38  ;;  %v4617_v23 = vmax.f32 %v4295_v34, %v4470_v20 }
 0x4f9   : > { %v4618_v46 = vmax.f32 %v4296_v6, %v4472_v24  ;;  %v4299_v3 = vmax.f32 %v6788_v43, 0.0  ;;  %v6790_v49 = vadd.f32 %v4216_v41, %v9930_v35  ;;  %v4218_v50 = vpop.f32.mrb[115].mxu1  ;;  %v10120_v40 = vpack.c.bf16 %v4616_v10, %v4614_v61 }
 0x4fa   : > { %v4300_v2 = vmax.f32 %v6789_v54, 0.0  ;;  %v6791_v42 = vadd.f32 %v4218_v50, %v9934_v55 }
 0x4fb   : > { %v4473_v33 = vrot.slane %v4299_v3, 2  ;;  %v4301_v28 = vmax.f32 %v6790_v49, 0.0  ;;  %6473 = vmatprep.mubr.msk.bf16.mxu0 %vm1167_vm4, %v10120_v40 }
 0x4fc   : > { %v4475_v18 = vrot.slane %v4300_v2, 2  ;;  %v4302_v51 = vmax.f32 %v6791_v42, 0.0  ;;  %4910 = vmatmul.mubr.bf16.gmra.mrb[168].mxu0 %v10117_v15 }
 0x4fd   : > { %v4477_v29 = vrot.slane %v4301_v28, 2  ;;  %v4474_v56 = vsel %vm644_vm2, %v4469_v39, %v4473_v33 }
 0x4fe   : > { %v4476_v38 = vsel %vm644_vm2, %v4471_v44, %v4475_v18  ;;  %v4479_v34 = vrot.slane %v4302_v51, 2  ;;  %v4222_v61 = vpop.f32.mrb[116].mxu1  ;;  %v4619_v58 = vmax.f32 %v4297_v37, %v4474_v56 }
 0x4ff   : > { %v4620_v36 = vmax.f32 %v4298_v0, %v4476_v38  ;;  %v6792_v6 = vadd.f32 %v4222_v61, %v9930_v35  ;;  %v4224_v26 = vpop.f32.mrb[117].mxu1  ;;  %v4478_v62 = vsel %vm644_vm2, %v4473_v33, %v4477_v29 }
 0x500   : > { %v4480_v32 = vsel %vm644_vm2, %v4475_v18, %v4479_v34  ;;  %v6793_v48 = vadd.f32 %v4224_v26, %v9934_v55  ;;  %v4226_v8 = vpop.f32.mrb[118].mxu1  ;;  %v10132_v52 = vpack.c.bf16 %v4619_v58, %v4617_v23  ;;  %v4621_v47 = vmax.f32 %v4299_v3, %v4478_v62 }
 0x501   : > { %v4622_v39 = vmax.f32 %v4300_v2, %v4480_v32  ;;  %v4303_v10 = vmax.f32 %v6792_v6, 0.0  ;;  %v6794_v44 = vadd.f32 %v4226_v8, %v9930_v35  ;;  %v4228_v43 = vpop.f32.mrb[119].mxu1  ;;  %v10135_v37 = vpack.c.bf16 %v4620_v36, %v4618_v46 }
 0x502   : > { %v4304_v0 = vmax.f32 %v6793_v48, 0.0  ;;  %v6795_v7 = vadd.f32 %v4228_v43, %v9934_v55 }
 0x503   : > { %v4481_v20 = vrot.slane %v4303_v10, 2  ;;  %v4305_v24 = vmax.f32 %v6794_v44, 0.0  ;;  %6474 = vmatprep.mubr.msk.bf16.mxu0 %vm1167_vm4, %v10135_v37 }
 0x504   : > { %v4483_v54 = vrot.slane %v4304_v0, 2  ;;  %v4306_v41 = vmax.f32 %v6795_v7, 0.0  ;;  %4918 = vmatmul.mubr.bf16.gmra.mrb[172].mxu0 %v10132_v52 }
 0x505   : > { %v4485_v23 = vrot.slane %v4305_v24, 2  ;;  %v4482_v3 = vsel %vm644_vm2, %v4477_v29, %v4481_v20 }
 0x506   : > { %v4484_v49 = vsel %vm644_vm2, %v4479_v34, %v4483_v54  ;;  %v4487_v50 = vrot.slane %v4306_v41, 2  ;;  %v4232_v46 = vpop.f32.mrb[120].mxu1  ;;  %v4623_v2 = vmax.f32 %v4301_v28, %v4482_v3 }
 0x507   : > { %v4624_v42 = vmax.f32 %v4302_v51, %v4484_v49  ;;  %v6796_v33 = vadd.f32 %v4232_v46, %v9930_v35  ;;  %v4234_v18 = vpop.f32.mrb[121].mxu1  ;;  %v4486_v56 = vsel %vm644_vm2, %v4481_v20, %v4485_v23 }
 0x508   : > { %v4488_v38 = vsel %vm644_vm2, %v4483_v54, %v4487_v50  ;;  %v6797_v61 = vadd.f32 %v4234_v18, %v9934_v55  ;;  %v4236_v58 = vpop.f32.mrb[122].mxu1  ;;  %v10147_v36 = vpack.c.bf16 %v4623_v2, %v4621_v47  ;;  %v4625_v6 = vmax.f32 %v4303_v10, %v4486_v56 }
 0x509   : > { %v4626_v29 = vmax.f32 %v4304_v0, %v4488_v38  ;;  %v4307_v26 = vmax.f32 %v6796_v33, 0.0  ;;  %v6798_v34 = vadd.f32 %v4236_v58, %v9930_v35  ;;  %v4238_v62 = vpop.f32.mrb[123].mxu1  ;;  %v10150_v28 = vpack.c.bf16 %v4624_v42, %v4622_v39 }
 0x50a   : > { %v4308_v51 = vmax.f32 %v6797_v61, 0.0  ;;  %v6799_v32 = vadd.f32 %v4238_v62, %v9934_v55 }
 0x50b   : > { %v4489_v48 = vrot.slane %v4307_v26, 2  ;;  %v4309_v8 = vmax.f32 %v6798_v34, 0.0  ;;  %6475 = vmatprep.mubr.msk.bf16.mxu0 %vm1167_vm4, %v10150_v28 }
 0x50c   : > { %v4491_v44 = vrot.slane %v4308_v51, 2  ;;  %v4310_v43 = vmax.f32 %v6799_v32, 0.0  ;;  %4926 = vmatmul.mubr.bf16.gmra.mrb[176].mxu0 %v10147_v36 }
 0x50d   : > { %v4493_v47 = vrot.slane %v4309_v8, 2  ;;  %v4490_v10 = vsel %vm644_vm2, %v4485_v23, %v4489_v48 }
 0x50e   : > { %v4492_v0 = vsel %vm644_vm2, %v4487_v50, %v4491_v44  ;;  %v4495_v7 = vrot.slane %v4310_v43, 2  ;;  %v4242_v39 = vpop.f32.mrb[124].mxu1  ;;  %v4627_v20 = vmax.f32 %v4305_v24, %v4490_v10 }
 0x50f   : > { %v4628_v54 = vmax.f32 %v4306_v41, %v4492_v0  ;;  %v6800_v3 = vadd.f32 %v4242_v39, %v9930_v35  ;;  %v4244_v49 = vpop.f32.mrb[125].mxu1  ;;  %v4494_v46 = vsel %vm644_vm2, %v4489_v48, %v4493_v47 }
 0x510   : > { %v4496_v2 = vsel %vm644_vm2, %v4491_v44, %v4495_v7  ;;  %v6801_v42 = vadd.f32 %v4244_v49, %v9934_v55  ;;  %v4246_v33 = vpop.f32.mrb[126].mxu1  ;;  %v10162_v18 = vpack.c.bf16 %v4627_v20, %v4625_v6  ;;  %v4629_v56 = vmax.f32 %v4307_v26, %v4494_v46 }
 0x511   : > { %v4630_v23 = vmax.f32 %v4308_v51, %v4496_v2  ;;  %v4311_v38 = vmax.f32 %v6800_v3, 0.0  ;;  %v6802_v50 = vadd.f32 %v4246_v33, %v9930_v35  ;;  %v4248_v61 = vpop.f32.mrb[127].mxu1  ;;  %v10165_v24 = vpack.c.bf16 %v4628_v54, %v4626_v29 }
 0x512   : > { %v4312_v41 = vmax.f32 %v6801_v42, 0.0  ;;  %v6803_v58 = vadd.f32 %v4248_v61, %v9934_v55 }
 0x513   : > { %v4497_v34 = vrot.slane %v4311_v38, 2  ;;  %v4313_v62 = vmax.f32 %v6802_v50, 0.0  ;;  %6476 = vmatprep.mubr.msk.bf16.mxu0 %vm1167_vm4, %v10165_v24 }
 0x514   : > { %v4499_v32 = vrot.slane %v4312_v41, 2  ;;  %v4314_v48 = vmax.f32 %v6803_v58, 0.0  ;;  %4934 = vmatmul.mubr.bf16.gmra.mrb[180].mxu0 %v10162_v18 }
 0x515   : > { %v4501_v6 = vrot.slane %v4313_v62, 2  ;;  %v4498_v26 = vsel %vm644_vm2, %v4493_v47, %v4497_v34 }
 0x516   : > { %v4500_v35 = vsel %vm644_vm2, %v4495_v7, %v4499_v32  ;;  %v4503_v51 = vrot.slane %v4314_v48, 2  ;;  %v4631_v29 = vmax.f32 %v4309_v8, %v4498_v26 }
 0x517   : > { %v4632_v44 = vmax.f32 %v4310_v43, %v4500_v35  ;;  %v4571_v55 = vsel %vm644_vm2, %v4501_v6, %v9940_v11  ;;  %v4502_v10 = vsel %vm644_vm2, %v4497_v34, %v4501_v6 }
 0x518   : > { %v4635_v0 = vmax.f32 %v4313_v62, %v4571_v55  ;;  %v4504_v39 = vsel %vm644_vm2, %v4499_v32, %v4503_v51  ;;  %v4572_v20 = vsel %vm644_vm2, %v4503_v51, %v9942_v16  ;;  %v4685_v54 = vpack.c.bf16 %v4631_v29, %v4629_v56 }
 0x519   : > { %v4634_v3 = vmax.f32 %v4312_v41, %v4504_v39  ;;  %v4636_v49 = vmax.f32 %v4314_v48, %v4572_v20  ;;  %v4686_v47 = vpack.c.bf16 %v4632_v44, %v4630_v23  ;;  %v4633_v46 = vmax.f32 %v4311_v38, %v4502_v10 }
 0x51b   : > { %v4688_v7 = vpack.c.bf16 %v4636_v49, %v4634_v3  ;;  %6477 = vmatprep.mubr.msk.bf16.mxu0 %vm1167_vm4, %v4686_v47  ;;  %v4687_v8 = vpack.c.bf16 %v4635_v0, %v4633_v46 }
 0x51c   : > { %4942 = vmatmul.mubr.bf16.gmra.mrb[184].mxu0 %v4685_v54 }
 0x51d   : > { %6478 = vmatprep.mubr.msk.bf16.mxu0 %vm1167_vm4, %v4688_v7 }
 0x524   : > { %4950 = vmatmul.mubr.bf16.gmra.mrb[188].mxu0 %v4687_v8 }
 0x525   : > { %6489 = vmatprep.mubr.msk.bf16.mxu0 %vm1167_vm4, %v9961_v17 }
 0x52c   : > { %5072 = vmatmul.mubr.bf16.vlgmr.msra.gmra.mrb[192].mxu0 %v9956_v19 }
 0x52d   : > { %6490 = vmatprep.mubr.msk.bf16.mxu0 %vm1167_vm4, %v9977_v31 }
 0x534   : > { %5080 = vmatmul.mubr.bf16.gmra.mrb[196].mxu0 %v9974_v57 }
 0x535   : > { %6491 = vmatprep.mubr.msk.bf16.mxu0 %vm1167_vm4, %v9994_v4 }
 0x53c   : > { %5088 = vmatmul.mubr.bf16.gmra.mrb[200].mxu0 %v9991_v9 }
 0x53d   : > { %6492 = vmatprep.mubr.msk.bf16.mxu0 %vm1167_vm4, %v10011_v5 }
 0x544   : > { %5096 = vmatmul.mubr.bf16.gmra.mrb[204].mxu0 %v10008_v21 }
 0x545   : > { %6493 = vmatprep.mubr.msk.bf16.mxu0 %vm1167_vm4, %v10028_v53 }
 0x54c   : > { %5104 = vmatmul.mubr.bf16.gmra.mrb[208].mxu0 %v10025_v1 }
 0x54d   : > { %6494 = vmatprep.mubr.msk.bf16.mxu0 %vm1167_vm4, %v10045_v27 }
 0x554   : > { %5112 = vmatmul.mubr.bf16.gmra.mrb[212].mxu0 %v10042_v59 }
 0x555   : > { %6495 = vmatprep.mubr.msk.bf16.mxu0 %vm1167_vm4, %v10060_v22 }
 0x55c   : > { %5120 = vmatmul.mubr.bf16.gmra.mrb[216].mxu0 %v10057_v60 }
 0x55d   : > { %6496 = vmatprep.mubr.msk.bf16.mxu0 %vm1167_vm4, %v10075_v30 }
 0x564   : > { %5128 = vmatmul.mubr.bf16.gmra.mrb[220].mxu0 %v10072_v12 }
 0x565   : > { %6497 = vmatprep.mubr.msk.bf16.mxu0 %vm1167_vm4, %v10090_v25 }
 0x56c   : > { %5136 = vmatmul.mubr.bf16.gmra.mrb[224].mxu0 %v10087_v14 }
 0x56d   : > { %6498 = vmatprep.mubr.msk.bf16.mxu0 %vm1167_vm4, %v10105_v63 }
 0x574   : > { %5144 = vmatmul.mubr.bf16.gmra.mrb[228].mxu0 %v10102_v13 }
 0x575   : > { %6499 = vmatprep.mubr.msk.bf16.mxu0 %vm1167_vm4, %v10120_v40 }
 0x57c   : > { %5152 = vmatmul.mubr.bf16.gmra.mrb[232].mxu0 %v10117_v15 }
 0x57d   : > { %6500 = vmatprep.mubr.msk.bf16.mxu0 %vm1167_vm4, %v10135_v37 }
 0x57f   : > { %v10216_v11 = vpop.f32.mrb[128].mxu0 }
 0x580   : > { %v4833_v16 = vpop.f32.mrb[129].mxu0 }
 0x581   : > { %v10218_v19 = vpop.f32.mrb[130].mxu0 }
 0x582   : > { %v4836_v17 = vpop.f32.mrb[131].mxu0 }
 0x584   : > { %5160 = vmatmul.mubr.bf16.gmra.mrb[236].mxu0 %v10132_v52 }
 0x585   : > { %6501 = vmatprep.mubr.msk.bf16.mxu0 %vm1167_vm4, %v10150_v28 }
 0x587   : > { %v10223_v57 = vpop.f32.mrb[132].mxu0 }
 0x588   : > { %v4841_v31 = vpop.f32.mrb[133].mxu0 }
 0x589   : > { %v10225_v9 = vpop.f32.mrb[134].mxu0 }
 0x58a   : > { %v4844_v4 = vpop.f32.mrb[135].mxu0 }
 0x58c   : > { %5168 = vmatmul.mubr.bf16.gmra.mrb[240].mxu0 %v10147_v36 }
 0x58d   : > { %6502 = vmatprep.mubr.msk.bf16.mxu0 %vm1167_vm4, %v10165_v24 }
 0x58f   : > { %v10230_v21 = vpop.f32.mrb[136].mxu0 }
 0x590   : > { %v4849_v5 = vpop.f32.mrb[137].mxu0 }
 0x591   : > { %v10232_v1 = vpop.f32.mrb[138].mxu0  ;;  %v10295_v5 = vld [vmem:[%s11027_s7] sm:$0xff] }
 0x592   : > { %v4852_v53 = vpop.f32.mrb[139].mxu0 }
 0x594   : > { %5176 = vmatmul.mubr.bf16.gmra.mrb[244].mxu0 %v10162_v18 }
 0x595   : > { %6503 = vmatprep.mubr.msk.bf16.mxu0 %vm1167_vm4, %v4686_v47 }
 0x597   : > { %v10236_v59 = vpop.f32.mrb[140].mxu0 }
 0x598   : > { %v4857_v27 = vpop.f32.mrb[141].mxu0 }
 0x599   : > { %v10238_v60 = vpop.f32.mrb[142].mxu0  ;;  %v10299_v27 = vcombine.high %v10295_v5, %v10295_v5 }
 0x59a   : > { %v4860_v22 = vpop.f32.mrb[143].mxu0 }
 0x59b   : > { %5288 = vmatprep.mubr.bf16.mxu1 %v10299_v27 }
 0x59c   : > { %5184 = vmatmul.mubr.bf16.gmra.mrb[248].mxu0 %v4685_v54 }
 0x59d   : > { %6504 = vmatprep.mubr.msk.bf16.mxu0 %vm1167_vm4, %v4688_v7 }
 0x59f   : > { %v10241_v12 = vpop.f32.mrb[144].mxu0 }
 0x5a0   : > { %v4865_v30 = vpop.f32.mrb[145].mxu0 }
 0x5a1   : > { %v10243_v14 = vpop.f32.mrb[146].mxu0 }
 0x5a2   : > { %v4868_v25 = vpop.f32.mrb[147].mxu0 }
 0x5a4   : > { %5192 = vmatmul.mubr.bf16.gmra.mrb[252].mxu0 %v4687_v8 }
 0x5a5   : > { %5625 = vmatprep.mubr.bf16.mxu0 %v10299_v27 }
 0x5a7   : > { %v10245_v13 = vpop.f32.mrb[148].mxu0 }
 0x5a8   : > { %v4873_v63 = vpop.f32.mrb[149].mxu0 }
 0x5a9   : > { %v10247_v15 = vpop.f32.mrb[150].mxu0 }
 0x5aa   : > { %v4876_v40 = vpop.f32.mrb[151].mxu0 }
 0x5af   : > { %v10249_v52 = vpop.f32.mrb[152].mxu0 }
 0x5b0   : > { %v4881_v37 = vpop.f32.mrb[153].mxu0 }
 0x5b1   : > { %v10251_v36 = vpop.f32.mrb[154].mxu0 }
 0x5b2   : > { %v4884_v28 = vpop.f32.mrb[155].mxu0 }
 0x5b7   : > { %v10253_v43 = vpop.f32.mrb[156].mxu0 }
 0x5b8   : > { %v4889_v2 = vpop.f32.mrb[157].mxu0 }
 0x5b9   : > { %v10255_v42 = vpop.f32.mrb[158].mxu0 }
 0x5ba   : > { %v4892_v33 = vpop.f32.mrb[159].mxu0 }
 0x5bf   : > { %v10257_v18 = vpop.f32.mrb[160].mxu0 }
 0x5c0   : > { %v4897_v56 = vpop.f32.mrb[161].mxu0 }
 0x5c1   : > { %v10259_v23 = vpop.f32.mrb[162].mxu0 }
 0x5c2   : > { %v4900_v38 = vpop.f32.mrb[163].mxu0 }
 0x5c7   : > { %v10261_v50 = vpop.f32.mrb[164].mxu0 }
 0x5c8   : > { %v4905_v61 = vpop.f32.mrb[165].mxu0 }
 0x5c9   : > { %v10263_v24 = vpop.f32.mrb[166].mxu0 }
 0x5ca   : > { %v4908_v41 = vpop.f32.mrb[167].mxu0 }
 0x5cf   : > { %v10265_v58 = vpop.f32.mrb[168].mxu0 }
 0x5d0   : > { %v4913_v34 = vpop.f32.mrb[169].mxu0 }
 0x5d1   : > { %v10267_v62 = vpop.f32.mrb[170].mxu0 }
 0x5d2   : > { %v4916_v32 = vpop.f32.mrb[171].mxu0 }
 0x5d7   : > { %v10269_v48 = vpop.f32.mrb[172].mxu0 }
 0x5d8   : > { %v4921_v6 = vpop.f32.mrb[173].mxu0 }
 0x5d9   : > { %v10271_v26 = vpop.f32.mrb[174].mxu0 }
 0x5da   : > { %v4924_v35 = vpop.f32.mrb[175].mxu0 }
 0x5df   : > { %v10273_v51 = vpop.f32.mrb[176].mxu0 }
 0x5e0   : > { %v4929_v29 = vpop.f32.mrb[177].mxu0 }
 0x5e1   : > { %v10275_v44 = vpop.f32.mrb[178].mxu0 }
 0x5e2   : > { %v4932_v55 = vpop.f32.mrb[179].mxu0 }
 0x5e7   : > { %v10277_v10 = vpop.f32.mrb[180].mxu0 }
 0x5e8   : > { %v4937_v0 = vpop.f32.mrb[181].mxu0 }
 0x5e9   : > { %v10279_v39 = vpop.f32.mrb[182].mxu0 }
 0x5ea   : > { %v4940_v20 = vpop.f32.mrb[183].mxu0 }
 0x5ef   : > { %v10281_v54 = vpop.f32.mrb[184].mxu0 }
 0x5f0   : > { %v4945_v3 = vpop.f32.mrb[185].mxu0 }
 0x5f1   : > { %v10283_v49 = vpop.f32.mrb[186].mxu0 }
 0x5f2   : > { %v4948_v47 = vpop.f32.mrb[187].mxu0 }
 0x5f7   : > { %v10285_v46 = vpop.f32.mrb[188].mxu0 }
 0x5f8   : > { %v4953_v7 = vpop.f32.mrb[189].mxu0 }
 0x5f9   : > { %v10287_v8 = vpop.f32.mrb[190].mxu0 }
 0x5fa   : > { %v4956_v16 = vpop.f32.mrb[191].mxu0 }
 0x5ff   : > { %v5073_v17 = vpop.f32.mrb[192].mxu0 }
 0x600   : > { %v10290_v31 = vmax.f32 %v10216_v11, %v5073_v17  ;;  %v5075_v4 = vpop.f32.mrb[193].mxu0 }
 0x601   : > { %v5076_v53 = vpop.f32.mrb[194].mxu0 }
 0x602   : > { %v10302_v22 = vmax.f32 %v10218_v19, %v5076_v53  ;;  %v5078_v30 = vpop.f32.mrb[195].mxu0 }
 0x604   : > { %v11060_v37 = vrot.slane %v10302_v22, 4 }
 0x607   : > { %v5081_v11 = vpop.f32.mrb[196].mxu0 }
 0x608   : > { %v10307_v25 = vmax.f32 %v10223_v57, %v5081_v11  ;;  %v5083_v63 = vpop.f32.mrb[197].mxu0 }
 0x609   : > { %v5084_v40 = vpop.f32.mrb[198].mxu0 }
 0x60a   : > { %v5331_v28 = vrot.slane %v10307_v25, 4  ;;  %v10314_v19 = vmax.f32 %v10225_v9, %v5084_v40  ;;  %v5086_v33 = vpop.f32.mrb[199].mxu0 }
 0x60c   : > { %v10318_v56 = vpack.c.bf16 %v10314_v19, %v10307_v25  ;;  %v5333_v57 = vrot.slane %v10314_v19, 4  ;;  %v10324_v38 = vsel %vm778_vm3, %v11060_v37, %v5331_v28 }
 0x60e   : > { %v10327_v61 = vsel %vm778_vm3, %v5331_v28, %v5333_v57 }
 0x60f   : > { %v5089_v41 = vpop.f32.mrb[200].mxu0 }
 0x610   : > { %v10332_v34 = vmax.f32 %v10230_v21, %v5089_v41  ;;  %v5091_v32 = vpop.f32.mrb[201].mxu0 }
 0x611   : > { %v5092_v6 = vpop.f32.mrb[202].mxu0 }
 0x612   : > { %v5335_v35 = vrot.slane %v10332_v34, 4  ;;  %v10338_v55 = vmax.f32 %v10232_v1, %v5092_v6  ;;  %v5094_v0 = vpop.f32.mrb[203].mxu0 }
 0x614   : > { %11116 = vst [vmem:[#allocation20_spill] sm:$0xff] %v10338_v55  ;;  %v10342_v20 = vpack.c.bf16 %v10338_v55, %v10332_v34  ;;  %v5337_v3 = vrot.slane %v10338_v55, 4  ;;  %v10346_v21 = vsel %vm778_vm3, %v5333_v57, %v5335_v35 }
 0x616   : > { %v10351_v7 = vsel %vm778_vm3, %v5335_v35, %v5337_v3 }
 0x617   : > { %v5097_v16 = vpop.f32.mrb[204].mxu0 }
 0x618   : > { %v10356_v17 = vmax.f32 %v10236_v59, %v5097_v16  ;;  %v5099_v4 = vpop.f32.mrb[205].mxu0 }
 0x619   : > { %v5100_v53 = vpop.f32.mrb[206].mxu0 }
 0x61a   : > { %v5339_v30 = vrot.slane %v10356_v17, 4  ;;  %v10362_v63 = vmax.f32 %v10238_v60, %v5100_v53  ;;  %v5102_v40 = vpop.f32.mrb[207].mxu0 }
 0x61c   : > { %11117 = vst [vmem:[#allocation21_spill] sm:$0xff] %v10362_v63  ;;  %v10366_v28 = vpack.c.bf16 %v10362_v63, %v10356_v17  ;;  %v5341_v33 = vrot.slane %v10362_v63, 4  ;;  %v10370_v59 = vsel %vm778_vm3, %v5337_v3, %v5339_v30 }
 0x61e   : > { %v10375_v41 = vsel %vm778_vm3, %v5339_v30, %v5341_v33 }
 0x61f   : > { %v5105_v32 = vpop.f32.mrb[208].mxu0 }
 0x620   : > { %v10380_v6 = vmax.f32 %v10241_v12, %v5105_v32  ;;  %v5107_v35 = vpop.f32.mrb[209].mxu0 }
 0x621   : > { %v5108_v0 = vpop.f32.mrb[210].mxu0 }
 0x622   : > { %11118 = vst [vmem:[#allocation22_spill] sm:$0xff] %v10380_v6  ;;  %v5343_v16 = vrot.slane %v10380_v6, 4  ;;  %v10386_v4 = vmax.f32 %v10243_v14, %v5108_v0  ;;  %v5110_v53 = vpop.f32.mrb[211].mxu0 }
 0x624   : > { %11119 = vst [vmem:[#allocation23_spill] sm:$0xff] %v10386_v4  ;;  %v10390_v30 = vpack.c.bf16 %v10386_v4, %v10380_v6  ;;  %v5345_v40 = vrot.slane %v10386_v4, 4  ;;  %v10394_v12 = vsel %vm778_vm3, %v5341_v33, %v5343_v16 }
 0x626   : > { %v10399_v35 = vsel %vm778_vm3, %v5343_v16, %v5345_v40 }
 0x627   : > { %v5113_v60 = vpop.f32.mrb[212].mxu0 }
 0x628   : > { %v10404_v0 = vmax.f32 %v10245_v13, %v5113_v60  ;;  %v5115_v53 = vpop.f32.mrb[213].mxu0 }
 0x629   : > { %v5116_v1 = vpop.f32.mrb[214].mxu0 }
 0x62a   : > { %11120 = vst [vmem:[#allocation24_spill] sm:$0xff] %v10404_v0  ;;  %v5347_v9 = vrot.slane %v10404_v0, 4  ;;  %v10410_v3 = vmax.f32 %v10247_v15, %v5116_v1  ;;  %v5118_v11 = vpop.f32.mrb[215].mxu0 }
 0x62c   : > { %11121 = vst [vmem:[#allocation25_spill] sm:$0xff] %v10410_v3  ;;  %v10414_v16 = vpack.c.bf16 %v10410_v3, %v10404_v0  ;;  %v5349_v14 = vrot.slane %v10410_v3, 4  ;;  %v10418_v13 = vsel %vm778_vm3, %v5345_v40, %v5347_v9 }
 0x62e   : > { %v10423_v53 = vsel %vm778_vm3, %v5347_v9, %v5349_v14 }
 0x62f   : > { %v5121_v33 = vpop.f32.mrb[216].mxu0 }
 0x630   : > { %v10428_v1 = vmax.f32 %v10249_v52, %v5121_v33  ;;  %v5123_v11 = vpop.f32.mrb[217].mxu0 }
 0x631   : > { %v5124_v29 = vpop.f32.mrb[218].mxu0 }
 0x632   : > { %11122 = vst [vmem:[#allocation26_spill] sm:$0xff] %v10428_v1  ;;  %v5351_v2 = vrot.slane %v10428_v1, 4  ;;  %v10434_v32 = vmax.f32 %v10251_v36, %v5124_v29  ;;  %v5126_v60 = vpop.f32.mrb[219].mxu0 }
 0x634   : > { %11123 = vst [vmem:[#allocation27_spill] sm:$0xff] %v10434_v32  ;;  %v10438_v9 = vpack.c.bf16 %v10434_v32, %v10428_v1  ;;  %v5353_v15 = vrot.slane %v10434_v32, 4  ;;  %v10442_v52 = vsel %vm778_vm3, %v5349_v14, %v5351_v2 }
 0x636   : > { %v10447_v11 = vsel %vm778_vm3, %v5351_v2, %v5353_v15 }
 0x637   : > { %v5129_v40 = vpop.f32.mrb[220].mxu0 }
 0x638   : > { %v10452_v29 = vmax.f32 %v10253_v43, %v5129_v40  ;;  %v5131_v60 = vpop.f32.mrb[221].mxu0 }
 0x639   : > { %v5132_v57 = vpop.f32.mrb[222].mxu0 }
 0x63a   : > { %11124 = vst [vmem:[#allocation28_spill] sm:$0xff] %v10452_v29  ;;  %v5355_v47 = vrot.slane %v10452_v29, 4  ;;  %v10458_v37 = vmax.f32 %v10255_v42, %v5132_v57  ;;  %v5134_v33 = vpop.f32.mrb[223].mxu0 }
 0x63c   : > { %11125 = vst [vmem:[#allocation29_spill] sm:$0xff] %v10458_v37  ;;  %v10462_v2 = vpack.c.bf16 %v10458_v37, %v10452_v29  ;;  %v5357_v36 = vrot.slane %v10458_v37, 4  ;;  %v10466_v43 = vsel %vm778_vm3, %v5353_v15, %v5355_v47 }
 0x63e   : > { %v10471_v60 = vsel %vm778_vm3, %v5355_v47, %v5357_v36 }
 0x63f   : > { %v5137_v14 = vpop.f32.mrb[224].mxu0 }
 0x640   : > { %v10476_v57 = vmax.f32 %v10257_v18, %v5137_v14  ;;  %v5139_v33 = vpop.f32.mrb[225].mxu0  ;;  %v10494_v14 = vpack.c.bf16 %v10302_v22, %v10290_v31 }
 0x641   : > { %v5140_v32 = vpop.f32.mrb[226].mxu0 }
 0x642   : > { %11126 = vst [vmem:[#allocation30_spill] sm:$0xff] %v10476_v57  ;;  %v5359_v29 = vrot.slane %v10476_v57, 4  ;;  %v10482_v3 = vmax.f32 %v10259_v23, %v5140_v32  ;;  %v5142_v40 = vpop.f32.mrb[227].mxu0 }
 0x644   : > { %v5361_v47 = vrot.slane %v10482_v3, 4  ;;  %v10487_v1 = vpack.c.bf16 %v10482_v3, %v10476_v57  ;;  %v10490_v18 = vsel %vm778_vm3, %v5357_v36, %v5359_v29 }
 0x646   : > { %6556 = vmatprep.subr.bf16.mxu1 %v10487_v1  ;;  %v10500_v23 = vsel %vm778_vm3, %v5359_v29, %v5361_v47 }
 0x647   : > { %v5145_v32 = vpop.f32.mrb[228].mxu0  ;;  %6557 = vmatpush3.bf16.msra.mxu1 %v10494_v14 }
 0x648   : > { %v10506_v36 = vmax.f32 %v10261_v50, %v5145_v32  ;;  %v5147_v42 = vpop.f32.mrb[229].mxu0 }
 0x649   : > { %v5148_v15 = vpop.f32.mrb[230].mxu0 }
 0x64a   : > { %v5363_v37 = vrot.slane %v10506_v36, 4  ;;  %v10510_v33 = vmax.f32 %v10263_v24, %v5148_v15  ;;  %v5150_v57 = vpop.f32.mrb[231].mxu0 }
 0x64c   : > { %v5365_v4 = vrot.slane %v10510_v33, 4  ;;  %v5242_v0 = vpack.c.bf16 %v10510_v33, %v10506_v36  ;;  %v10518_v40 = vsel %vm778_vm3, %v5361_v47, %v5363_v37 }
 0x64e   : > { %6558 = vmatprep.subr.bf16.mxu1 %v5242_v0  ;;  %6644 = vmatprep.subr.bf16.mxu0 %v5242_v0  ;;  %v10523_v24 = vsel %vm778_vm3, %v5363_v37, %v5365_v4 }
 0x64f   : > { %v5153_v42 = vpop.f32.mrb[232].mxu0  ;;  %6559 = vmatpush3.bf16.msra.mxu1 %v10318_v56  ;;  %6645 = vmatpush3.bf16.msra.mxu0 %v10318_v56 }
 0x650   : > { %v10530_v15 = vmax.f32 %v10265_v58, %v5153_v42  ;;  %v5155_v47 = vpop.f32.mrb[233].mxu0 }
 0x651   : > { %v5156_v32 = vpop.f32.mrb[234].mxu0 }
 0x652   : > { %v5367_v29 = vrot.slane %v10530_v15, 4  ;;  %v10534_v0 = vmax.f32 %v10267_v62, %v5156_v32  ;;  %v5158_v37 = vpop.f32.mrb[235].mxu0 }
 0x654   : > { %v5369_v63 = vrot.slane %v10534_v0, 4  ;;  %v5243_v56 = vpack.c.bf16 %v10534_v0, %v10530_v15  ;;  %v10542_v57 = vsel %vm778_vm3, %v5365_v4, %v5367_v29 }
 0x656   : > { %6560 = vmatprep.subr.bf16.mxu1 %v5243_v56  ;;  %6646 = vmatprep.subr.bf16.mxu0 %v5243_v56  ;;  %v10547_v62 = vsel %vm778_vm3, %v5367_v29, %v5369_v63 }
 0x657   : > { %v5161_v42 = vpop.f32.mrb[236].mxu0  ;;  %6561 = vmatpush3.bf16.msra.mxu1 %v10342_v20  ;;  %6647 = vmatpush3.bf16.msra.mxu0 %v10342_v20 }
 0x658   : > { %v10554_v32 = vmax.f32 %v10269_v48, %v5161_v42  ;;  %v5163_v4 = vpop.f32.mrb[237].mxu0 }
 0x659   : > { %v5164_v37 = vpop.f32.mrb[238].mxu0 }
 0x65a   : > { %v5371_v50 = vrot.slane %v10554_v32, 4  ;;  %v10558_v56 = vmax.f32 %v10271_v26, %v5164_v37  ;;  %v5166_v29 = vpop.f32.mrb[239].mxu0 }
 0x65c   : > { %11127 = vst [vmem:[#allocation31_spill] sm:$0xff] %v10558_v56  ;;  %v5373_v6 = vrot.slane %v10558_v56, 4  ;;  %v5244_v20 = vpack.c.bf16 %v10558_v56, %v10554_v32  ;;  %v10566_v47 = vsel %vm778_vm3, %v5369_v63, %v5371_v50 }
 0x65e   : > { %6562 = vmatprep.subr.bf16.mxu1 %v5244_v20  ;;  %6648 = vmatprep.subr.bf16.mxu0 %v5244_v20  ;;  %v10571_v26 = vsel %vm778_vm3, %v5371_v50, %v5373_v6 }
 0x65f   : > { %v5169_v42 = vpop.f32.mrb[240].mxu0  ;;  %6563 = vmatpush3.bf16.msra.mxu1 %v10366_v28  ;;  %6649 = vmatpush3.bf16.msra.mxu0 %v10366_v28 }
 0x660   : > { %v10578_v37 = vmax.f32 %v10273_v51, %v5169_v42  ;;  %v5171_v63 = vpop.f32.mrb[241].mxu0 }
 0x661   : > { %v5172_v29 = vpop.f32.mrb[242].mxu0 }
 0x662   : > { %v5375_v58 = vrot.slane %v10578_v37, 4  ;;  %v10582_v20 = vmax.f32 %v10275_v44, %v5172_v29  ;;  %v5174_v50 = vpop.f32.mrb[243].mxu0 }
 0x664   : > { %11128 = vst [vmem:[#allocation32_spill] sm:$0xff] %v10582_v20  ;;  %v5377_v55 = vrot.slane %v10582_v20, 4  ;;  %v5245_v28 = vpack.c.bf16 %v10582_v20, %v10578_v37  ;;  %v10590_v4 = vsel %vm778_vm3, %v5373_v6, %v5375_v58 }
 0x666   : > { %6564 = vmatprep.subr.bf16.mxu1 %v5245_v28  ;;  %6650 = vmatprep.subr.bf16.mxu0 %v5245_v28  ;;  %v10595_v44 = vsel %vm778_vm3, %v5375_v58, %v5377_v55 }
 0x667   : > { %11129 = vst [vmem:[#allocation33_spill] sm:$0xff] %v10595_v44  ;;  %v5177_v42 = vpop.f32.mrb[244].mxu0  ;;  %6565 = vmatpush3.bf16.msra.mxu1 %v10390_v30  ;;  %6651 = vmatpush3.bf16.msra.mxu0 %v10390_v30 }
 0x668   : > { %v10602_v29 = vmax.f32 %v10277_v10, %v5177_v42  ;;  %v5179_v6 = vpop.f32.mrb[245].mxu0 }
 0x669   : > { %v5180_v50 = vpop.f32.mrb[246].mxu0 }
 0x66a   : > { %11130 = vst [vmem:[#allocation34_spill] sm:$0xff] %v10602_v29  ;;  %v5379_v48 = vrot.slane %v10602_v29, 4  ;;  %v10606_v28 = vmax.f32 %v10279_v39, %v5180_v50  ;;  %v5182_v58 = vpop.f32.mrb[247].mxu0 }
 0x66c   : > { %11131 = vst [vmem:[#allocation35_spill] sm:$0xff] %v10606_v28  ;;  %v5381_v56 = vrot.slane %v10606_v28, 4  ;;  %v5246_v30 = vpack.c.bf16 %v10606_v28, %v10602_v29  ;;  %v10614_v63 = vsel %vm778_vm3, %v5377_v55, %v5379_v48 }
 0x66d   : > { %11132 = vst [vmem:[#allocation36_spill] sm:$0xff] %v10614_v63  ;;  %v5437_v10 = vpack.c.bf16 %v10614_v63, %v10595_v44 }
 0x66e   : > { %6566 = vmatprep.subr.bf16.mxu1 %v5246_v30  ;;  %6652 = vmatprep.subr.bf16.mxu0 %v5246_v30  ;;  %v10619_v39 = vsel %vm778_vm3, %v5379_v48, %v5381_v56 }
 0x66f   : > { %11133 = vst [vmem:[#allocation37_spill] sm:$0xff] %v10619_v39  ;;  %v5185_v42 = vpop.f32.mrb[248].mxu0  ;;  %6567 = vmatpush3.bf16.msra.mxu1 %v10414_v16  ;;  %6653 = vmatpush3.bf16.msra.mxu0 %v10414_v16 }
 0x670   : > { %v10626_v50 = vmax.f32 %v10281_v54, %v5185_v42  ;;  %v5187_v55 = vpop.f32.mrb[249].mxu0 }
 0x671   : > { %v5188_v58 = vpop.f32.mrb[250].mxu0 }
 0x672   : > { %11134 = vst [vmem:[#allocation38_spill] sm:$0xff] %v10626_v50  ;;  %v5383_v51 = vrot.slane %v10626_v50, 4  ;;  %v10630_v30 = vmax.f32 %v10283_v49, %v5188_v58  ;;  %v5190_v48 = vpop.f32.mrb[251].mxu0 }
 0x674   : > { %v5385_v20 = vrot.slane %v10630_v30, 4  ;;  %v5247_v16 = vpack.c.bf16 %v10630_v30, %v10626_v50  ;;  %v10638_v6 = vsel %vm778_vm3, %v5381_v56, %v5383_v51 }
 0x675   : > { %v5438_v54 = vpack.c.bf16 %v10638_v6, %v10619_v39 }
 0x676   : > { %6568 = vmatprep.subr.bf16.mxu1 %v5247_v16  ;;  %6654 = vmatprep.subr.bf16.mxu0 %v5247_v16  ;;  %v10643_v49 = vsel %vm778_vm3, %v5383_v51, %v5385_v20  ;;  %v5328_v51 = vrot.slane %v10290_v31, 4 }
 0x677   : > { %v5193_v42 = vpop.f32.mrb[252].mxu0  ;;  %6569 = vmatpush3.bf16.msra.mxu1 %v10438_v9  ;;  %6655 = vmatpush3.bf16.msra.mxu0 %v10438_v9  ;;  %v5550_v55 = vpack.c.bf16 %v10643_v49, %v10638_v6 }
 0x678   : > { %v5230_v58 = vmax.f32 %v10285_v46, %v5193_v42  ;;  %v5195_v56 = vpop.f32.mrb[253].mxu0  ;;  %v10660_v46 = vcombine.low %v10295_v5, %v10295_v5  ;;  %v11135_v5 = vpack.c.bf16 %v10518_v40, %v10500_v23  ;;  %v11141_v42 = vpack.c.bf16 %v10590_v4, %v10571_v26 }
 0x679   : > { %v5196_v48 = vpop.f32.mrb[254].mxu0  ;;  %v11143_v56 = vpack.c.bf16 %v10418_v13, %v10399_v35 }
 0x67a   : > { %v5387_v44 = vrot.slane %v5230_v58, 4  ;;  %v5231_v63 = vmax.f32 %v10287_v8, %v5196_v48  ;;  %v5198_v39 = vpop.f32.mrb[255].mxu0  ;;  %v5495_v16 = vpack.c.bf16 %v5230_v58, %v10630_v30  ;;  %v11144_v48 = vpack.c.bf16 %v10442_v52, %v10423_v53 }
 0x67c   : > { %v5389_v28 = vrot.slane %v5231_v63, 4  ;;  %v5248_v50 = vpack.c.bf16 %v5231_v63, %v5230_v58  ;;  %v10654_v29 = vsel %vm778_vm3, %v5385_v20, %v5387_v44  ;;  %v11142_v58 = vpack.c.bf16 %v10394_v12, %v10375_v41 }
 0x67d   : > { %v5439_v9 = vpack.c.bf16 %v10654_v29, %v10643_v49 }
 0x67e   : > { %6570 = vmatprep.subr.bf16.mxu1 %v5248_v50  ;;  %6656 = vmatprep.subr.bf16.mxu0 %v5248_v50  ;;  %v10663_v8 = vsel %vm778_vm3, %v5387_v44, %v5389_v28  ;;  %v10666_v39 = vsel %vm778_vm3, %v5389_v28, %v5328_v51  ;;  %v11136_v44 = vrot.slane %v10302_v22, 4 }
 0x67f   : > { %6571 = vmatpush3.bf16.msra.mxu1 %v10462_v2  ;;  %6657 = vmatpush3.bf16.msra.mxu0 %v10462_v2  ;;  %v5440_v20 = vpack.c.bf16 %v10666_v39, %v10663_v8  ;;  %v5551_v50 = vpack.c.bf16 %v10663_v8, %v10654_v29  ;;  %v11137_v2 = vpack.c.bf16 %v10542_v57, %v10523_v24 }
 0x680   : > { %6578 = vmatprep.subr.bf16.mxu1 %v11135_v5  ;;  %6658 = vmatprep.subr.bf16.mxu0 %v10494_v14  ;;  %v5330_v28 = vsel %vm778_vm3, %v5328_v51, %v11136_v44  ;;  %v11138_v14 = vpack.c.bf16 %v10346_v21, %v10327_v61  ;;  %v11139_v29 = vpack.c.bf16 %v10566_v47, %v10547_v62  ;;  %v11156_v44 = vld [vmem:[#allocation22_spill] sm:$0xff] }
 0x681   : > { %v5425_v30 = vpack.c.bf16 %v10324_v38, %v5330_v28  ;;  %v11145_v51 = vpack.c.bf16 %v10466_v43, %v10447_v11  ;;  %v11146_v8 = vpack.c.bf16 %v10490_v18, %v10471_v60 }
 0x682   : > { %5289 = vmatmul.mubr.bf16.vlgmr.msra.gmra.mrb[128].mxu1 %v10660_v46 }
 0x683   : > { %6579 = vmatpush3.bf16.msra.mxu1 %v5425_v30  ;;  %6659 = vmatpush3.bf16.msra.mxu0 %v10487_v1  ;;  %v11140_v1 = vpack.c.bf16 %v10370_v59, %v10351_v7  ;;  %v11157_v30 = vld [vmem:[#allocation21_spill] sm:$0xff] }
 0x684   : > { %6580 = vmatprep.subr.bf16.mxu1 %v11137_v2  ;;  %5473 = vmatprep.mubr.bf16.mxu1 %v10299_v27  ;;  %v11160_v2 = vld [vmem:[#allocation32_spill] sm:$0xff] }
 0x685   : > { %5909 = vmatprep.subr.bf16.mxu0 %v11109_v45 }
 0x686   : > { %5626 = vmatmul.mubr.bf16.vlgmr.msra.gmra.mrb[0].mxu0 %v10660_v46 }
 0x687   : > { %6581 = vmatpush3.bf16.msra.mxu1 %v11138_v14  ;;  %v11163_v14 = vld [vmem:[#allocation23_spill] sm:$0xff] }
 0x688   : > { %6582 = vmatprep.subr.bf16.mxu1 %v11139_v29  ;;  %v11166_v29 = vld [vmem:[#allocation35_spill] sm:$0xff] }
 0x68b   : > { %6583 = vmatpush3.bf16.msra.mxu1 %v11140_v1  ;;  %v11168_v1 = vld [vmem:[#allocation26_spill] sm:$0xff] }
 0x68c   : > { %6584 = vmatprep.subr.bf16.mxu1 %v11141_v42  ;;  %v11169_v42 = vld [vmem:[#allocation25_spill] sm:$0xff] }
 0x68f   : > { %6585 = vmatpush3.bf16.msra.mxu1 %v11142_v58  ;;  %v5496_v58 = vpack.c.bf16 %v10290_v31, %v5231_v63  ;;  %v11179_v31 = vpack.c.bf16 %v10547_v62, %v10542_v57  ;;  %v11180_v63 = vpack.c.bf16 %v10351_v7, %v10346_v21  ;;  %v11186_v57 = vld [vmem:[#allocation37_spill] sm:$0xff]  ;;  %v11187_v62 = vld [vmem:[#allocation36_spill] sm:$0xff]  ;;  %v11189_v7 = vpack.c.bf16 %v10423_v53, %v10418_v13 }
 0x690   : > { %6586 = vmatprep.subr.bf16.mxu1 %v5437_v10  ;;  %v11147_v10 = vpack.c.bf16 %v10506_v36, %v10482_v3  ;;  %v11151_v3 = vpack.c.bf16 %v10554_v32, %v10534_v0  ;;  %v11152_v36 = vld [vmem:[#allocation20_spill] sm:$0xff]  ;;  %v11165_v32 = vld [vmem:[#allocation38_spill] sm:$0xff]  ;;  %v11188_v21 = vpack.c.bf16 %v11186_v57, %v11187_v62 }
 0x691   : > { %v11153_v5 = vpack.c.bf16 %v10356_v17, %v11152_v36  ;;  %v11167_v17 = vpack.c.bf16 %v11165_v32, %v11166_v29  ;;  %v7676_v36 = vld [vmem:[%s11028_s8 + $0x58] sm:$0xff]   ;;  %v7685_v32 = vld [vmem:[%s11028_s8 + $0x70] sm:$0xff]  }
 0x692   : > { %v7687_v29 = vld [vmem:[%s11028_s8 + $0xb0] sm:$0xff]  }
 0x693   : > { %6587 = vmatpush3.bf16.msra.mxu1 %v11143_v56  ;;  %v11171_v56 = vld [vmem:[#allocation28_spill] sm:$0xff] }
 0x694   : > { %6588 = vmatprep.subr.bf16.mxu1 %v5438_v54  ;;  %v11148_v54 = vpack.c.bf16 %v10307_v25, %v10302_v22  ;;  %v11154_v22 = vld [vmem:[#allocation31_spill] sm:$0xff] }
 0x695   : > { %v11155_v25 = vpack.c.bf16 %v10578_v37, %v11154_v22  ;;  %v11170_v37 = vpack.c.bf16 %v11168_v1, %v11169_v42 }
 0x697   : > { %6589 = vmatpush3.bf16.msra.mxu1 %v11144_v48  ;;  %v11172_v48 = vld [vmem:[#allocation27_spill] sm:$0xff] }
 0x698   : > { %6590 = vmatprep.subr.bf16.mxu1 %v5439_v9  ;;  %v11149_v9 = vpack.c.bf16 %v10530_v15, %v10510_v33  ;;  %v11158_v33 = vpack.c.bf16 %v11156_v44, %v11157_v30  ;;  %v11159_v15 = vld [vmem:[#allocation34_spill] sm:$0xff]  ;;  %v7678_v44 = vld [vmem:[%s11028_s8 + $0x98] sm:$0xff]  }
 0x69b   : > { %6591 = vmatpush3.bf16.msra.mxu1 %v11145_v51  ;;  %v11173_v51 = vpack.c.bf16 %v11171_v56, %v11172_v48  ;;  %v7690_v48 = vld [vmem:[%s11028_s8 + $0xb8] sm:$0xff]  }
 0x69c   : > { %6592 = vmatprep.subr.bf16.mxu1 %v5440_v20  ;;  %v11150_v20 = vpack.c.bf16 %v10332_v34, %v10314_v19  ;;  %v11161_v19 = vpack.c.bf16 %v11159_v15, %v11160_v2  ;;  %v11162_v34 = vld [vmem:[#allocation24_spill] sm:$0xff]  ;;  %v7679_v15 = vld [vmem:[%s11028_s8 + $0x60] sm:$0xff]  }
 0x69d   : > { %v11164_v0 = vpack.c.bf16 %v11162_v34, %v11163_v14  ;;  %v7681_v2 = vld [vmem:[%s11028_s8 + $0xa0] sm:$0xff]   ;;  %v7682_v34 = vld [vmem:[%s11028_s8 + $0x68] sm:$0xff]  }
 0x69e   : > { %v7684_v14 = vld [vmem:[%s11028_s8 + $0xa8] sm:$0xff]  }
 0x69f   : > { %6593 = vmatpush3.bf16.msra.mxu1 %v11146_v8  ;;  %v11174_v8 = vld [vmem:[#allocation30_spill] sm:$0xff] }
 0x6a0   : > { %6600 = vmatprep.subr.bf16.mxu1 %v11147_v10  ;;  %v11175_v10 = vld [vmem:[#allocation29_spill] sm:$0xff] }
 0x6a2   : > { %5474 = vmatmul.mubr.bf16.vlgmr.msra.gmra.mrb[132].mxu1 %v10660_v46 }
 0x6a3   : > { %6601 = vmatpush3.bf16.msra.mxu1 %v11148_v54  ;;  %5529 = vmatprep.mubr.bf16.mxu1 %v10299_v27  ;;  %v11176_v54 = vpack.c.bf16 %v11174_v8, %v11175_v10  ;;  %v7691_v8 = vld [vmem:[%s11028_s8 + $0xc0] sm:$0xff]   ;;  %v7689_v10 = vld [vmem:[%s11028_s8 + $0x38] sm:$0xff]  }
 0x6a4   : > { %6602 = vmatprep.subr.bf16.mxu1 %v11149_v9  ;;  %v11177_v9 = vpack.c.bf16 %v10523_v24, %v10518_v40  ;;  %v11181_v40 = vpack.c.bf16 %v10571_v26, %v10566_v47  ;;  %v11182_v24 = vpack.c.bf16 %v10375_v41, %v10370_v59  ;;  %v11190_v59 = vpack.c.bf16 %v10447_v11, %v10442_v52 }
 0x6a5   : > { %v5552_v41 = vpack.c.bf16 %v5330_v28, %v10666_v39  ;;  %v7671_v39 = vld [vmem:[%s11028_s8 + $0x8] sm:$0xff]   ;;  %v7675_v28 = vld [vmem:[%s11028_s8 + $0x90] sm:$0xff]  }
 0x6a7   : > { %6603 = vmatpush3.bf16.msra.mxu1 %v11150_v20  ;;  %v7674_v20 = vld [vmem:[%s11028_s8 + $0x10] sm:$0xff]  }
 0x6a8   : > { %6604 = vmatprep.subr.bf16.mxu1 %v11151_v3 }
 0x6ab   : > { %6605 = vmatpush3.bf16.msra.mxu1 %v11153_v5 }
 0x6ac   : > { %6606 = vmatprep.subr.bf16.mxu1 %v11155_v25 }
 0x6af   : > { %6607 = vmatpush3.bf16.msra.mxu1 %v11158_v33  ;;  %v7677_v33 = vld [vmem:[%s11028_s8 + $0x18] sm:$0xff]  }
 0x6b0   : > { %6608 = vmatprep.subr.bf16.mxu1 %v11161_v19  ;;  %v7680_v19 = vld [vmem:[%s11028_s8 + $0x20] sm:$0xff]  }
 0x6b3   : > { %6609 = vmatpush3.bf16.msra.mxu1 %v11164_v0  ;;  %v7683_v0 = vld [vmem:[%s11028_s8 + $0x28] sm:$0xff]  }
 0x6b4   : > { %6610 = vmatprep.subr.bf16.mxu1 %v11167_v17  ;;  %v7686_v17 = vld [vmem:[%s11028_s8 + $0x30] sm:$0xff]  }
 0x6b7   : > { %6611 = vmatpush3.bf16.msra.mxu1 %v11170_v37 }
 0x6b8   : > { %6612 = vmatprep.subr.bf16.mxu1 %v5495_v16  ;;  %v11178_v16 = vpack.c.bf16 %v10327_v61, %v10324_v38  ;;  %v11183_v38 = vld [vmem:[#allocation33_spill] sm:$0xff] }
 0x6b9   : > { %v11184_v61 = vpack.c.bf16 %v11183_v38, %v10590_v4 }
 0x6bb   : > { %6613 = vmatpush3.bf16.msra.mxu1 %v11173_v51  ;;  %v7688_v51 = vld [vmem:[%s11028_s8 + $0x78] sm:$0xff]  }
 0x6bc   : > { %6614 = vmatprep.subr.bf16.mxu1 %v5496_v58 }
 0x6bf   : > { %6615 = vmatpush3.bf16.msra.mxu1 %v11176_v54  ;;  %v7913_v54 = vmov 0.0  }
 0x6c0   : > { %6622 = vmatprep.subr.bf16.mxu1 %v11177_v9 }
 0x6c2   : > { %5530 = vmatmul.mubr.bf16.vlgmr.msra.gmra.mrb[136].mxu1 %v10660_v46 }
 0x6c3   : > { %6623 = vmatpush3.bf16.msra.mxu1 %v11178_v16  ;;  %5585 = vmatprep.mubr.bf16.mxu1 %v10299_v27  ;;  %v11185_v27 = vpack.c.bf16 %v10399_v35, %v10394_v12  ;;  %v11191_v12 = vpack.c.bf16 %v10471_v60, %v10466_v43  ;;  %v11192_v35 = vpack.c.bf16 %v10500_v23, %v10490_v18  ;;  %v7667_v60 = vld [vmem:[%s11028_s8 + $0x40] sm:$0xff]  }
 0x6c4   : > { %6624 = vmatprep.subr.bf16.mxu1 %v11179_v31  ;;  %v7668_v18 = vld [vmem:[%s11028_s8] sm:$0xff]  }
 0x6c5   : > { %v7669_v23 = vld [vmem:[%s11028_s8 + $0x80] sm:$0xff]  }
 0x6c6   : > { %5910 = vmatpush1.bf16.msra.mxu0 %v7669_v23 }
 0x6c7   : > { %6625 = vmatpush3.bf16.msra.mxu1 %v11180_v63  ;;  %5911 = vmatprep.subr.bf16.mxu0 %v11109_v45 }
 0x6c8   : > { %6626 = vmatprep.subr.bf16.mxu1 %v11181_v40 }
 0x6cb   : > { %6627 = vmatpush3.bf16.msra.mxu1 %v11182_v24 }
 0x6cc   : > { %6628 = vmatprep.subr.bf16.mxu1 %v11184_v61 }
 0x6cf   : > { %6629 = vmatpush3.bf16.msra.mxu1 %v11185_v27 }
 0x6d0   : > { %6630 = vmatprep.subr.bf16.mxu1 %v11188_v21 }
 0x6d3   : > { %6631 = vmatpush3.bf16.msra.mxu1 %v11189_v7 }
 0x6d4   : > { %6632 = vmatprep.subr.bf16.mxu1 %v5550_v55  ;;  %v7670_v55 = vld [vmem:[%s11028_s8 + $0x48] sm:$0xff]  }
 0x6d7   : > { %6633 = vmatpush3.bf16.msra.mxu1 %v11190_v59 }
 0x6d8   : > { %6634 = vmatprep.subr.bf16.mxu1 %v5551_v50  ;;  %v7673_v50 = vld [vmem:[%s11028_s8 + $0x50] sm:$0xff]  }
 0x6db   : > { %6635 = vmatpush3.bf16.msra.mxu1 %v11191_v12  ;;  %v7692_v12 = vld [vmem:[%s11030_s10] sm:$0xff]  }
 0x6dc   : > { %6636 = vmatprep.subr.bf16.mxu1 %v5552_v41 }
 0x6df   : > { %6637 = vmatpush3.bf16.msra.mxu1 %v11192_v35 }
 0x6e0   : > { %6666 = vmatprep.subr.bf16.mxu1 %v7667_v60  ;;  %v7702_v60 = vld [vmem:[%s11032_s12 + $0x10] sm:$0xff]  }
 0x6e2   : > { %5586 = vmatmul.mubr.bf16.vlgmr.msra.gmra.mrb[140].mxu1 %v10660_v46  ;;  %v7672_v46 = vld [vmem:[%s11028_s8 + $0x88] sm:$0xff]  }
 0x6e3   : > { %6667 = vmatpush3.bf16.msra.mxu1 %v7668_v18  ;;  %5912 = vmatpush1.bf16.msra.mxu0 %v7672_v46  ;;  %v7703_v18 = vld [vmem:[%s11032_s12 + $0x18] sm:$0xff]  }
 0x6e4   : > { %6668 = vmatprep.subr.bf16.mxu1 %v7670_v55  ;;  %5913 = vmatprep.subr.bf16.mxu0 %v11109_v45 }
 0x6e7   : > { %6669 = vmatpush3.bf16.msra.mxu1 %v7671_v39  ;;  %5914 = vmatpush1.bf16.msra.mxu0 %v7675_v28 }
 0x6e8   : > { %6670 = vmatprep.subr.bf16.mxu1 %v7673_v50  ;;  %5915 = vmatprep.subr.bf16.mxu0 %v11109_v45  ;;  %v6507_v50 = vld [vmem:[%s11029_s9] ss:$0 sm:$0xff] }
 0x6eb   : > { %6671 = vmatpush3.bf16.msra.mxu1 %v7674_v20  ;;  %5916 = vmatpush1.bf16.msra.mxu0 %v7678_v44 }
 0x6ec   : > { %6672 = vmatprep.subr.bf16.mxu1 %v7676_v36  ;;  %5917 = vmatprep.subr.bf16.mxu0 %v11109_v45 }
 0x6ef   : > { %6673 = vmatpush3.bf16.msra.mxu1 %v7677_v33  ;;  %5918 = vmatpush1.bf16.msra.mxu0 %v7681_v2  ;;  %v7704_v33 = vld [vmem:[%s11032_s12 + $0x20] sm:$0xff]  }
 0x6f0   : > { %6674 = vmatprep.subr.bf16.mxu1 %v7679_v15  ;;  %5919 = vmatprep.subr.bf16.mxu0 %v11109_v45  ;;  %v7705_v15 = vld [vmem:[%s11032_s12 + $0x28] ss:$0 sps:$4 sm:$0x33]  }
 0x6f1   : > { %v6122_v2 = vsel %vm2831_vm8, %v7705_v15, 0 }
 0x6f3   : > { %6675 = vmatpush3.bf16.msra.mxu1 %v7680_v19  ;;  %5920 = vmatpush1.bf16.msra.mxu0 %v7684_v14  ;;  %v6534_v19 = vld [vmem:[%s11031_s11] ss:$0 sm:$0xff] }
 0x6f4   : > { %6676 = vmatprep.subr.bf16.mxu1 %v7682_v34  ;;  %5921 = vmatprep.subr.bf16.mxu0 %v11109_v45 }
 0x6f7   : > { %6677 = vmatpush3.bf16.msra.mxu1 %v7683_v0  ;;  %5922 = vmatpush1.bf16.msra.mxu0 %v7687_v29 }
 0x6f8   : > { %6678 = vmatprep.subr.bf16.mxu1 %v7685_v32  ;;  %5923 = vmatprep.subr.bf16.mxu0 %v11109_v45 }
 0x6fb   : > { %6679 = vmatpush3.bf16.msra.mxu1 %v7686_v17  ;;  %5924 = vmatpush1.bf16.msra.mxu0 %v7690_v48 }
 0x6fc   : > { %5925 = vmatprep.subr.bf16.mxu0 %v11109_v45  ;;  %6680 = vmatprep.subr.bf16.mxu1 %v7688_v51 }
 0x6ff   : > { %5926 = vmatpush1.bf16.msra.mxu0 %v7691_v8  ;;  %6681 = vmatpush3.bf16.msra.mxu1 %v7689_v10 }
 0x700   : > { %6704 = vmatprep.subr.bf16.mxu1 %v7913_v54  ;;  %6724 = vmatprep.subr.bf16.mxu0 %v7913_v54 }
 0x755   : > { %v6572_v13 = vpop.f32.mrb[128].mxu1 }
 0x756   : > { %v6573_v53 = vpop.f32.mrb[129].mxu1 }
 0x757   : > { %v10808_v47 = vadd.f32 %v6573_v53, %v6572_v13  ;;  %v6575_v52 = vpop.f32.mrb[130].mxu1  ;;  %v7693_v13 = vld [vmem:[%s11030_s10 + $0x8] sm:$0xff]   ;;  %v7694_v53 = vld [vmem:[%s11030_s10 + $0x10] sm:$0xff]  }
 0x758   : > { %v6576_v11 = vpop.f32.mrb[131].mxu1  ;;  %v7696_v52 = vld [vmem:[%s11030_s10 + $0x20] sm:$0xff]  }
 0x759   : > { %v6660_v26 = vpop.f32.mrb[0].mxu0  ;;  %v7697_v11 = vld [vmem:[%s11030_s10 + $0x28] sm:$0xff]  }
 0x75a   : > { %v6661_v4 = vpop.f32.mrb[1].mxu0 }
 0x75b   : > { %v10810_v6 = vadd.f32 %v6661_v4, %v6660_v26  ;;  %v6663_v49 = vpop.f32.mrb[2].mxu0  ;;  %v7698_v26 = vld [vmem:[%s11030_s10 + $0x30] sm:$0xff]   ;;  %v7699_v4 = vld [vmem:[%s11030_s10 + $0x38] ss:$0 sps:$4 sm:$0xff]  }
 0x75c   : > { %v6664_v43 = vpop.f32.mrb[3].mxu0  ;;  %v7700_v49 = vld [vmem:[%s11032_s12] sm:$0xff]  }
 0x75d   : > { %v7701_v43 = vld [vmem:[%s11032_s12 + $0x8] sm:$0xff]  }
 0x775   : > { %v6594_v3 = vpop.f32.mrb[132].mxu1 }
 0x776   : > { %v6595_v5 = vpop.f32.mrb[133].mxu1 }
 0x777   : > { %v6596_v22 = vadd.f32 %v6595_v5, %v6594_v3  ;;  %v6597_v25 = vpop.f32.mrb[134].mxu1 }
 0x778   : > { %v6598_v30 = vpop.f32.mrb[135].mxu1 }
 0x779   : > { %5634 = vrot.lane.b32.xlu0 %v6596_v22, %s7912_s21  ;;  %s6176_s21 = scalar_lea.sflag [#allocation4], %s503_s14 }
 0x795   : > { %v6616_v1 = vpop.f32.mrb[136].mxu1 }
 0x796   : > { %v6617_v42 = vpop.f32.mrb[137].mxu1 }
 0x797   : > { %v6618_v37 = vadd.f32 %v6617_v42, %v6616_v1  ;;  %v6619_v58 = vpop.f32.mrb[138].mxu1  ;;  %v6544_v42 = vld [vmem:[%s11033_s13] ss:$0 sm:$0xff] }
 0x798   : > { %v6620_v56 = vpop.f32.mrb[139].mxu1 }
 0x799   : > { %5638 = vrot.lane.b32.xlu1 %v6618_v37, %s7905_s23  ;;  %s7832_s23 = scalar_lea.vmem %s7831_s27, 256 }
 0x79a   : > { %p7834_p7 = scmp.lt.s32.totalorder %s7832_s23, %s7826_s22 }
 0x79c   : > { %p7835_p8 = por %p7834_p7, %p7833_p4 }
 0x79d   : > { %5646 = vrot.lane.b32.xlu1 %v10810_v6, %s7907_s15  ;;  %s7914_s15 = smov 112   ;;  %v6023_v6 = vsel %vm778_vm3, %v7699_v4, 0 }
 0x79e   : > { %p7836_p11 = pnand %p7835_p8, %p7829_p3 }
 0x7b5   : > { %v6638_v45 = vpop.f32.mrb[140].mxu1 }
 0x7b6   : > { %v6639_v9 = vpop.f32.mrb[141].mxu1 }
 0x7b7   : > { %v6640_v16 = vadd.f32 %v6639_v9, %v6638_v45  ;;  %v6641_v31 = vpop.f32.mrb[142].mxu1 }
 0x7b8   : > { %v6642_v63 = vpop.f32.mrb[143].mxu1 }
 0x7b9   : > { %5642 = vrot.lane.b32.xlu0 %v6640_v16, %s7914_s15 }
 0x7eb   : > { %v5635_v61 = vpop.permute.xlu0 %5634 }
 0x7ec   : > { %v5649_v27 = vsel %vm3383_vm12, %v10808_v47, %v5635_v61  ;;  %v7695_v47 = vld [vmem:[%s11030_s10 + $0x18] sm:$0xff]  }
 0x7ed   : > { %v5704_v35 = vpack.c.bf16 %v5649_v27, %v5649_v27 }
 0x80b   : > { %v5639_v40 = vpop.permute.xlu1 %5638 }
 0x80c   : > { %v5650_v57 = vsel %vm1167_vm4, %v5635_v61, %v5639_v40 }
 0x80f   : > { %v5647_v24 = vpop.permute.xlu1 %5646 }
 0x810   : > { %v5707_v38 = vpack.c.bf16 %v5647_v24, %v5647_v24 }
 0x812   : > { %6533 = vmatprep.mubr.msk.bf16.mxu0 %vm5865_vm13, %v5707_v38 }
 0x82b   : > { %v5643_v62 = vpop.permute.xlu0 %5642 }
 0x82c   : > { %v5652_v21 = vsel %vm5651_vm14, %v5650_v57, %v5643_v62  ;;  %v5653_v7 = vsel %vm1200_vm5, %v5643_v62, %v5647_v24 }
 0x82d   : > { %v5705_v59 = vpack.c.bf16 %v5652_v21, %v5652_v21  ;;  %v5706_v41 = vpack.c.bf16 %v5653_v7, %v5653_v7 }
 0x82f   : > { %5901 = vmatprep.mubr.bf16.mxu1 %v5705_v59  ;;  %5942 = vmatmul.mubr.bf16.vlgmr.msra.gmra.mrb[4].mxu0 %v5706_v41 }
 0x830   : > { %5902 = vmatmul.mubr.bf16.vlgmr.msra.gmra.mrb[144].mxu1 %v5704_v35  ;;  %6736 = vmatprep.mubr.msk.bf16.mxu0 %vm7915_vm15, %v7913_v54 }
 0x831   : > { %6705 = vmatpush3.bf16.msra.mxu1 %v7692_v12  ;;  %6720 = vmatprep.mubr.msk.bf16.mxu1 %vm7915_vm15, %v7913_v54 }
 0x832   : > { %6706 = vmatprep.subr.bf16.mxu1 %v7913_v54  ;;  %6725 = vmatpush3.bf16.msra.mxu0 %v7700_v49 }
 0x833   : > { %6726 = vmatprep.subr.bf16.mxu0 %v7913_v54 }
 0x835   : > { %6707 = vmatpush3.bf16.msra.mxu1 %v7693_v13 }
 0x836   : > { %6708 = vmatprep.subr.bf16.mxu1 %v7913_v54  ;;  %6727 = vmatpush3.bf16.msra.mxu0 %v7701_v43 }
 0x837   : > { %6728 = vmatprep.subr.bf16.mxu0 %v7913_v54 }
 0x839   : > { %6709 = vmatpush3.bf16.msra.mxu1 %v7694_v53 }
 0x83a   : > { %6710 = vmatprep.subr.bf16.mxu1 %v7913_v54  ;;  %6729 = vmatpush3.bf16.msra.mxu0 %v7702_v60 }
 0x83b   : > { %6730 = vmatprep.subr.bf16.mxu0 %v7913_v54 }
 0x83d   : > { %6711 = vmatpush3.bf16.msra.mxu1 %v7695_v47 }
 0x83e   : > { %6712 = vmatprep.subr.bf16.mxu1 %v7913_v54  ;;  %6731 = vmatpush3.bf16.msra.mxu0 %v7703_v18 }
 0x83f   : > { %6732 = vmatprep.subr.bf16.mxu0 %v7913_v54 }
 0x841   : > { %6713 = vmatpush3.bf16.msra.mxu1 %v7696_v52 }
 0x842   : > { %6714 = vmatprep.subr.bf16.mxu1 %v7913_v54  ;;  %6733 = vmatpush3.bf16.msra.mxu0 %v7704_v33 }
 0x843   : > { %6734 = vmatprep.subr.bf16.mxu0 %v7913_v54 }
 0x845   : > { %6715 = vmatpush3.bf16.msra.mxu1 %v7697_v11 }
 0x846   : > { %6716 = vmatprep.subr.bf16.mxu1 %v7913_v54  ;;  %6735 = vmatpush3.bf16.msra.mxu0 %v6122_v2 }
 0x849   : > { %6717 = vmatpush3.bf16.msra.mxu1 %v7698_v26 }
 0x84a   : > { %6718 = vmatprep.subr.bf16.mxu1 %v7913_v54 }
 0x84d   : > { %6719 = vmatpush3.bf16.msra.mxu1 %v6023_v6 }
 0x902   : > { %v5943_v23 = vpop.f32.mrb[4].mxu0 }
 0x903   : > { %v6682_v55 = vpop.f32.mrb[144].mxu1  ;;  %v5945_v46 = vpop.f32.mrb[5].mxu0 }
 0x904   : > { %v6683_v39 = vpop.f32.mrb[145].mxu1  ;;  %v5946_v28 = vpop.f32.mrb[6].mxu0 }
 0x905   : > { %v6684_v20 = vadd.f32 %v6683_v39, %v6682_v55  ;;  %v6685_v3 = vpop.f32.mrb[146].mxu1  ;;  %v5947_v36 = vpop.f32.mrb[7].mxu0 }
 0x906   : > { %v6686_v5 = vpop.f32.mrb[147].mxu1 }
 0x907   : > { %v5904_v22 = vadd.f32 %v6684_v20, %v6507_v50 }
 0x909   : > { %v5944_v25 = vadd.f32 %v5943_v23, %v5904_v22 }
 0x90b   : > { %v5949_v44 = vmax.f32 %v5944_v25, 0.0 }
 0x90d   : > { %v5965_v30 = vpack.c.bf16 %v5949_v44, %v5949_v44 }
 0x90f   : > { %6721 = vmatmul.mubr.msk.bf16.vlgmr.msra.gmra.mrb[148].mxu1 %vm6018_vm0, %v5965_v30 }
 0x9e2   : > { %v6059_v34 = vpop.f32.mrb[148].mxu1 }
 0x9e3   : > { %v6060_v14 = vadd.f32 %v6534_v19, %v6059_v34  ;;  %v6722_v0 = vpop.f32.mrb[149].mxu1 }
 0x9e4   : > { %v6062_v32 = vpop.f32.mrb[150].mxu1 }
 0x9e5   : > { %v6065_v29 = vmax.f32 %v6060_v14, 0.0  ;;  %v6723_v17 = vpop.f32.mrb[151].mxu1 }
 0x9e7   : > { %v6077_v1 = vpack.c.bf16 %v6065_v29, %v6065_v29 }
 0x9e9   : > { %6737 = vmatmul.mubr.msk.bf16.vlgmr.msra.gmra.mrb[8].mxu0 %vm3285_vm9, %v6077_v1 }
 0xabc   : > { %v6158_v37 = vpop.f32.mrb[8].mxu0 }
 0xabd   : > { %v6159_v58 = vadd.f32 %v6544_v42, %v6158_v37  ;;  %v6738_v56 = vpop.f32.mrb[9].mxu0 }
 0xabe   : > { %v6161_v48 = vpop.f32.mrb[10].mxu0 }
 0xabf   : > { %6164 = vmax.xlane.f32.xlu0 %v6159_v58  ;;  %v6739_v51 = vpop.f32.mrb[11].mxu0 }
 0xb4c   : > { %v6165_v8 = vpop.xlane.xlu0 %6164 }
 0xb4d   : > { %v6166_v10 = vsub.f32 %v6159_v58, %v6165_v8 }
 0xb4f   : > { %v6167_v54 = vmul.f32 1.442695, %v6166_v10 }
 0xb51   : > { %7706 = vpow2.f32 %v6167_v54 }
 0xb5b   : > { %v7707_v45 = vpop.eup %7706 }
 0xb5c   : > { %6169 = vadd.xlane.f32.xlu1 %v7707_v45 }
 0xbe9   : > { %v6170_v9 = vpop.xlane.xlu1 %6169 }
 0xbea   : > { %7708 = vlog2.f32 %v6170_v9 }
 0xbf4   : > { %v7709_v16 = vpop.eup %7708 }
 0xbf5   : > { %v6172_v31 = vmul.f32 0.6931472, %v7709_v16 }
 0xbf7   : > { %v6173_v63 = vsub.f32 %v6166_v10, %v6172_v31 }
 0xbf9   : > { %6174 = vst [vmem:[%s505_s28] sm:$0xff] %v6173_v63 }
 0xbfa   : > { %7839 = shalt.err (!%p7836_p11)
}
 0xbfb   : > { %s7840_s15 = scalar_lea.hbm %s10978_s29, 128  ;;  %s7844_s3 = scalar_lea.hbm %s11196_s18, 256 }
 0xbfc   : > { %p7841_p5 = scmp.ne.s32.totalorder %s10978_s29, %s7840_s15  ;;  %p7845_p9 = scmp.lt.u32.totalorder %s10978_s29, %s11196_s18 }
 0xbfd   : > { %p7846_p10 = scmp.lt.u32.totalorder %s7844_s3, %s7840_s15  ;;  %p7848_p12 = scmp.lt.u32.totalorder %s7840_s15, %s10978_s29 }
 0xbfe   : > { %p7842_p0 = pnand %p7841_p5, %p11197_p1 }
 0xbff   : > { %p7847_p13 = por %p7846_p10, %p7845_p9 }
 0xc00   : > { %p7843_p6 = pneg %p7842_p0 }
 0xc01   : > { %p7849_p2 = por %p7848_p12, %p7847_p13 }
 0xc03   : > { %p7850_p3 = pnand %p7849_p2, %p7843_p6 }
 0xc05   : > { %7853 = shalt.err (!%p7850_p3)
}
 0xc06   : > { %6880 = dma.vmem_to_hbm [thread:$0]  (%p11197_p1), %s10980_s26, 128, %s10978_s29, %s6176_s21  }
 0xc07 PF: > { %s11198_s30 = sld [smem:[#allocation15_spill]]  ;;  %s11199_s25 = sld [smem:[#allocation12_spill]] }
 0xc08   : > { %s11200_s16 = sld [smem:[#allocation19_spill]] }
 0xc0d   : > { %p6902_p4 = scmp.ge.s32.totalorder %s11198_s30, 2  ;;  %s6201_s22 = sand.u32 1, %s11199_s25  }
 0xc0e   : > { %p11201_p7 = scmp.ne.s32.totalorder %s11200_s16, 0  ;;  %s6202_s17 = scalar_lea.sflag [#allocation4], %s6201_s22 }
 0xc10   : > { %p6893_p8 = pnand %p6902_p4, %p11201_p7 }
 0xc12   : > { %7879 = dma.done.wait (!%p6893_p8), %s6202_s17, 128  }
 0xc13   : > { %7881 = vsyncadd (!%p6893_p8), %s6202_s17, 4294967168  ;;  %s11202_s16 = sld [smem:[#allocation16_spill]]  ;;  %s11203_s29 = sld [smem:[#allocation13_spill]] }
 0xc14   : > { %s11204_s30 = sld [smem:[#allocation14_spill]]  ;;  %s11205_s15 = sld [smem:[#allocation17_spill]] }
 0xc19   : > { %p26_p11 = scmp.ge.s32.totalorder %s11202_s16, 4  }
 0xc1b   :  { %28 = sbr.rel (!%p26_p11) target bundleno = 8 (0x8), region = 126 }
 0xc22   :  { %6207 = vsyncpa [#allocation3], 1 }
 0xc23   :  { %6209 = vsyncpa [#allocation3 + $0x1], 1 }
 0xc24   :  { %6210 = vsyncpa [#allocation6], 1 }
 0xc25   :  { %6211 = vsyncpa [#allocation4], 1 }
 0xc26   :  { %6213 = vsyncpa [#allocation4 + $0x1], 1 }

</bundles_post_ra>
